<compile_context>
chip_gen: v5e
topology: v5e:2x2
jax: 0.10.0
libtpu: 0.0.40
codegen_flags: <defaults>
</compile_context>

<pallas_src>
import functools

import jax
import jax.numpy as jnp
from jax import lax
from jax.experimental import pallas as pl
from jax.experimental.pallas import tpu as pltpu

BN_EPS = 1e-5

_COMPILER_PARAMS = pltpu.CompilerParams(
    dimension_semantics=("parallel",),          # batch axis: shard across TCs on v7x
    vmem_limit_bytes=32 * 1024 * 1024,          # explicit, fits v7x's 64 MiB physical VMEM
)


def _conv_stats_kernel(xp_ref, w_ref, o_ref, sum_ref, sq_ref, *, H, W):
    """3x3 SAME conv (taps fused along K) + per-image BN partial stats, one image per grid step.

    xp_ref : (1, H+2, W+2, Cin)   spatially padded image
    w_ref  : (9*Cin, Cout)        fused conv taps, row index = (ky*3+kx)*Cin + c
    o_ref  : (1, H*W, Cout)       raw conv output (pre-BN, no bias: BN cancels it exactly)
    sum_ref, sq_ref : (1, 1, Cout) per-image channel sum / sum-of-squares
    """
    xp = xp_ref[0]                       # (H+2, W+2, Cin)
    Cin = xp.shape[-1]

    # im2col with all 9 taps fused along the contraction dim -> a single MXU matmul
    # (K = 9*Cin instead of nine K=Cin pushes + eight VPU adds).
    cols = [
        xp[ky:ky + H, kx:kx + W, :].reshape(H * W, Cin)
        for ky in range(3) for kx in range(3)
    ]
    patches = jnp.concatenate(cols, axis=1)                    # (H*W, 9*Cin)
    y = jnp.dot(patches, w_ref[...], preferred_element_type=jnp.float32)  # (H*W, Cout)

    o_ref[0] = y
    # One-pass BN statistics (f32 accumulation); finalized across images in the wrapper.
    sum_ref[0] = jnp.sum(y, axis=0, keepdims=True)             # (1, Cout)
    sq_ref[0] = jnp.sum(y * y, axis=0, keepdims=True)          # (1, Cout)


def _bn_relu_kernel(x_ref, scale_ref, shift_ref, o_ref):
    """Lane-dense elementwise normalize + ReLU.

    x_ref     : (1, H, W*Cout)  conv output, channels folded into the lane dim
    scale_ref : (1, 1, W*Cout)  gamma * rsqrt(var+eps), tiled over W
    shift_ref : (1, 1, W*Cout)  beta - mean*scale,      tiled over W
    """
    o_ref[...] = jnp.maximum(x_ref[...] * scale_ref[...] + shift_ref[...], 0.0)


def _conv_bn_relu_stage(x_nhwc, w_fused, gamma, beta):
    """x_nhwc: (N,H,W,Cin) f32; w_fused: (9*Cin,Cout); gamma/beta: (Cout,)."""
    N, H, W, Cin = x_nhwc.shape
    Cout = w_fused.shape[-1]

    xp = jnp.pad(x_nhwc, ((0, 0), (1, 1), (1, 1), (0, 0)))  # SAME padding halo

    conv_kernel = functools.partial(_conv_stats_kernel, H=H, W=W)
    conv_flat, s1, s2 = pl.pallas_call(
        conv_kernel,
        grid=(N,),
        in_specs=[
            pl.BlockSpec((1, H + 2, W + 2, Cin), lambda n: (n, 0, 0, 0)),
            pl.BlockSpec((9 * Cin, Cout), lambda n: (0, 0)),
        ],
        out_specs=(
            pl.BlockSpec((1, H * W, Cout), lambda n: (n, 0, 0)),
            pl.BlockSpec((1, 1, Cout), lambda n: (n, 0, 0)),
            pl.BlockSpec((1, 1, Cout), lambda n: (n, 0, 0)),
        ),
        out_shape=(
            jax.ShapeDtypeStruct((N, H * W, Cout), jnp.float32),
            jax.ShapeDtypeStruct((N, 1, Cout), jnp.float32),
            jax.ShapeDtypeStruct((N, 1, Cout), jnp.float32),
        ),
        compiler_params=_COMPILER_PARAMS,
    )(xp, w_fused)

    # Finalize train-mode BatchNorm statistics (biased variance) over (N, H, W): O(Cout) work.
    count = float(N * H * W)
    mean = jnp.sum(s1[:, 0, :], axis=0) / count
    var = jnp.sum(s2[:, 0, :], axis=0) / count - mean * mean
    var = jnp.maximum(var, 0.0)
    scale = gamma * lax.rsqrt(var + BN_EPS)
    shift = beta - mean * scale

    # Lane-dense views: channels folded into the lane dim (last dim = W*Cout >= 64).
    scale_t = jnp.tile(scale, W).reshape(1, 1, W * Cout)
    shift_t = jnp.tile(shift, W).reshape(1, 1, W * Cout)
    conv_ld = conv_flat.reshape(N, H, W * Cout)   # contiguous (free) reshape

    y = pl.pallas_call(
        _bn_relu_kernel,
        grid=(N,),
        in_specs=[
            pl.BlockSpec((1, H, W * Cout), lambda n: (n, 0, 0)),
            pl.BlockSpec((1, 1, W * Cout), lambda n: (0, 0, 0)),
            pl.BlockSpec((1, 1, W * Cout), lambda n: (0, 0, 0)),
        ],
        out_specs=pl.BlockSpec((1, H, W * Cout), lambda n: (n, 0, 0)),
        out_shape=jax.ShapeDtypeStruct((N, H, W * Cout), jnp.float32),
        compiler_params=_COMPILER_PARAMS,
    )(conv_ld, scale_t, shift_t)

    return y.reshape(N, H, W, Cout)


def make_vgg_block_params(key, in_channels, middle_channels, out_channels):
    """Deterministic synthetic parameters (PyTorch Conv2d init; weights stored as fused taps)."""
    k1, k2, k3, k4 = jax.random.split(key, 4)

    def conv_w(k, cin, cout):
        bound = 1.0 / (cin * 9) ** 0.5
        w = jax.random.uniform(k, (cout, cin, 3, 3), jnp.float32, -bound, bound)
        # (Cout,Cin,3,3) -> (3,3,Cin,Cout) -> (9*Cin, Cout); row = (ky*3+kx)*Cin + c
        return jnp.transpose(w, (2, 3, 1, 0)).reshape(9 * cin, cout)

    def conv_b(k, cin, cout):
        bound = 1.0 / (cin * 9) ** 0.5
        return jax.random.uniform(k, (cout,), jnp.float32, -bound, bound)

    return {
        "w1": conv_w(k1, in_channels, middle_channels),
        "b1": conv_b(k2, in_channels, middle_channels),   # used by reference only (BN cancels it)
        "gamma1": jnp.ones((middle_channels,), jnp.float32),
        "beta1": jnp.zeros((middle_channels,), jnp.float32),
        "w2": conv_w(k3, middle_channels, out_channels),
        "b2": conv_b(k4, middle_channels, out_channels),  # used by reference only (BN cancels it)
        "gamma2": jnp.ones((out_channels,), jnp.float32),
        "beta2": jnp.zeros((out_channels,), jnp.float32),
    }


@jax.jit
def vgg_block_forward(x_nchw, params):
    # PyTorch-style NCHW in/out; compute in NHWC.
    x = jnp.transpose(x_nchw, (0, 2, 3, 1)).astype(jnp.float32)
    h = _conv_bn_relu_stage(x, params["w1"], params["gamma1"], params["beta1"])
    y = _conv_bn_relu_stage(h, params["w2"], params["gamma2"], params["beta2"])
    return jnp.transpose(y, (0, 3, 1, 2))


def _reference_forward(x_nchw, params):
    """Pure-JAX reference with the PyTorch semantics (conv + bias -> train-mode BN -> ReLU)."""
    def stage(x, w_fused, b, g, be):
        kdim, cout = w_fused.shape
        cin = kdim // 9
        w = w_fused.reshape(3, 3, cin, cout)   # HWIO
        y = lax.conv_general_dilated(
            x, w, window_strides=(1, 1), padding="SAME",
            dimension_numbers=("NHWC", "HWIO", "NHWC"))
        y = y + b
        mean = jnp.mean(y, axis=(0, 1, 2), keepdims=True)
        var = jnp.mean((y - mean) ** 2, axis=(0, 1, 2), keepdims=True)
        y = (y - mean) * lax.rsqrt(var + BN_EPS) * g + be
        return jnp.maximum(y, 0.0)

    x = jnp.transpose(x_nchw, (0, 2, 3, 1)).astype(jnp.float32)
    h = stage(x, params["w1"], params["b1"], params["gamma1"], params["beta1"])
    y = stage(h, params["w2"], params["b2"], params["gamma2"], params["beta2"])
    return jnp.transpose(y, (0, 3, 1, 2))


if __name__ == "__main__":
    key = jax.random.PRNGKey(0)
    kx_, kp = jax.random.split(key)

    N, Cin, Cmid, Cout, H, W = 2, 4, 8, 4, 16, 16
    x = jax.random.normal(kx_, (N, Cin, H, W), jnp.float32)
    params = make_vgg_block_params(kp, Cin, Cmid, Cout)

    out = jax.block_until_ready(vgg_block_forward(x, params))
    ref = jax.block_until_ready(_reference_forward(x, params))

    assert out.shape == (N, Cout, H, W)
    assert jnp.max(jnp.abs(out - ref)) < 2e-4

    print("KERNEL_OK")
</pallas_src>

<mosaic_0001>
module attributes {stable_mosaic.version = 11 : i64} {
  func.func @_conv_stats_kernel(%arg0: i32, %arg1: memref<1x18x18x4xf32, #tpu.memory_space<vmem>>, %arg2: memref<36x8xf32, #tpu.memory_space<vmem>>, %arg3: memref<1x256x8xf32, #tpu.memory_space<vmem>>, %arg4: memref<1x1x8xf32, #tpu.memory_space<vmem>>, %arg5: memref<1x1x8xf32, #tpu.memory_space<vmem>>) attributes {dimension_semantics = [#tpu.dimension_semantics<parallel>], iteration_bounds = array<i64: 2>, scalar_prefetch = 0 : i64, scratch_operands = 0 : i64, tpu.core_type = #tpu.core_type<tc>, window_params = [{transform_indices = @transform_0, window_bounds = array<i64: 1, 18, 18, 4>}, {pipeline_mode = #tpu.pipeline_mode<synchronous>, transform_indices = @transform_1, window_bounds = array<i64: 36, 8>}, {transform_indices = @transform_2, window_bounds = array<i64: 1, 256, 8>}, {transform_indices = @transform_3, window_bounds = array<i64: 1, 1, 8>}, {transform_indices = @transform_4, window_bounds = array<i64: 1, 1, 8>}]} {
    %c0 = arith.constant 0 : index
    %c0_0 = arith.constant 0 : index
    %c0_1 = arith.constant 0 : index
    %c0_2 = arith.constant 0 : index
    %0 = vector.load %arg1[%c0, %c0_0, %c0_1, %c0_2] : memref<1x18x18x4xf32, #tpu.memory_space<vmem>>, vector<1x18x18x4xf32>
    %1 = vector.shape_cast %0 : vector<1x18x18x4xf32> to vector<18x18x4xf32>
    %2 = vector.extract_strided_slice %1 {offsets = [0, 0, 0], sizes = [16, 16, 4], strides = [1, 1, 1]} : vector<18x18x4xf32> to vector<16x16x4xf32>
    %3 = vector.shape_cast %2 : vector<16x16x4xf32> to vector<256x4xf32>
    %4 = vector.extract_strided_slice %1 {offsets = [0, 1, 0], sizes = [16, 16, 4], strides = [1, 1, 1]} : vector<18x18x4xf32> to vector<16x16x4xf32>
    %5 = vector.shape_cast %4 : vector<16x16x4xf32> to vector<256x4xf32>
    %6 = vector.extract_strided_slice %1 {offsets = [0, 2, 0], sizes = [16, 16, 4], strides = [1, 1, 1]} : vector<18x18x4xf32> to vector<16x16x4xf32>
    %7 = vector.shape_cast %6 : vector<16x16x4xf32> to vector<256x4xf32>
    %8 = vector.extract_strided_slice %1 {offsets = [1, 0, 0], sizes = [16, 16, 4], strides = [1, 1, 1]} : vector<18x18x4xf32> to vector<16x16x4xf32>
    %9 = vector.shape_cast %8 : vector<16x16x4xf32> to vector<256x4xf32>
    %10 = vector.extract_strided_slice %1 {offsets = [1, 1, 0], sizes = [16, 16, 4], strides = [1, 1, 1]} : vector<18x18x4xf32> to vector<16x16x4xf32>
    %11 = vector.shape_cast %10 : vector<16x16x4xf32> to vector<256x4xf32>
    %12 = vector.extract_strided_slice %1 {offsets = [1, 2, 0], sizes = [16, 16, 4], strides = [1, 1, 1]} : vector<18x18x4xf32> to vector<16x16x4xf32>
    %13 = vector.shape_cast %12 : vector<16x16x4xf32> to vector<256x4xf32>
    %14 = vector.extract_strided_slice %1 {offsets = [2, 0, 0], sizes = [16, 16, 4], strides = [1, 1, 1]} : vector<18x18x4xf32> to vector<16x16x4xf32>
    %15 = vector.shape_cast %14 : vector<16x16x4xf32> to vector<256x4xf32>
    %16 = vector.extract_strided_slice %1 {offsets = [2, 1, 0], sizes = [16, 16, 4], strides = [1, 1, 1]} : vector<18x18x4xf32> to vector<16x16x4xf32>
    %17 = vector.shape_cast %16 : vector<16x16x4xf32> to vector<256x4xf32>
    %18 = vector.extract_strided_slice %1 {offsets = [2, 2, 0], sizes = [16, 16, 4], strides = [1, 1, 1]} : vector<18x18x4xf32> to vector<16x16x4xf32>
    %19 = vector.shape_cast %18 : vector<16x16x4xf32> to vector<256x4xf32>
    %20 = tpu.concatenate %3, %5, %7, %9, %11, %13, %15, %17, %19 in 1 : vector<256x4xf32>, vector<256x4xf32>, vector<256x4xf32>, vector<256x4xf32>, vector<256x4xf32>, vector<256x4xf32>, vector<256x4xf32>, vector<256x4xf32>, vector<256x4xf32> -> vector<256x36xf32>
    %c0_3 = arith.constant 0 : index
    %c0_4 = arith.constant 0 : index
    %21 = vector.load %arg2[%c0_3, %c0_4] : memref<36x8xf32, #tpu.memory_space<vmem>>, vector<36x8xf32>
    %cst = arith.constant dense<0.000000e+00> : vector<256x8xf32>
    %22 = tpu.matmul %20, %21, %cst {dimension_numbers = #tpu.dot_dimension_numbers<[1], [0], [0], [1], [0, 0, 1, 1], [], []>} : vector<256x36xf32>, vector<36x8xf32>, vector<256x8xf32> -> vector<256x8xf32>
    %c0_5 = arith.constant 0 : index
    %c0_6 = arith.constant 0 : index
    %c0_7 = arith.constant 0 : index
    %23 = vector.load %arg3[%c0_5, %c0_6, %c0_7] : memref<1x256x8xf32, #tpu.memory_space<vmem>>, vector<1x256x8xf32>
    %24 = vector.shape_cast %23 : vector<1x256x8xf32> to vector<256x8xf32>
    %25 = vector.shape_cast %22 : vector<256x8xf32> to vector<1x256x8xf32>
    tpu.vector_store %arg3[%c0_5, %c0_6, %c0_7], %25 {strides = array<i32>} : memref<1x256x8xf32, #tpu.memory_space<vmem>>, vector<1x256x8xf32>,
    %cst_8 = arith.constant dense<0.000000e+00> : vector<8xf32>
    %26 = vector.multi_reduction <add>, %22, %cst_8 [0] : vector<256x8xf32> to vector<8xf32>
    %27 = vector.shape_cast %26 : vector<8xf32> to vector<1x8xf32>
    %c0_9 = arith.constant 0 : index
    %c0_10 = arith.constant 0 : index
    %c0_11 = arith.constant 0 : index
    %28 = vector.load %arg4[%c0_9, %c0_10, %c0_11] : memref<1x1x8xf32, #tpu.memory_space<vmem>>, vector<1x1x8xf32>
    %29 = vector.shape_cast %28 : vector<1x1x8xf32> to vector<1x8xf32>
    %30 = vector.shape_cast %27 : vector<1x8xf32> to vector<1x1x8xf32>
    tpu.vector_store %arg4[%c0_9, %c0_10, %c0_11], %30 {strides = array<i32>} : memref<1x1x8xf32, #tpu.memory_space<vmem>>, vector<1x1x8xf32>,
    %31 = arith.mulf %22, %22 : vector<256x8xf32>
    %cst_12 = arith.constant dense<0.000000e+00> : vector<8xf32>
    %32 = vector.multi_reduction <add>, %31, %cst_12 [0] : vector<256x8xf32> to vector<8xf32>
    %33 = vector.shape_cast %32 : vector<8xf32> to vector<1x8xf32>
    %c0_13 = arith.constant 0 : index
    %c0_14 = arith.constant 0 : index
    %c0_15 = arith.constant 0 : index
    %34 = vector.load %arg5[%c0_13, %c0_14, %c0_15] : memref<1x1x8xf32, #tpu.memory_space<vmem>>, vector<1x1x8xf32>
    %35 = vector.shape_cast %34 : vector<1x1x8xf32> to vector<1x8xf32>
    %36 = vector.shape_cast %33 : vector<1x8xf32> to vector<1x1x8xf32>
    tpu.vector_store %arg5[%c0_13, %c0_14, %c0_15], %36 {strides = array<i32>} : memref<1x1x8xf32, #tpu.memory_space<vmem>>, vector<1x1x8xf32>,
    return
  }
  func.func @transform_0(%arg0: i32) -> (i32, i32, i32, i32) {
    %c0_i32 = arith.constant 0 : i32
    %c0_i32_0 = arith.constant 0 : i32
    %c0_i32_1 = arith.constant 0 : i32
    %c0_i32_2 = arith.constant 0 : i32
    return %arg0, %c0_i32, %c0_i32_0, %c0_i32_1 : i32, i32, i32, i32
  }
  func.func @transform_1(%arg0: i32) -> (i32, i32) {
    %c0_i32 = arith.constant 0 : i32
    %c0_i32_0 = arith.constant 0 : i32
    %c0_i32_1 = arith.constant 0 : i32
    return %c0_i32, %c0_i32_0 : i32, i32
  }
  func.func @transform_2(%arg0: i32) -> (i32, i32, i32) {
    %c0_i32 = arith.constant 0 : i32
    %c0_i32_0 = arith.constant 0 : i32
    %c0_i32_1 = arith.constant 0 : i32
    return %arg0, %c0_i32, %c0_i32_0 : i32, i32, i32
  }
  func.func @transform_3(%arg0: i32) -> (i32, i32, i32) {
    %c0_i32 = arith.constant 0 : i32
    %c0_i32_0 = arith.constant 0 : i32
    %c0_i32_1 = arith.constant 0 : i32
    return %arg0, %c0_i32, %c0_i32_0 : i32, i32, i32
  }
  func.func @transform_4(%arg0: i32) -> (i32, i32, i32) {
    %c0_i32 = arith.constant 0 : i32
    %c0_i32_0 = arith.constant 0 : i32
    %c0_i32_1 = arith.constant 0 : i32
    return %arg0, %c0_i32, %c0_i32_0 : i32, i32, i32
  }
}

module attributes {stable_mosaic.version = 11 : i64} {
  func.func @_bn_relu_kernel(%arg0: i32, %arg1: memref<1x16x128xf32, #tpu.memory_space<vmem>>, %arg2: memref<1x1x128xf32, #tpu.memory_space<vmem>>, %arg3: memref<1x1x128xf32, #tpu.memory_space<vmem>>, %arg4: memref<1x16x128xf32, #tpu.memory_space<vmem>>) attributes {dimension_semantics = [#tpu.dimension_semantics<parallel>], iteration_bounds = array<i64: 2>, scalar_prefetch = 0 : i64, scratch_operands = 0 : i64, tpu.core_type = #tpu.core_type<tc>, window_params = [{transform_indices = @transform_0, window_bounds = array<i64: 1, 16, 128>}, {pipeline_mode = #tpu.pipeline_mode<synchronous>, transform_indices = @transform_1, window_bounds = array<i64: 1, 1, 128>}, {pipeline_mode = #tpu.pipeline_mode<synchronous>, transform_indices = @transform_2, window_bounds = array<i64: 1, 1, 128>}, {transform_indices = @transform_3, window_bounds = array<i64: 1, 16, 128>}]} {
    %c0 = arith.constant 0 : index
    %c0_0 = arith.constant 0 : index
    %c0_1 = arith.constant 0 : index
    %0 = vector.load %arg1[%c0, %c0_0, %c0_1] : memref<1x16x128xf32, #tpu.memory_space<vmem>>, vector<1x16x128xf32>
    %c0_2 = arith.constant 0 : index
    %c0_3 = arith.constant 0 : index
    %c0_4 = arith.constant 0 : index
    %1 = vector.load %arg2[%c0_2, %c0_3, %c0_4] : memref<1x1x128xf32, #tpu.memory_space<vmem>>, vector<1x1x128xf32>
    %2 = vector.broadcast %1 : vector<1x1x128xf32> to vector<1x16x128xf32>
    %3 = arith.mulf %0, %2 : vector<1x16x128xf32>
    %c0_5 = arith.constant 0 : index
    %c0_6 = arith.constant 0 : index
    %c0_7 = arith.constant 0 : index
    %4 = vector.load %arg3[%c0_5, %c0_6, %c0_7] : memref<1x1x128xf32, #tpu.memory_space<vmem>>, vector<1x1x128xf32>
    %5 = vector.broadcast %4 : vector<1x1x128xf32> to vector<1x16x128xf32>
    %6 = arith.addf %3, %5 : vector<1x16x128xf32>
    %cst = arith.constant 0.000000e+00 : f32
    %7 = vector.broadcast %cst : f32 to vector<1x16x128xf32>
    %8 = arith.maximumf %6, %7 : vector<1x16x128xf32>
    %c0_8 = arith.constant 0 : index
    %c0_9 = arith.constant 0 : index
    %c0_10 = arith.constant 0 : index
    %9 = vector.load %arg4[%c0_8, %c0_9, %c0_10] : memref<1x16x128xf32, #tpu.memory_space<vmem>>, vector<1x16x128xf32>
    tpu.vector_store %arg4[%c0_8, %c0_9, %c0_10], %8 {strides = array<i32>} : memref<1x16x128xf32, #tpu.memory_space<vmem>>, vector<1x16x128xf32>,
    return
  }
  func.func @transform_0(%arg0: i32) -> (i32, i32, i32) {
    %c0_i32 = arith.constant 0 : i32
    %c0_i32_0 = arith.constant 0 : i32
    %c0_i32_1 = arith.constant 0 : i32
    return %arg0, %c0_i32, %c0_i32_0 : i32, i32, i32
  }
  func.func @transform_1(%arg0: i32) -> (i32, i32, i32) {
    %c0_i32 = arith.constant 0 : i32
    %c0_i32_0 = arith.constant 0 : i32
    %c0_i32_1 = arith.constant 0 : i32
    %c0_i32_2 = arith.constant 0 : i32
    return %c0_i32, %c0_i32_0, %c0_i32_1 : i32, i32, i32
  }
  func.func @transform_2(%arg0: i32) -> (i32, i32, i32) {
    %c0_i32 = arith.constant 0 : i32
    %c0_i32_0 = arith.constant 0 : i32
    %c0_i32_1 = arith.constant 0 : i32
    %c0_i32_2 = arith.constant 0 : i32
    return %c0_i32, %c0_i32_0, %c0_i32_1 : i32, i32, i32
  }
  func.func @transform_3(%arg0: i32) -> (i32, i32, i32) {
    %c0_i32 = arith.constant 0 : i32
    %c0_i32_0 = arith.constant 0 : i32
    %c0_i32_1 = arith.constant 0 : i32
    return %arg0, %c0_i32, %c0_i32_0 : i32, i32, i32
  }
}

module attributes {stable_mosaic.version = 11 : i64} {
  func.func @_conv_stats_kernel(%arg0: i32, %arg1: memref<1x18x18x8xf32, #tpu.memory_space<vmem>>, %arg2: memref<72x4xf32, #tpu.memory_space<vmem>>, %arg3: memref<1x256x4xf32, #tpu.memory_space<vmem>>, %arg4: memref<1x1x4xf32, #tpu.memory_space<vmem>>, %arg5: memref<1x1x4xf32, #tpu.memory_space<vmem>>) attributes {dimension_semantics = [#tpu.dimension_semantics<parallel>], iteration_bounds = array<i64: 2>, scalar_prefetch = 0 : i64, scratch_operands = 0 : i64, tpu.core_type = #tpu.core_type<tc>, window_params = [{transform_indices = @transform_0, window_bounds = array<i64: 1, 18, 18, 8>}, {pipeline_mode = #tpu.pipeline_mode<synchronous>, transform_indices = @transform_1, window_bounds = array<i64: 72, 4>}, {transform_indices = @transform_2, window_bounds = array<i64: 1, 256, 4>}, {transform_indices = @transform_3, window_bounds = array<i64: 1, 1, 4>}, {transform_indices = @transform_4, window_bounds = array<i64: 1, 1, 4>}]} {
    %c0 = arith.constant 0 : index
    %c0_0 = arith.constant 0 : index
    %c0_1 = arith.constant 0 : index
    %c0_2 = arith.constant 0 : index
    %0 = vector.load %arg1[%c0, %c0_0, %c0_1, %c0_2] : memref<1x18x18x8xf32, #tpu.memory_space<vmem>>, vector<1x18x18x8xf32>
    %1 = vector.shape_cast %0 : vector<1x18x18x8xf32> to vector<18x18x8xf32>
    %2 = vector.extract_strided_slice %1 {offsets = [0, 0, 0], sizes = [16, 16, 8], strides = [1, 1, 1]} : vector<18x18x8xf32> to vector<16x16x8xf32>
    %3 = vector.shape_cast %2 : vector<16x16x8xf32> to vector<256x8xf32>
    %4 = vector.extract_strided_slice %1 {offsets = [0, 1, 0], sizes = [16, 16, 8], strides = [1, 1, 1]} : vector<18x18x8xf32> to vector<16x16x8xf32>
    %5 = vector.shape_cast %4 : vector<16x16x8xf32> to vector<256x8xf32>
    %6 = vector.extract_strided_slice %1 {offsets = [0, 2, 0], sizes = [16, 16, 8], strides = [1, 1, 1]} : vector<18x18x8xf32> to vector<16x16x8xf32>
    %7 = vector.shape_cast %6 : vector<16x16x8xf32> to vector<256x8xf32>
    %8 = vector.extract_strided_slice %1 {offsets = [1, 0, 0], sizes = [16, 16, 8], strides = [1, 1, 1]} : vector<18x18x8xf32> to vector<16x16x8xf32>
    %9 = vector.shape_cast %8 : vector<16x16x8xf32> to vector<256x8xf32>
    %10 = vector.extract_strided_slice %1 {offsets = [1, 1, 0], sizes = [16, 16, 8], strides = [1, 1, 1]} : vector<18x18x8xf32> to vector<16x16x8xf32>
    %11 = vector.shape_cast %10 : vector<16x16x8xf32> to vector<256x8xf32>
    %12 = vector.extract_strided_slice %1 {offsets = [1, 2, 0], sizes = [16, 16, 8], strides = [1, 1, 1]} : vector<18x18x8xf32> to vector<16x16x8xf32>
    %13 = vector.shape_cast %12 : vector<16x16x8xf32> to vector<256x8xf32>
    %14 = vector.extract_strided_slice %1 {offsets = [2, 0, 0], sizes = [16, 16, 8], strides = [1, 1, 1]} : vector<18x18x8xf32> to vector<16x16x8xf32>
    %15 = vector.shape_cast %14 : vector<16x16x8xf32> to vector<256x8xf32>
    %16 = vector.extract_strided_slice %1 {offsets = [2, 1, 0], sizes = [16, 16, 8], strides = [1, 1, 1]} : vector<18x18x8xf32> to vector<16x16x8xf32>
    %17 = vector.shape_cast %16 : vector<16x16x8xf32> to vector<256x8xf32>
    %18 = vector.extract_strided_slice %1 {offsets = [2, 2, 0], sizes = [16, 16, 8], strides = [1, 1, 1]} : vector<18x18x8xf32> to vector<16x16x8xf32>
    %19 = vector.shape_cast %18 : vector<16x16x8xf32> to vector<256x8xf32>
    %20 = tpu.concatenate %3, %5, %7, %9, %11, %13, %15, %17, %19 in 1 : vector<256x8xf32>, vector<256x8xf32>, vector<256x8xf32>, vector<256x8xf32>, vector<256x8xf32>, vector<256x8xf32>, vector<256x8xf32>, vector<256x8xf32>, vector<256x8xf32> -> vector<256x72xf32>
    %c0_3 = arith.constant 0 : index
    %c0_4 = arith.constant 0 : index
    %21 = vector.load %arg2[%c0_3, %c0_4] : memref<72x4xf32, #tpu.memory_space<vmem>>, vector<72x4xf32>
    %cst = arith.constant dense<0.000000e+00> : vector<256x4xf32>
    %22 = tpu.matmul %20, %21, %cst {dimension_numbers = #tpu.dot_dimension_numbers<[1], [0], [0], [1], [0, 0, 1, 1], [], []>} : vector<256x72xf32>, vector<72x4xf32>, vector<256x4xf32> -> vector<256x4xf32>
    %c0_5 = arith.constant 0 : index
    %c0_6 = arith.constant 0 : index
    %c0_7 = arith.constant 0 : index
    %23 = vector.load %arg3[%c0_5, %c0_6, %c0_7] : memref<1x256x4xf32, #tpu.memory_space<vmem>>, vector<1x256x4xf32>
    %24 = vector.shape_cast %23 : vector<1x256x4xf32> to vector<256x4xf32>
    %25 = vector.shape_cast %22 : vector<256x4xf32> to vector<1x256x4xf32>
    tpu.vector_store %arg3[%c0_5, %c0_6, %c0_7], %25 {strides = array<i32>} : memref<1x256x4xf32, #tpu.memory_space<vmem>>, vector<1x256x4xf32>,
    %cst_8 = arith.constant dense<0.000000e+00> : vector<4xf32>
    %26 = vector.multi_reduction <add>, %22, %cst_8 [0] : vector<256x4xf32> to vector<4xf32>
    %27 = vector.shape_cast %26 : vector<4xf32> to vector<1x4xf32>
    %c0_9 = arith.constant 0 : index
    %c0_10 = arith.constant 0 : index
    %c0_11 = arith.constant 0 : index
    %28 = vector.load %arg4[%c0_9, %c0_10, %c0_11] : memref<1x1x4xf32, #tpu.memory_space<vmem>>, vector<1x1x4xf32>
    %29 = vector.shape_cast %28 : vector<1x1x4xf32> to vector<1x4xf32>
    %30 = vector.shape_cast %27 : vector<1x4xf32> to vector<1x1x4xf32>
    tpu.vector_store %arg4[%c0_9, %c0_10, %c0_11], %30 {strides = array<i32>} : memref<1x1x4xf32, #tpu.memory_space<vmem>>, vector<1x1x4xf32>,
    %31 = arith.mulf %22, %22 : vector<256x4xf32>
    %cst_12 = arith.constant dense<0.000000e+00> : vector<4xf32>
    %32 = vector.multi_reduction <add>, %31, %cst_12 [0] : vector<256x4xf32> to vector<4xf32>
    %33 = vector.shape_cast %32 : vector<4xf32> to vector<1x4xf32>
    %c0_13 = arith.constant 0 : index
    %c0_14 = arith.constant 0 : index
    %c0_15 = arith.constant 0 : index
    %34 = vector.load %arg5[%c0_13, %c0_14, %c0_15] : memref<1x1x4xf32, #tpu.memory_space<vmem>>, vector<1x1x4xf32>
    %35 = vector.shape_cast %34 : vector<1x1x4xf32> to vector<1x4xf32>
    %36 = vector.shape_cast %33 : vector<1x4xf32> to vector<1x1x4xf32>
    tpu.vector_store %arg5[%c0_13, %c0_14, %c0_15], %36 {strides = array<i32>} : memref<1x1x4xf32, #tpu.memory_space<vmem>>, vector<1x1x4xf32>,
    return
  }
  func.func @transform_0(%arg0: i32) -> (i32, i32, i32, i32) {
    %c0_i32 = arith.constant 0 : i32
    %c0_i32_0 = arith.constant 0 : i32
    %c0_i32_1 = arith.constant 0 : i32
    %c0_i32_2 = arith.constant 0 : i32
    return %arg0, %c0_i32, %c0_i32_0, %c0_i32_1 : i32, i32, i32, i32
  }
  func.func @transform_1(%arg0: i32) -> (i32, i32) {
    %c0_i32 = arith.constant 0 : i32
    %c0_i32_0 = arith.constant 0 : i32
    %c0_i32_1 = arith.constant 0 : i32
    return %c0_i32, %c0_i32_0 : i32, i32
  }
  func.func @transform_2(%arg0: i32) -> (i32, i32, i32) {
    %c0_i32 = arith.constant 0 : i32
    %c0_i32_0 = arith.constant 0 : i32
    %c0_i32_1 = arith.constant 0 : i32
    return %arg0, %c0_i32, %c0_i32_0 : i32, i32, i32
  }
  func.func @transform_3(%arg0: i32) -> (i32, i32, i32) {
    %c0_i32 = arith.constant 0 : i32
    %c0_i32_0 = arith.constant 0 : i32
    %c0_i32_1 = arith.constant 0 : i32
    return %arg0, %c0_i32, %c0_i32_0 : i32, i32, i32
  }
  func.func @transform_4(%arg0: i32) -> (i32, i32, i32) {
    %c0_i32 = arith.constant 0 : i32
    %c0_i32_0 = arith.constant 0 : i32
    %c0_i32_1 = arith.constant 0 : i32
    return %arg0, %c0_i32, %c0_i32_0 : i32, i32, i32
  }
}

module attributes {stable_mosaic.version = 11 : i64} {
  func.func @_bn_relu_kernel(%arg0: i32, %arg1: memref<1x16x64xf32, #tpu.memory_space<vmem>>, %arg2: memref<1x1x64xf32, #tpu.memory_space<vmem>>, %arg3: memref<1x1x64xf32, #tpu.memory_space<vmem>>, %arg4: memref<1x16x64xf32, #tpu.memory_space<vmem>>) attributes {dimension_semantics = [#tpu.dimension_semantics<parallel>], iteration_bounds = array<i64: 2>, scalar_prefetch = 0 : i64, scratch_operands = 0 : i64, tpu.core_type = #tpu.core_type<tc>, window_params = [{transform_indices = @transform_0, window_bounds = array<i64: 1, 16, 64>}, {pipeline_mode = #tpu.pipeline_mode<synchronous>, transform_indices = @transform_1, window_bounds = array<i64: 1, 1, 64>}, {pipeline_mode = #tpu.pipeline_mode<synchronous>, transform_indices = @transform_2, window_bounds = array<i64: 1, 1, 64>}, {transform_indices = @transform_3, window_bounds = array<i64: 1, 16, 64>}]} {
    %c0 = arith.constant 0 : index
    %c0_0 = arith.constant 0 : index
    %c0_1 = arith.constant 0 : index
    %0 = vector.load %arg1[%c0, %c0_0, %c0_1] : memref<1x16x64xf32, #tpu.memory_space<vmem>>, vector<1x16x64xf32>
    %c0_2 = arith.constant 0 : index
    %c0_3 = arith.constant 0 : index
    %c0_4 = arith.constant 0 : index
    %1 = vector.load %arg2[%c0_2, %c0_3, %c0_4] : memref<1x1x64xf32, #tpu.memory_space<vmem>>, vector<1x1x64xf32>
    %2 = vector.broadcast %1 : vector<1x1x64xf32> to vector<1x16x64xf32>
    %3 = arith.mulf %0, %2 : vector<1x16x64xf32>
    %c0_5 = arith.constant 0 : index
    %c0_6 = arith.constant 0 : index
    %c0_7 = arith.constant 0 : index
    %4 = vector.load %arg3[%c0_5, %c0_6, %c0_7] : memref<1x1x64xf32, #tpu.memory_space<vmem>>, vector<1x1x64xf32>
    %5 = vector.broadcast %4 : vector<1x1x64xf32> to vector<1x16x64xf32>
    %6 = arith.addf %3, %5 : vector<1x16x64xf32>
    %cst = arith.constant 0.000000e+00 : f32
    %7 = vector.broadcast %cst : f32 to vector<1x16x64xf32>
    %8 = arith.maximumf %6, %7 : vector<1x16x64xf32>
    %c0_8 = arith.constant 0 : index
    %c0_9 = arith.constant 0 : index
    %c0_10 = arith.constant 0 : index
    %9 = vector.load %arg4[%c0_8, %c0_9, %c0_10] : memref<1x16x64xf32, #tpu.memory_space<vmem>>, vector<1x16x64xf32>
    tpu.vector_store %arg4[%c0_8, %c0_9, %c0_10], %8 {strides = array<i32>} : memref<1x16x64xf32, #tpu.memory_space<vmem>>, vector<1x16x64xf32>,
    return
  }
  func.func @transform_0(%arg0: i32) -> (i32, i32, i32) {
    %c0_i32 = arith.constant 0 : i32
    %c0_i32_0 = arith.constant 0 : i32
    %c0_i32_1 = arith.constant 0 : i32
    return %arg0, %c0_i32, %c0_i32_0 : i32, i32, i32
  }
  func.func @transform_1(%arg0: i32) -> (i32, i32, i32) {
    %c0_i32 = arith.constant 0 : i32
    %c0_i32_0 = arith.constant 0 : i32
    %c0_i32_1 = arith.constant 0 : i32
    %c0_i32_2 = arith.constant 0 : i32
    return %c0_i32, %c0_i32_0, %c0_i32_1 : i32, i32, i32
  }
  func.func @transform_2(%arg0: i32) -> (i32, i32, i32) {
    %c0_i32 = arith.constant 0 : i32
    %c0_i32_0 = arith.constant 0 : i32
    %c0_i32_1 = arith.constant 0 : i32
    %c0_i32_2 = arith.constant 0 : i32
    return %c0_i32, %c0_i32_0, %c0_i32_1 : i32, i32, i32
  }
  func.func @transform_3(%arg0: i32) -> (i32, i32, i32) {
    %c0_i32 = arith.constant 0 : i32
    %c0_i32_0 = arith.constant 0 : i32
    %c0_i32_1 = arith.constant 0 : i32
    return %arg0, %c0_i32, %c0_i32_0 : i32, i32, i32
  }
}

</mosaic_0001>

<bundles_post_ra>
// kernel: tile.23
= control target key start
LH: loop header
LB: loop body
LE: loop exit
PB: predicated region body
PF: predicated region fallthrough
CT: control target
= control target key end

     0   :  { %s28_s0 = inlined_call_operand.vmem [shape: f32[8], index: 0, kind: input, shape index: {}]   ;;  %s29_s1 = inlined_call_operand.vmem [shape: f32[16,8], index: 1, kind: output, shape index: {}]  }
   0x1   :  { %v4_v0 = vld [vmem:[%s28_s0] ss:$0 sm:$0xff] }
   0x2   :  { %5 = vst [vmem:[%s29_s1] sm:$0xff] %v4_v0 }
   0x3   :  { %8 = vst [vmem:[%s29_s1 + $0x8] sm:$0xff] %v4_v0 }

// kernel: tile.24
= control target key start
LH: loop header
LB: loop body
LE: loop exit
PB: predicated region body
PF: predicated region fallthrough
CT: control target
= control target key end

     0   :  { %s131_s10 = smov 120   ;;  %s132_s11 = smov 104   ;;  %vm3_vm0 = vcmask 64512   ;;  %vm9_vm1 = vcmask 1048512   ;;  %vm15_vm2 = vcmask 982912   ;;  %vm21_vm3 = vcmask 917312   ;;  %s207_s0 = inlined_call_operand.vmem [shape: f32[16,8], index: 0, kind: input, shape index: {}]   ;;  %s208_s1 = inlined_call_operand.vmem [shape: f32[1,1,128], index: 1, kind: output, shape index: {}]  }
   0x1   :  { %v101_v0 = vld [vmem:[%s207_s0 + $0xf] sm:$0x1]   ;;  %v103_v1 = vld [vmem:[%s207_s0 + $0xd] sm:$0x1]   ;;  %v105_v2 = vld [vmem:[%s207_s0 + $0xb] sm:$0x1]  }
   0x2   :  { %7 = vrot.lane.b32.xlu0 %v101_v0, %s131_s10  ;;  %19 = vrot.lane.b32.xlu1 %v103_v1, %s132_s11  ;;  %s133_s14 = smov 88   ;;  %v102_v3 = vld [vmem:[%s207_s0 + $0xe] sm:$0x1]   ;;  %v104_v4 = vld [vmem:[%s207_s0 + $0xc] sm:$0x1]   ;;  %s134_s19 = smov 112  }
   0x3   :  { %31 = vrot.lane.b32.xlu2 %v105_v2, %s133_s14  ;;  %s135_s20 = smov 96   ;;  %v106_v5 = vld [vmem:[%s207_s0 + $0xa] sm:$0x1]   ;;  %s136_s23 = smov 80   ;;  %v107_v6 = vld [vmem:[%s207_s0 + $0x9] sm:$0x1]  }
   0x4   :  { %v108_v7 = vld [vmem:[%s207_s0 + $0x8] sm:$0x1]   ;;  %s137_s28 = smov 72   ;;  %s138_s29 = smov 64   ;;  %v109_v8 = vld [vmem:[%s207_s0 + $0x7] sm:$0x1]  }
   0x5   :  { %s139_s3 = smov 56   ;;  %v110_v9 = vld [vmem:[%s207_s0 + $0x6] sm:$0x1]   ;;  %v111_v10 = vld [vmem:[%s207_s0 + $0x5] sm:$0x1]   ;;  %s140_s8 = smov 48  }
   0x6   :  { %s141_s9 = smov 40   ;;  %v112_v11 = vld [vmem:[%s207_s0 + $0x4] sm:$0x1]   ;;  %s142_s12 = smov 32   ;;  %v113_v12 = vld [vmem:[%s207_s0 + $0x3] sm:$0x1]  }
   0x7   :  { %v114_v13 = vld [vmem:[%s207_s0 + $0x2] sm:$0x1]   ;;  %s143_s17 = smov 24   ;;  %s144_s18 = smov 16   ;;  %v115_v14 = vld [vmem:[%s207_s0 + $0x1] sm:$0x1]  }
   0x8   :  { %s145_s21 = smov 8   ;;  %v2_v15 = vld [vmem:[%s207_s0] sm:$0x1]   ;;  %vm27_vm4 = vcmask 851712   ;;  %vm33_vm5 = vcmask 786112   ;;  %vm39_vm6 = vcmask 720512  }
   0x9   :  { %4 = vst.msk [vmem:[#allocation0] sm:$0x1] %vm3_vm0, %v2_v15   ;;  %vm45_vm7 = vcmask 654912   ;;  %vm51_vm8 = vcmask 589312   ;;  %vm57_vm9 = vcmask 523712   ;;  %vm63_vm10 = vcmask 458112  }
   0xa   :  { %13 = vrot.lane.b32.xlu0 %v102_v3, %s134_s19  ;;  %25 = vrot.lane.b32.xlu1 %v104_v4, %s135_s20  ;;  %vm69_vm11 = vcmask 392512   ;;  %vm75_vm12 = vcmask 326912   ;;  %vm81_vm13 = vcmask 261312   ;;  %vm87_vm14 = vcmask 195712  }
   0xb   :  { %37 = vrot.lane.b32.xlu2 %v106_v5, %s136_s23  ;;  %vm93_vm15 = vcmask 130112  }
  0x12   :  { %43 = vrot.lane.b32.xlu0 %v107_v6, %s137_s28  ;;  %49 = vrot.lane.b32.xlu1 %v108_v7, %s138_s29 }
  0x13   :  { %55 = vrot.lane.b32.xlu2 %v109_v8, %s139_s3 }
  0x1a   :  { %61 = vrot.lane.b32.xlu0 %v110_v9, %s140_s8  ;;  %67 = vrot.lane.b32.xlu1 %v111_v10, %s141_s9 }
  0x1b   :  { %73 = vrot.lane.b32.xlu2 %v112_v11, %s142_s12 }
  0x22   :  { %79 = vrot.lane.b32.xlu0 %v113_v12, %s143_s17  ;;  %85 = vrot.lane.b32.xlu1 %v114_v13, %s144_s18 }
  0x23   :  { %91 = vrot.lane.b32.xlu2 %v115_v14, %s145_s21 }
  0x5d   :  { %v32_v16 = vpop.permute.xlu2 %31  }
  0x65   :  { %v38_v17 = vpop.permute.xlu2 %37  }
  0x6d   :  { %v56_v18 = vpop.permute.xlu2 %55  }
  0x74   :  { %v8_v19 = vpop.permute.xlu0 %7   ;;  %v20_v20 = vpop.permute.xlu1 %19  }
  0x75   :  { %10 = vst.msk [vmem:[#allocation0] sm:$0x1] %vm9_vm1, %v8_v19   ;;  %v74_v21 = vpop.permute.xlu2 %73  }
  0x7c   :  { %v14_v22 = vpop.permute.xlu0 %13   ;;  %v26_v23 = vpop.permute.xlu1 %25  }
  0x7d   :  { %16 = vst.msk [vmem:[#allocation0] sm:$0x1] %vm15_vm2, %v14_v22   ;;  %v92_v24 = vpop.permute.xlu2 %91  }
  0x7e   :  { %22 = vst.msk [vmem:[#allocation0] sm:$0x1] %vm21_vm3, %v20_v20  }
  0x7f   :  { %28 = vst.msk [vmem:[#allocation0] sm:$0x1] %vm27_vm4, %v26_v23  }
  0x80   :  { %34 = vst.msk [vmem:[#allocation0] sm:$0x1] %vm33_vm5, %v32_v16  }
  0x81   :  { %40 = vst.msk [vmem:[#allocation0] sm:$0x1] %vm39_vm6, %v38_v17  }
  0x84   :  { %v44_v25 = vpop.permute.xlu0 %43   ;;  %v50_v26 = vpop.permute.xlu1 %49  }
  0x85   :  { %46 = vst.msk [vmem:[#allocation0] sm:$0x1] %vm45_vm7, %v44_v25  }
  0x86   :  { %52 = vst.msk [vmem:[#allocation0] sm:$0x1] %vm51_vm8, %v50_v26  }
  0x87   :  { %58 = vst.msk [vmem:[#allocation0] sm:$0x1] %vm57_vm9, %v56_v18  }
  0x8c   :  { %v62_v27 = vpop.permute.xlu0 %61   ;;  %v68_v28 = vpop.permute.xlu1 %67  }
  0x8d   :  { %64 = vst.msk [vmem:[#allocation0] sm:$0x1] %vm63_vm10, %v62_v27  }
  0x8e   :  { %70 = vst.msk [vmem:[#allocation0] sm:$0x1] %vm69_vm11, %v68_v28  }
  0x8f   :  { %76 = vst.msk [vmem:[#allocation0] sm:$0x1] %vm75_vm12, %v74_v21  }
  0x94   :  { %v80_v29 = vpop.permute.xlu0 %79   ;;  %v86_v30 = vpop.permute.xlu1 %85  }
  0x95   :  { %82 = vst.msk [vmem:[#allocation0] sm:$0x1] %vm81_vm13, %v80_v29  }
  0x96   :  { %88 = vst.msk [vmem:[#allocation0] sm:$0x1] %vm87_vm14, %v86_v30  }
  0x97   :  { %94 = vst.msk [vmem:[#allocation0] sm:$0x1] %vm93_vm15, %v92_v24  }
  0x9e   :  { %v97_v31 = vld [vmem:[#allocation0] sm:$0x1] }
  0x9f   :  { %100 = vst [vmem:[%s208_s1] sm:$0x1] %v97_v31 }

// kernel: vgg_block_forward.5
= control target key start
LH: loop header
LB: loop body
LE: loop exit
PB: predicated region body
PF: predicated region fallthrough
CT: control target
= control target key end

     0   :  { %s295_s12 = smov 0   ;;  %s312_s0 = inlined_call_operand.vmem [shape: f32[2,16,128], index: 0, kind: input, shape index: {}]   ;;  %s313_s1 = inlined_call_operand.vmem [shape: f32[1,1,128], index: 1, kind: input, shape index: {}]   ;;  %s314_s2 = inlined_call_operand.vmem [shape: f32[1,1,128], index: 2, kind: input, shape index: {}]   ;;  %s315_s3 = inlined_call_operand.vmem [shape: f32[2,16,128], index: 3, kind: output, shape index: {}]  }
   0x1 LB: > { %s244_s13 = sadd.s32 4294967295, %s273_s12   ;;  %p248_p0 = scmp.ge.s32.totalorder %s273_s12, 1  ;;  %s273_s12 = sphi %s295_s12, %s13_s12  }
   0x2   : > { %p137_p1 = scmp.lt.s32.totalorder %s273_s12, 3 }
   0x4   : > { %p138_p2 = pnand %p248_p0, %p137_p1 }
   0x5   : > { %p161_p3 = scmp.lt.s32.totalorder (!%p138_p2), %s244_s13, 1 }
   0x6   : > { %141 = sbr.rel (%p138_p2) target bundleno = 23 (0x17), region = 32 }
   0xb   : > { %s317_s13 = smov (!%p161_p3, %s244_s13), 1  ;;  %v265_v0 = vld [vmem:[%s313_s1] ss:$0 sm:$0xff] }
   0xc   : > { %s255_s16 = sshll.u32 %s317_s13, 4  ;;  %v266_v1 = vld [vmem:[%s314_s2] ss:$0 sm:$0xff] }
   0xd   : > { %s165_s19 = scalar_lea.vmem %s312_s0, %s255_s16  ;;  %s170_s24 = scalar_lea.vmem %s315_s3, %s255_s16 }
   0xe   : > { %v171_v2 = vld [vmem:[%s165_s19] sm:$0xff]  ;;  %v172_v3 = vld [vmem:[%s165_s19 + $0x8] sm:$0xff] }
   0xf   : > { %v177_v4 = vmul.f32 %v265_v0, %v171_v2  ;;  %v178_v5 = vmul.f32 %v265_v0, %v172_v3 }
  0x11   : > { %v183_v6 = vadd.f32 %v266_v1, %v177_v4  ;;  %v184_v7 = vadd.f32 %v266_v1, %v178_v5 }
  0x13   : > { %v185_v8 = vmax.f32 %v183_v6, 0.0  ;;  %v186_v9 = vmax.f32 %v184_v7, 0.0 }
  0x15   : > { %187 = vst [vmem:[%s170_s24] sm:$0xff] %v185_v8 }
  0x16   : > { %188 = vst [vmem:[%s170_s24 + $0x8] sm:$0xff] %v186_v9 }
  0x17 PF: > { %s13_s12 = sadd.s32 1, %s273_s12  }
  0x18   : > { %p10_p4 = scmp.ge.s32.totalorder %s13_s12, 4  }
  0x1a   :  { %12 = sbr.rel (!%p10_p4) target bundleno = 1 (0x1), region = 62 }

// kernel: tile.33
= control target key start
LH: loop header
LB: loop body
LE: loop exit
PB: predicated region body
PF: predicated region fallthrough
CT: control target
= control target key end

     0   :  { %s28_s0 = inlined_call_operand.vmem [shape: f32[4], index: 0, kind: input, shape index: {}]   ;;  %s29_s1 = inlined_call_operand.vmem [shape: f32[16,4], index: 1, kind: output, shape index: {}]  }
   0x1   :  { %v4_v0 = vld [vmem:[%s28_s0] ss:$0 sm:$0xff] }
   0x2   :  { %5 = vst [vmem:[%s29_s1] sm:$0xff] %v4_v0 }
   0x3   :  { %8 = vst [vmem:[%s29_s1 + $0x8] sm:$0xff] %v4_v0 }

// kernel: tile.34
= control target key start
LH: loop header
LB: loop body
LE: loop exit
PB: predicated region body
PF: predicated region fallthrough
CT: control target
= control target key end

     0   :  { %s131_s10 = smov 60   ;;  %s132_s11 = smov 52   ;;  %vm3_vm0 = vcmask 31744   ;;  %vm9_vm1 = vcmask 523744   ;;  %vm15_vm2 = vcmask 490944   ;;  %vm21_vm3 = vcmask 458144   ;;  %s207_s0 = inlined_call_operand.vmem [shape: f32[16,4], index: 0, kind: input, shape index: {}]   ;;  %s208_s1 = inlined_call_operand.vmem [shape: f32[1,1,64], index: 1, kind: output, shape index: {}]  }
   0x1   :  { %v101_v0 = vld [vmem:[%s207_s0 + $0xf] sm:$0x1]   ;;  %v103_v1 = vld [vmem:[%s207_s0 + $0xd] sm:$0x1]   ;;  %v105_v2 = vld [vmem:[%s207_s0 + $0xb] sm:$0x1]  }
   0x2   :  { %7 = vrot.lane.b32.xlu0 %v101_v0, %s131_s10  ;;  %19 = vrot.lane.b32.xlu1 %v103_v1, %s132_s11  ;;  %s133_s14 = smov 44   ;;  %v102_v3 = vld [vmem:[%s207_s0 + $0xe] sm:$0x1]   ;;  %v104_v4 = vld [vmem:[%s207_s0 + $0xc] sm:$0x1]   ;;  %s134_s19 = smov 56  }
   0x3   :  { %31 = vrot.lane.b32.xlu2 %v105_v2, %s133_s14  ;;  %s135_s20 = smov 48   ;;  %v106_v5 = vld [vmem:[%s207_s0 + $0xa] sm:$0x1]   ;;  %s136_s23 = smov 40   ;;  %v107_v6 = vld [vmem:[%s207_s0 + $0x9] sm:$0x1]  }
   0x4   :  { %v108_v7 = vld [vmem:[%s207_s0 + $0x8] sm:$0x1]   ;;  %s137_s28 = smov 36   ;;  %s138_s29 = smov 32   ;;  %v109_v8 = vld [vmem:[%s207_s0 + $0x7] sm:$0x1]  }
   0x5   :  { %s139_s3 = smov 28   ;;  %v110_v9 = vld [vmem:[%s207_s0 + $0x6] sm:$0x1]   ;;  %v111_v10 = vld [vmem:[%s207_s0 + $0x5] sm:$0x1]   ;;  %s140_s8 = smov 24  }
   0x6   :  { %s141_s9 = smov 20   ;;  %v112_v11 = vld [vmem:[%s207_s0 + $0x4] sm:$0x1]   ;;  %s142_s12 = smov 16   ;;  %v113_v12 = vld [vmem:[%s207_s0 + $0x3] sm:$0x1]  }
   0x7   :  { %v114_v13 = vld [vmem:[%s207_s0 + $0x2] sm:$0x1]   ;;  %s143_s17 = smov 12   ;;  %s144_s18 = smov 8   ;;  %v115_v14 = vld [vmem:[%s207_s0 + $0x1] sm:$0x1]  }
   0x8   :  { %s145_s21 = smov 4   ;;  %v2_v15 = vld [vmem:[%s207_s0] sm:$0x1]   ;;  %vm27_vm4 = vcmask 425344   ;;  %vm33_vm5 = vcmask 392544   ;;  %vm39_vm6 = vcmask 359744  }
   0x9   :  { %4 = vst.msk [vmem:[#allocation0] sm:$0x1] %vm3_vm0, %v2_v15   ;;  %vm45_vm7 = vcmask 326944   ;;  %vm51_vm8 = vcmask 294144   ;;  %vm57_vm9 = vcmask 261344   ;;  %vm63_vm10 = vcmask 228544  }
   0xa   :  { %13 = vrot.lane.b32.xlu0 %v102_v3, %s134_s19  ;;  %25 = vrot.lane.b32.xlu1 %v104_v4, %s135_s20  ;;  %vm69_vm11 = vcmask 195744   ;;  %vm75_vm12 = vcmask 162944   ;;  %vm81_vm13 = vcmask 130144   ;;  %vm87_vm14 = vcmask 97344  }
   0xb   :  { %37 = vrot.lane.b32.xlu2 %v106_v5, %s136_s23  ;;  %vm93_vm15 = vcmask 64544  }
  0x12   :  { %43 = vrot.lane.b32.xlu0 %v107_v6, %s137_s28  ;;  %49 = vrot.lane.b32.xlu1 %v108_v7, %s138_s29 }
  0x13   :  { %55 = vrot.lane.b32.xlu2 %v109_v8, %s139_s3 }
  0x1a   :  { %61 = vrot.lane.b32.xlu0 %v110_v9, %s140_s8  ;;  %67 = vrot.lane.b32.xlu1 %v111_v10, %s141_s9 }
  0x1b   :  { %73 = vrot.lane.b32.xlu2 %v112_v11, %s142_s12 }
  0x22   :  { %79 = vrot.lane.b32.xlu0 %v113_v12, %s143_s17  ;;  %85 = vrot.lane.b32.xlu1 %v114_v13, %s144_s18 }
  0x23   :  { %91 = vrot.lane.b32.xlu2 %v115_v14, %s145_s21 }
  0x5d   :  { %v32_v16 = vpop.permute.xlu2 %31  }
  0x65   :  { %v38_v17 = vpop.permute.xlu2 %37  }
  0x6d   :  { %v56_v18 = vpop.permute.xlu2 %55  }
  0x74   :  { %v8_v19 = vpop.permute.xlu0 %7   ;;  %v20_v20 = vpop.permute.xlu1 %19  }
  0x75   :  { %10 = vst.msk [vmem:[#allocation0] sm:$0x1] %vm9_vm1, %v8_v19   ;;  %v74_v21 = vpop.permute.xlu2 %73  }
  0x7c   :  { %v14_v22 = vpop.permute.xlu0 %13   ;;  %v26_v23 = vpop.permute.xlu1 %25  }
  0x7d   :  { %16 = vst.msk [vmem:[#allocation0] sm:$0x1] %vm15_vm2, %v14_v22   ;;  %v92_v24 = vpop.permute.xlu2 %91  }
  0x7e   :  { %22 = vst.msk [vmem:[#allocation0] sm:$0x1] %vm21_vm3, %v20_v20  }
  0x7f   :  { %28 = vst.msk [vmem:[#allocation0] sm:$0x1] %vm27_vm4, %v26_v23  }
  0x80   :  { %34 = vst.msk [vmem:[#allocation0] sm:$0x1] %vm33_vm5, %v32_v16  }
  0x81   :  { %40 = vst.msk [vmem:[#allocation0] sm:$0x1] %vm39_vm6, %v38_v17  }
  0x84   :  { %v44_v25 = vpop.permute.xlu0 %43   ;;  %v50_v26 = vpop.permute.xlu1 %49  }
  0x85   :  { %46 = vst.msk [vmem:[#allocation0] sm:$0x1] %vm45_vm7, %v44_v25  }
  0x86   :  { %52 = vst.msk [vmem:[#allocation0] sm:$0x1] %vm51_vm8, %v50_v26  }
  0x87   :  { %58 = vst.msk [vmem:[#allocation0] sm:$0x1] %vm57_vm9, %v56_v18  }
  0x8c   :  { %v62_v27 = vpop.permute.xlu0 %61   ;;  %v68_v28 = vpop.permute.xlu1 %67  }
  0x8d   :  { %64 = vst.msk [vmem:[#allocation0] sm:$0x1] %vm63_vm10, %v62_v27  }
  0x8e   :  { %70 = vst.msk [vmem:[#allocation0] sm:$0x1] %vm69_vm11, %v68_v28  }
  0x8f   :  { %76 = vst.msk [vmem:[#allocation0] sm:$0x1] %vm75_vm12, %v74_v21  }
  0x94   :  { %v80_v29 = vpop.permute.xlu0 %79   ;;  %v86_v30 = vpop.permute.xlu1 %85  }
  0x95   :  { %82 = vst.msk [vmem:[#allocation0] sm:$0x1] %vm81_vm13, %v80_v29  }
  0x96   :  { %88 = vst.msk [vmem:[#allocation0] sm:$0x1] %vm87_vm14, %v86_v30  }
  0x97   :  { %94 = vst.msk [vmem:[#allocation0] sm:$0x1] %vm93_vm15, %v92_v24  }
  0x9e   :  { %v97_v31 = vld [vmem:[#allocation0] sm:$0x1] }
  0x9f   :  { %100 = vst [vmem:[%s208_s1] sm:$0x1] %v97_v31 }

// kernel: vgg_block_forward.4
= control target key start
LH: loop header
LB: loop body
LE: loop exit
PB: predicated region body
PF: predicated region fallthrough
CT: control target
= control target key end

     0   :  { %s2216_s15 = smov 0   ;;  %s4272_s0 = inlined_call_operand.vmem [shape: f32[2,18,18,4], index: 0, kind: input, shape index: {}]   ;;  %s4273_s1 = inlined_call_operand.vmem [shape: f32[36,8], index: 1, kind: input, shape index: {}]   ;;  %s4274_s2 = inlined_call_operand.vmem [shape: f32[2,256,8], index: 2, kind: output, shape index: {0}]   ;;  %s4275_s3 = inlined_call_operand.vmem [shape: f32[2,1,8], index: 3, kind: output, shape index: {1}]   ;;  %s4276_s4 = inlined_call_operand.vmem [shape: f32[2,1,8], index: 4, kind: output, shape index: {2}]  }
   0x1 LB: > { %s2066_s16 = sadd.s32 4294967295, %s2181_s15   ;;  %p2070_p0 = scmp.ge.s32.totalorder %s2181_s15, 1  ;;  %s2181_s15 = sphi %s2216_s15, %s15_s15  }
   0x2   : > { %p167_p1 = scmp.lt.s32.totalorder %s2181_s15, 3 }
   0x4   : > { %p168_p2 = pnand %p2070_p0, %p167_p1 }
   0x6   : > { %171 = sbr.rel (%p168_p2) target bundleno = 969 (0x3c9), region = 28 }
   0xb   : > { %p199_p3 = scmp.lt.s32.totalorder %s2066_s16, 1  ;;  %vm317_vm0 = vcmask 1046528   ;;  %s2183_s21 = smov 4   ;;  %vm398_vm1 = vcmask 1045504   ;;  %vm1273_vm2 = vcmask 31744   ;;  %vm1306_vm3 = vcmask 64512  }
   0xc   : > { %s2184_s22 = smov 8   ;;  %s2185_s23 = smov 12   ;;  %vm1339_vm4 = vcmask 97280   ;;  %vm1372_vm5 = vcmask 130048   ;;  %vm1405_vm6 = vcmask 162816   ;;  %vm1639_vm7 = vcmask 1043456  }
   0xd   : > { %s4682_s16 = smov (!%p199_p3, %s2066_s16), 1  ;;  %s2186_s24 = smov 16   ;;  %vm1438_vm8 = vcmask 195584   ;;  %vm1471_vm9 = vcmask 228352   ;;  %vm1504_vm10 = vcmask 261120   ;;  %vm1542_vm11 = vcmask 293888  }
   0xe   : > { %s2125_s17 = smul.u32 432, %s4682_s16  ;;  %s2187_s25 = smov 20   ;;  %vm1857_vm12 = vcmask 57344  }
   0xf   : > { %s2188_s26 = smov 28   ;;  %s2189_s27 = smov 24  }
  0x10   : > { %s2230_s20 = scalar_lea.vmem %s4272_s0, %s2125_s17  ;;  %s2190_s28 = smov 32  }
  0x11   : > { %v2233_v0 = vld [vmem:[%s2230_s20 + $0x30] sm:$0xff]  ;;  %v2236_v1 = vld [vmem:[%s2230_s20 + $0x38] sm:$0xff]  ;;  %v2244_v5 = vld [vmem:[%s2230_s20 + $0x20] sm:$0xff]  ;;  %s2109_s13 = sshll.u32 %s4682_s16, 8 }
  0x12   : > { %v2239_v2 = vld [vmem:[%s2230_s20 + $0x18] sm:$0xff]  ;;  %v328_v3 = vrot.slane %v2233_v0, 1  ;;  %v329_v4 = vrot.slane %v2236_v1, 1  ;;  %v2248_v7 = vld [vmem:[%s2230_s20] sm:$0xff]  ;;  %v2251_v8 = vld [vmem:[%s2230_s20 + $0x8] sm:$0xff]  ;;  %v324_v9 = vrot.slane %v2244_v5, 1  ;;  %s3968_s18 = scalar_lea.vmem %s4274_s2, %s2109_s13 }
  0x13   : > { %v323_v6 = vrot.slane %v2239_v2, 1  ;;  %v318_v10 = vrot.slane %v2248_v7, 1  ;;  %v319_v11 = vrot.slane %v2251_v8, 1  ;;  %v2257_v12 = vld [vmem:[%s2230_s20 + $0x40] sm:$0x3]  ;;  %v2291_v25 = vld [vmem:[%s2230_s20 + $0x68] sm:$0xff] }
  0x14   : > { %v2260_v13 = vsel %vm317_vm0, %v328_v3, %v329_v4  ;;  %v2263_v14 = vld [vmem:[%s2230_s20 + $0x28] sm:$0x3]  ;;  %v2266_v15 = vld [vmem:[%s2230_s20 + $0x10] sm:$0x3]  ;;  %v331_v18 = vrot.slane %v2257_v12, 1  ;;  %v2288_v24 = vld [vmem:[%s2230_s20 + $0x60] sm:$0xff] }
  0x15   : > { %513 = vrot.lane.b32.xlu2 %v2260_v13, %s2183_s21  ;;  %v2271_v16 = vsel %vm317_vm0, %v323_v6, %v324_v9  ;;  %v320_v17 = vsel %vm317_vm0, %v318_v10, %v319_v11  ;;  %v326_v19 = vrot.slane %v2263_v14, 1  ;;  %v321_v20 = vrot.slane %v2266_v15, 1  ;;  %v2294_v26 = vld [vmem:[%s2230_s20 + $0x50] sm:$0xff]  ;;  %v2297_v27 = vld [vmem:[%s2230_s20 + $0x58] sm:$0x3]  ;;  %v2300_v28 = vld [vmem:[%s2230_s20 + $0x48] sm:$0xff] }
  0x16   : > { %509 = vrot.lane.b32.xlu1 %v2271_v16, %s2183_s21  ;;  %505 = vrot.lane.b32.xlu0 %v320_v17, %s2183_s21  ;;  %v2281_v21 = vsel %vm317_vm0, %v329_v4, %v331_v18  ;;  %v338_v29 = vrot.slane %v2288_v24, 1  ;;  %v339_v30 = vrot.slane %v2291_v25, 1  ;;  %v334_v31 = vrot.slane %v2294_v26, 1  ;;  %v2322_v37 = vld [vmem:[%s2230_s20 + $0x80] sm:$0xff]  ;;  %v2325_v38 = vld [vmem:[%s2230_s20 + $0x88] sm:$0x3] }
  0x17   : > { %v2284_v22 = vsel %vm317_vm0, %v324_v9, %v326_v19  ;;  %v322_v23 = vsel %vm317_vm0, %v319_v11, %v321_v20  ;;  %v336_v32 = vrot.slane %v2297_v27, 1  ;;  %v333_v33 = vrot.slane %v2300_v28, 1  ;;  %v2328_v39 = vld [vmem:[%s2230_s20 + $0x78] sm:$0xff]  ;;  %v2331_v40 = vld [vmem:[%s2230_s20 + $0x70] sm:$0x3]  ;;  %v2353_v48 = vld [vmem:[%s2230_s20 + $0xa8] sm:$0xff] }
  0x18   : > { %v2313_v34 = vsel %vm317_vm0, %v338_v29, %v339_v30  ;;  %v344_v41 = vrot.slane %v2322_v37, 1  ;;  %v346_v42 = vrot.slane %v2325_v38, 1  ;;  %v343_v43 = vrot.slane %v2328_v39, 1  ;;  %v2356_v49 = vld [vmem:[%s2230_s20 + $0xb0] sm:$0xff]  ;;  %v2359_v50 = vld [vmem:[%s2230_s20 + $0x98] sm:$0xff]  ;;  %v2388_v61 = vld [vmem:[%s2230_s20 + $0xc8] sm:$0xff] }
  0x19   : > { %4364 = vst [vmem:[#allocation2_spill] sm:$0xff] %v2313_v34  ;;  %v2316_v35 = vsel %vm317_vm0, %v334_v31, %v336_v32  ;;  %v2319_v36 = vsel %vm317_vm0, %v333_v33, %v334_v31  ;;  %v341_v44 = vrot.slane %v2331_v40, 1  ;;  %v2362_v51 = vld [vmem:[%s2230_s20 + $0xa0] sm:$0x3]  ;;  %v2365_v52 = vld [vmem:[%s2230_s20 + $0x90] sm:$0xff]  ;;  %v353_v53 = vrot.slane %v2353_v48, 1 }
  0x1a   : > { %v2344_v45 = vsel %vm317_vm0, %v344_v41, %v346_v42  ;;  %v2347_v46 = vsel %vm317_vm0, %v343_v43, %v344_v41  ;;  %v354_v54 = vrot.slane %v2356_v49, 1  ;;  %v349_v55 = vrot.slane %v2359_v50, 1  ;;  %v2391_v62 = vld [vmem:[%s2230_s20 + $0xd0] sm:$0x3]  ;;  %v2394_v63 = vld [vmem:[%s2230_s20 + $0xc0] sm:$0xff]  ;;  %v2422_v20 = vld [vmem:[%s2230_s20 + $0xf8] sm:$0xff] }
  0x1b   : > { %4365 = vst [vmem:[#allocation3_spill] sm:$0xff] %v2344_v45  ;;  %v2350_v47 = vsel %vm317_vm0, %v339_v30, %v341_v44  ;;  %v351_v56 = vrot.slane %v2362_v51, 1  ;;  %v348_v57 = vrot.slane %v2365_v52, 1  ;;  %v2397_v3 = vld [vmem:[%s2230_s20 + $0xb8] sm:$0x3]  ;;  %v359_v4 = vrot.slane %v2388_v61, 1 }
  0x1c   : > { %4366 = vst [vmem:[#allocation4_spill] sm:$0xff] %v2347_v46  ;;  %v2379_v58 = vsel %vm317_vm0, %v353_v53, %v354_v54  ;;  %v361_v6 = vrot.slane %v2391_v62, 1  ;;  %v358_v9 = vrot.slane %v2394_v63, 1  ;;  %v356_v10 = vrot.slane %v2397_v3, 1  ;;  %v2419_v19 = vld [vmem:[%s2230_s20 + $0xf0] sm:$0xff]  ;;  %v2431_v30 = vld [vmem:[%s2230_s20 + $0xd8] sm:$0xff] }
  0x1d   : > { %515 = vrot.lane.b32.xlu2 %v2281_v21, %s2183_s21  ;;  %4367 = vst [vmem:[#allocation5_spill] sm:$0xff] %v2350_v47  ;;  %v2382_v59 = vsel %vm317_vm0, %v349_v55, %v351_v56  ;;  %v2385_v60 = vsel %vm317_vm0, %v348_v57, %v349_v55  ;;  %v2428_v29 = vld [vmem:[%s2230_s20 + $0xe8] sm:$0x3]  ;;  %v368_v31 = vrot.slane %v2419_v19, 1  ;;  %v369_v32 = vrot.slane %v2422_v20, 1 }
  0x1e   : > { %511 = vrot.lane.b32.xlu1 %v2284_v22, %s2183_s21  ;;  %507 = vrot.lane.b32.xlu0 %v322_v23, %s2183_s21  ;;  %4368 = vst [vmem:[#allocation6_spill] sm:$0xff] %v2379_v58  ;;  %v2410_v11 = vsel %vm317_vm0, %v359_v4, %v361_v6  ;;  %v2413_v17 = vsel %vm317_vm0, %v358_v9, %v359_v4  ;;  %v2425_v23 = vld [vmem:[%s2230_s20 + $0xe0] sm:$0xff]  ;;  %v366_v41 = vrot.slane %v2428_v29, 1  ;;  %v363_v42 = vrot.slane %v2431_v30, 1  ;;  %v2457_v55 = vld [vmem:[%s2230_s20 + $0x118] sm:$0x3] }
  0x1f   : > { %4369 = vst [vmem:[#allocation7_spill] sm:$0xff] %v2382_v59  ;;  %v2416_v18 = vsel %vm317_vm0, %v354_v54, %v356_v10  ;;  %v364_v33 = vrot.slane %v2425_v23, 1  ;;  %v2445_v43 = vsel %vm317_vm0, %v368_v31, %v369_v32  ;;  %v2454_v54 = vld [vmem:[%s2230_s20 + $0x110] sm:$0xff]  ;;  %v2460_v56 = vld [vmem:[%s2230_s20 + $0x108] sm:$0xff]  ;;  %v2463_v57 = vld [vmem:[%s2230_s20 + $0x100] sm:$0x3] }
  0x20   : > { %4370 = vst [vmem:[#allocation8_spill] sm:$0xff] %v2385_v60  ;;  %v374_v4 = vrot.slane %v2454_v54, 1  ;;  %v376_v6 = vrot.slane %v2457_v55, 1  ;;  %v373_v9 = vrot.slane %v2460_v56, 1  ;;  %v371_v10 = vrot.slane %v2463_v57, 1 }
  0x21   : > { %4371 = vst [vmem:[#allocation9_spill] sm:$0xff] %v2410_v11  ;;  %v2448_v44 = vsel %vm317_vm0, %v364_v33, %v366_v41  ;;  %v2451_v53 = vsel %vm317_vm0, %v363_v42, %v364_v33  ;;  %v2485_v42 = vld [vmem:[%s2230_s20 + $0x138] sm:$0xff] }
  0x22   : > { %4372 = vst [vmem:[#allocation10_spill] sm:$0xff] %v2413_v17  ;;  %v2476_v31 = vsel %vm317_vm0, %v374_v4, %v376_v6  ;;  %v2479_v33 = vsel %vm317_vm0, %v373_v9, %v374_v4  ;;  %v2482_v41 = vsel %vm317_vm0, %v369_v32, %v371_v10  ;;  %v2497_v6 = vld [vmem:[%s2230_s20 + $0x120] sm:$0xff]  ;;  %v383_v32 = vrot.slane %v2485_v42, 1 }
  0x23   : > { %4373 = vst [vmem:[#allocation11_spill] sm:$0xff] %v2416_v18 }
  0x24   : > { %4374 = vst [vmem:[#allocation12_spill] sm:$0xff] %v2445_v43 }
  0x25   : > { %521 = vrot.lane.b32.xlu2 %v2313_v34, %s2183_s21  ;;  %4375 = vst [vmem:[#allocation13_spill] sm:$0xff] %v2448_v44  ;;  %v2557_v34 = vld [vmem:[%s2230_s20 + $0x168] sm:$0xff] }
  0x26   : > { %519 = vrot.lane.b32.xlu1 %v2316_v35, %s2183_s21  ;;  %517 = vrot.lane.b32.xlu0 %v2319_v36, %s2183_s21  ;;  %4376 = vst [vmem:[#allocation14_spill] sm:$0xff] %v2451_v53 }
  0x27   : > { %4377 = vst [vmem:[#allocation15_spill] sm:$0xff] %v2476_v31 }
  0x28   : > { %4378 = vst [vmem:[#allocation16_spill] sm:$0xff] %v2479_v33 }
  0x29   : > { %4379 = vst [vmem:[#allocation17_spill] sm:$0xff] %v2482_v41 }
  0x2a   : > { %4387 = vst [vmem:[#allocation25_spill] sm:$0xff] %v2557_v34 }
  0x2d   : > { %527 = vrot.lane.b32.xlu2 %v2344_v45, %s2183_s21  ;;  %v2529_v45 = vld [vmem:[%s2230_s20 + $0x148] sm:$0x3] }
  0x2e   : > { %525 = vrot.lane.b32.xlu1 %v2347_v46, %s2183_s21  ;;  %523 = vrot.lane.b32.xlu0 %v2350_v47, %s2183_s21 }
  0x35   : > { %533 = vrot.lane.b32.xlu2 %v2379_v58, %s2183_s21 }
  0x36   : > { %531 = vrot.lane.b32.xlu1 %v2382_v59, %s2183_s21  ;;  %529 = vrot.lane.b32.xlu0 %v2385_v60, %s2183_s21 }
  0x3d   : > { %539 = vrot.lane.b32.xlu2 %v2410_v11, %s2183_s21  ;;  %v2491_v11 = vld [vmem:[%s2230_s20 + $0x128] sm:$0xff] }
  0x3e   : > { %537 = vrot.lane.b32.xlu1 %v2413_v17, %s2183_s21  ;;  %535 = vrot.lane.b32.xlu0 %v2416_v18, %s2183_s21  ;;  %v379_v9 = vrot.slane %v2491_v11, 1  ;;  %v2523_v18 = vld [vmem:[%s2230_s20 + $0x160] sm:$0x3]  ;;  %v2526_v17 = vld [vmem:[%s2230_s20 + $0x150] sm:$0xff] }
  0x45   : > { %545 = vrot.lane.b32.xlu2 %v2445_v43, %s2183_s21  ;;  %v2488_v43 = vld [vmem:[%s2230_s20 + $0x140] sm:$0xff] }
  0x46   : > { %543 = vrot.lane.b32.xlu1 %v2448_v44, %s2183_s21  ;;  %541 = vrot.lane.b32.xlu0 %v2451_v53, %s2183_s21  ;;  %4380 = vst [vmem:[#allocation18_spill] sm:$0xff] %v2488_v43  ;;  %v2494_v53 = vld [vmem:[%s2230_s20 + $0x130] sm:$0x3]  ;;  %v384_v4 = vrot.slane %v2488_v43, 1  ;;  %v378_v44 = vrot.slane %v2497_v6, 1 }
  0x47   : > { %v381_v10 = vrot.slane %v2494_v53, 1 }
  0x48   : > { %v2511_v58 = vsel %vm317_vm0, %v383_v32, %v384_v4  ;;  %v391_v32 = vrot.slane %v2523_v18, 1 }
  0x49   : > { %4381 = vst [vmem:[#allocation19_spill] sm:$0xff] %v2511_v58 }
  0x4d   : > { %551 = vrot.lane.b32.xlu2 %v2476_v31, %s2183_s21  ;;  %v2514_v31 = vsel %vm317_vm0, %v379_v9, %v381_v10  ;;  %v386_v10 = vrot.slane %v2529_v45, 1 }
  0x4e   : > { %549 = vrot.lane.b32.xlu1 %v2479_v33, %s2183_s21  ;;  %547 = vrot.lane.b32.xlu0 %v2482_v41, %s2183_s21  ;;  %4382 = vst [vmem:[#allocation20_spill] sm:$0xff] %v2514_v31  ;;  %v2517_v33 = vsel %vm317_vm0, %v378_v44, %v379_v9  ;;  %v2520_v41 = vld [vmem:[%s2230_s20 + $0x158] sm:$0xff]  ;;  %v388_v9 = vrot.slane %v2526_v17, 1 }
  0x4f   : > { %4383 = vst [vmem:[#allocation21_spill] sm:$0xff] %v2517_v33  ;;  %v389_v44 = vrot.slane %v2520_v41, 1 }
  0x51   : > { %v2542_v60 = vsel %vm317_vm0, %v389_v44, %v391_v32  ;;  %v2545_v59 = vsel %vm317_vm0, %v388_v9, %v389_v44  ;;  %v399_v44 = vrot.slane %v2248_v7, 2  ;;  %v405_v7 = vrot.slane %v2244_v5, 2 }
  0x52   : > { %4384 = vst [vmem:[#allocation22_spill] sm:$0xff] %v2542_v60 }
  0x53   : > { %4385 = vst [vmem:[#allocation23_spill] sm:$0xff] %v2545_v59 }
  0x55   : > { %557 = vrot.lane.b32.xlu2 %v2511_v58, %s2183_s21  ;;  %v2548_v58 = vsel %vm317_vm0, %v384_v4, %v386_v10  ;;  %v400_v4 = vrot.slane %v2251_v8, 2  ;;  %v393_v10 = vrot.slane %v2557_v34, 1  ;;  %v407_v8 = vrot.slane %v2263_v14, 2 }
  0x56   : > { %555 = vrot.lane.b32.xlu1 %v2514_v31, %s2183_s21  ;;  %553 = vrot.lane.b32.xlu0 %v2517_v33, %s2183_s21  ;;  %4386 = vst [vmem:[#allocation24_spill] sm:$0xff] %v2548_v58  ;;  %v2551_v31 = vld [vmem:[%s2230_s20 + $0x170] sm:$0xff]  ;;  %v2554_v33 = vld [vmem:[%s2230_s20 + $0x178] sm:$0x3]  ;;  %v414_v14 = vrot.slane %v2300_v28, 2 }
  0x57   : > { %v394_v32 = vrot.slane %v2551_v31, 1  ;;  %v396_v9 = vrot.slane %v2554_v33, 1  ;;  %v401_v47 = vsel %vm398_vm1, %v399_v44, %v400_v4  ;;  %v404_v44 = vrot.slane %v2239_v2, 2 }
  0x5d   : > { %563 = vrot.lane.b32.xlu2 %v2542_v60, %s2183_s21  ;;  %v2572_v60 = vsel %vm317_vm0, %v394_v32, %v396_v9  ;;  %v402_v9 = vrot.slane %v2266_v15, 2  ;;  %v415_v15 = vrot.slane %v2294_v26, 2 }
  0x5e   : > { %561 = vrot.lane.b32.xlu1 %v2545_v59, %s2183_s21  ;;  %559 = vrot.lane.b32.xlu0 %v2548_v58, %s2183_s21  ;;  %4388 = vst [vmem:[#allocation26_spill] sm:$0xff] %v2572_v60  ;;  %v2575_v59 = vsel %vm317_vm0, %v393_v10, %v394_v32  ;;  %v2587_v32 = vsel %vm398_vm1, %v405_v7, %v407_v8  ;;  %v410_v8 = vrot.slane %v2236_v1, 2 }
  0x5f   : > { %4389 = vst [vmem:[#allocation27_spill] sm:$0xff] %v2575_v59  ;;  %v2590_v10 = vsel %vm398_vm1, %v404_v44, %v405_v7  ;;  %v412_v7 = vrot.slane %v2257_v12, 2  ;;  %v2606_v44 = vsel %vm398_vm1, %v414_v14, %v415_v15  ;;  %v420_v12 = vrot.slane %v2291_v25, 2 }
  0x60   : > { %4390 = vst [vmem:[#allocation28_spill] sm:$0xff] %v2587_v32  ;;  %v422_v14 = vrot.slane %v2331_v40, 2  ;;  %v430_v40 = vrot.slane %v2359_v50, 2 }
  0x61   : > { %4392 = vst [vmem:[#allocation30_spill] sm:$0xff] %v2606_v44 }
  0x65   : > { %601 = vrot.lane.b32.xlu2 %v401_v47, %s2184_s22  ;;  %v403_v47 = vsel %vm398_vm1, %v400_v4, %v402_v9  ;;  %v409_v4 = vrot.slane %v2233_v0, 2  ;;  %v2609_v9 = vsel %vm398_vm1, %v410_v8, %v412_v7  ;;  %v419_v7 = vrot.slane %v2288_v24, 2 }
  0x66   : > { %567 = vrot.lane.b32.xlu1 %v2572_v60, %s2183_s21  ;;  %565 = vrot.lane.b32.xlu0 %v2575_v59, %s2183_s21  ;;  %s211_s21 = scalar_lea.vmem %s4275_s3, %s4682_s16 }
  0x6d   : > { %607 = vrot.lane.b32.xlu2 %v2587_v32, %s2184_s22 }
  0x6e   : > { %605 = vrot.lane.b32.xlu1 %v2590_v10, %s2184_s22  ;;  %603 = vrot.lane.b32.xlu0 %v403_v47, %s2184_s22  ;;  %v2612_v47 = vsel %vm398_vm1, %v409_v4, %v410_v8  ;;  %v417_v8 = vrot.slane %v2297_v27, 2  ;;  %v2627_v4 = vsel %vm398_vm1, %v420_v12, %v422_v14  ;;  %v429_v27 = vrot.slane %v2365_v52, 2 }
  0x6f   : > { %v2600_v59 = vpop.permute.xlu2 %513  ;;  %4394 = vst [vmem:[#allocation32_spill] sm:$0xff] %v2627_v4 }
  0x70   : > { %4391 = vst [vmem:[#allocation29_spill] sm:$0xff] %v2600_v59  ;;  %v2633_v32 = vsel %vm398_vm1, %v415_v15, %v417_v8  ;;  %v427_v15 = vrot.slane %v2325_v38, 2  ;;  %v2649_v8 = vsel %vm398_vm1, %v429_v27, %v430_v40  ;;  %v435_v38 = vrot.slane %v2356_v49, 2 }
  0x71   : > { %4396 = vst [vmem:[#allocation34_spill] sm:$0xff] %v2633_v32  ;;  %v437_v27 = vrot.slane %v2397_v3, 2  ;;  %v445_v3 = vrot.slane %v2425_v23, 2 }
  0x72   : > { %4398 = vst [vmem:[#allocation36_spill] sm:$0xff] %v2649_v8 }
  0x75   : > { %613 = vrot.lane.b32.xlu2 %v2606_v44, %s2184_s22  ;;  %v2630_v44 = vsel %vm398_vm1, %v419_v7, %v420_v12  ;;  %v425_v12 = vrot.slane %v2322_v37, 2  ;;  %v424_v7 = vrot.slane %v2328_v39, 2 }
  0x76   : > { %611 = vrot.lane.b32.xlu1 %v2609_v9, %s2184_s22  ;;  %609 = vrot.lane.b32.xlu0 %v2612_v47, %s2184_s22  ;;  %4395 = vst [vmem:[#allocation33_spill] sm:$0xff] %v2630_v44 }
  0x77   : > { %v2622_v59 = vpop.permute.xlu2 %515 }
  0x78   : > { %4393 = vst [vmem:[#allocation31_spill] sm:$0xff] %v2622_v59  ;;  %v2652_v59 = vsel %vm398_vm1, %v425_v12, %v427_v15  ;;  %v434_v15 = vrot.slane %v2353_v48, 2 }
  0x79   : > { %4399 = vst [vmem:[#allocation37_spill] sm:$0xff] %v2652_v59 }
  0x7d   : > { %619 = vrot.lane.b32.xlu2 %v2627_v4, %s2184_s22  ;;  %v2655_v4 = vsel %vm398_vm1, %v424_v7, %v425_v12  ;;  %v432_v12 = vrot.slane %v2362_v51, 2  ;;  %v444_v51 = vrot.slane %v2431_v30, 2 }
  0x7e   : > { %617 = vrot.lane.b32.xlu1 %v2630_v44, %s2184_s22  ;;  %615 = vrot.lane.b32.xlu0 %v2633_v32, %s2184_s22  ;;  %4400 = vst [vmem:[#allocation38_spill] sm:$0xff] %v2655_v4 }
  0x7f   : > { %v2643_v14 = vpop.permute.xlu2 %521 }
  0x80   : > { %4397 = vst [vmem:[#allocation35_spill] sm:$0xff] %v2643_v14 }
  0x85   : > { %625 = vrot.lane.b32.xlu2 %v2649_v8, %s2184_s22  ;;  %v2674_v8 = vsel %vm398_vm1, %v435_v38, %v437_v27 }
  0x86   : > { %623 = vrot.lane.b32.xlu1 %v2652_v59, %s2184_s22  ;;  %621 = vrot.lane.b32.xlu0 %v2655_v4, %s2184_s22  ;;  %4404 = vst [vmem:[#allocation42_spill] sm:$0xff] %v2674_v8  ;;  %v2677_v59 = vsel %vm398_vm1, %v434_v15, %v435_v38  ;;  %v2680_v4 = vsel %vm398_vm1, %v430_v40, %v432_v12  ;;  %v440_v38 = vrot.slane %v2388_v61, 2  ;;  %v442_v40 = vrot.slane %v2391_v62, 2 }
  0x87   : > { %v2665_v14 = vpop.permute.xlu2 %527  ;;  %4405 = vst [vmem:[#allocation43_spill] sm:$0xff] %v2677_v59  ;;  %v439_v15 = vrot.slane %v2394_v63, 2  ;;  %v450_v62 = vrot.slane %v2422_v20, 2 }
  0x88   : > { %4401 = vst [vmem:[#allocation39_spill] sm:$0xff] %v2665_v14  ;;  %v2669_v7 = vpop.permute.xlu1 %509  ;;  %v2671_v32 = vpop.permute.xlu0 %505 }
  0x89   : > { %4402 = vst [vmem:[#allocation40_spill] sm:$0xff] %v2669_v7  ;;  %v2700_v7 = vsel %vm398_vm1, %v444_v51, %v445_v3  ;;  %v452_v51 = vrot.slane %v2463_v57, 2  ;;  %v460_v57 = vrot.slane %v2491_v11, 2 }
  0x8a   : > { %4403 = vst [vmem:[#allocation41_spill] sm:$0xff] %v2671_v32  ;;  %v2703_v32 = vsel %vm398_vm1, %v440_v38, %v442_v40  ;;  %v449_v40 = vrot.slane %v2419_v19, 2 }
  0x8b   : > { %4409 = vst [vmem:[#allocation47_spill] sm:$0xff] %v2700_v7 }
  0x8c   : > { %4410 = vst [vmem:[#allocation48_spill] sm:$0xff] %v2703_v32 }
  0x8d   : > { %631 = vrot.lane.b32.xlu2 %v2674_v8, %s2184_s22  ;;  %v2706_v8 = vsel %vm398_vm1, %v439_v15, %v440_v38  ;;  %v447_v38 = vrot.slane %v2428_v29, 2  ;;  %v459_v29 = vrot.slane %v2497_v6, 2 }
  0x8e   : > { %629 = vrot.lane.b32.xlu1 %v2677_v59, %s2184_s22  ;;  %627 = vrot.lane.b32.xlu0 %v2680_v4, %s2184_s22  ;;  %4411 = vst [vmem:[#allocation49_spill] sm:$0xff] %v2706_v8 }
  0x8f   : > { %v2690_v27 = vpop.permute.xlu2 %533 }
  0x90   : > { %4406 = vst [vmem:[#allocation44_spill] sm:$0xff] %v2690_v27  ;;  %v2695_v12 = vpop.permute.xlu1 %511  ;;  %v2697_v14 = vpop.permute.xlu0 %507  ;;  %v2725_v27 = vsel %vm398_vm1, %v450_v62, %v452_v51 }
  0x91   : > { %4407 = vst [vmem:[#allocation45_spill] sm:$0xff] %v2695_v12 }
  0x92   : > { %4408 = vst [vmem:[#allocation46_spill] sm:$0xff] %v2697_v14 }
  0x93   : > { %4415 = vst [vmem:[#allocation53_spill] sm:$0xff] %v2725_v27 }
  0x95   : > { %637 = vrot.lane.b32.xlu2 %v2700_v7, %s2184_s22  ;;  %v2728_v7 = vsel %vm398_vm1, %v449_v40, %v450_v62  ;;  %v455_v62 = vrot.slane %v2454_v54, 2  ;;  %v454_v40 = vrot.slane %v2460_v56, 2 }
  0x96   : > { %635 = vrot.lane.b32.xlu1 %v2703_v32, %s2184_s22  ;;  %633 = vrot.lane.b32.xlu0 %v2706_v8, %s2184_s22  ;;  %v2731_v8 = vsel %vm398_vm1, %v445_v3, %v447_v38  ;;  %v457_v3 = vrot.slane %v2457_v55, 2  ;;  %v465_v55 = vrot.slane %v2488_v43, 2 }
  0x97   : > { %v2716_v12 = vpop.permute.xlu2 %539  ;;  %4416 = vst [vmem:[#allocation54_spill] sm:$0xff] %v2731_v8 }
  0x98   : > { %4412 = vst [vmem:[#allocation50_spill] sm:$0xff] %v2716_v12  ;;  %v2720_v15 = vpop.permute.xlu1 %519  ;;  %v2722_v14 = vpop.permute.xlu0 %517  ;;  %v2754_v12 = vsel %vm398_vm1, %v455_v62, %v457_v3  ;;  %v464_v3 = vrot.slane %v2485_v42, 2 }
  0x99   : > { %4413 = vst [vmem:[#allocation51_spill] sm:$0xff] %v2720_v15 }
  0x9a   : > { %4414 = vst [vmem:[#allocation52_spill] sm:$0xff] %v2722_v14  ;;  %v2751_v14 = vsel %vm398_vm1, %v459_v29, %v460_v57  ;;  %v467_v29 = vrot.slane %v2529_v45, 2  ;;  %v474_v45 = vrot.slane %v2557_v34, 2 }
  0x9b   : > { %4420 = vst [vmem:[#allocation58_spill] sm:$0xff] %v2751_v14 }
  0x9c   : > { %4421 = vst [vmem:[#allocation59_spill] sm:$0xff] %v2754_v12 }
  0x9d   : > { %643 = vrot.lane.b32.xlu2 %v2725_v27, %s2184_s22  ;;  %v2757_v27 = vsel %vm398_vm1, %v454_v40, %v455_v62  ;;  %v462_v62 = vrot.slane %v2494_v53, 2  ;;  %v475_v53 = vrot.slane %v2551_v31, 2 }
  0x9e   : > { %641 = vrot.lane.b32.xlu1 %v2728_v7, %s2184_s22  ;;  %639 = vrot.lane.b32.xlu0 %v2731_v8, %s2184_s22  ;;  %4422 = vst [vmem:[#allocation60_spill] sm:$0xff] %v2757_v27 }
  0x9f   : > { %v2741_v51 = vpop.permute.xlu2 %545 }
  0xa0   : > { %4417 = vst [vmem:[#allocation55_spill] sm:$0xff] %v2741_v51  ;;  %v2746_v38 = vpop.permute.xlu1 %525  ;;  %v2748_v15 = vpop.permute.xlu0 %523  ;;  %v2776_v51 = vsel %vm398_vm1, %v465_v55, %v467_v29 }
  0xa1   : > { %4418 = vst [vmem:[#allocation56_spill] sm:$0xff] %v2746_v38 }
  0xa2   : > { %4419 = vst [vmem:[#allocation57_spill] sm:$0xff] %v2748_v15 }
  0xa3   : > { %4426 = vst [vmem:[#allocation64_spill] sm:$0xff] %v2776_v51 }
  0xa5   : > { %649 = vrot.lane.b32.xlu2 %v2751_v14, %s2184_s22  ;;  %v2779_v14 = vsel %vm398_vm1, %v464_v3, %v465_v55  ;;  %v470_v55 = vrot.slane %v2520_v41, 2  ;;  %v469_v3 = vrot.slane %v2526_v17, 2 }
  0xa6   : > { %647 = vrot.lane.b32.xlu1 %v2754_v12, %s2184_s22  ;;  %645 = vrot.lane.b32.xlu0 %v2757_v27, %s2184_s22  ;;  %4427 = vst [vmem:[#allocation65_spill] sm:$0xff] %v2779_v14  ;;  %v2782_v27 = vsel %vm398_vm1, %v460_v57, %v462_v62  ;;  %v472_v57 = vrot.slane %v2523_v18, 2 }
  0xa7   : > { %v2767_v38 = vpop.permute.xlu2 %551  ;;  %4428 = vst [vmem:[#allocation66_spill] sm:$0xff] %v2782_v27 }
  0xa8   : > { %4423 = vst [vmem:[#allocation61_spill] sm:$0xff] %v2767_v38  ;;  %v2771_v40 = vpop.permute.xlu1 %531  ;;  %v2773_v15 = vpop.permute.xlu0 %529  ;;  %v2802_v38 = vsel %vm398_vm1, %v474_v45, %v475_v53  ;;  %v477_v45 = vrot.slane %v2554_v33, 2 }
  0xa9   : > { %4424 = vst [vmem:[#allocation62_spill] sm:$0xff] %v2771_v40  ;;  %v2805_v40 = vsel %vm398_vm1, %v470_v55, %v472_v57 }
  0xaa   : > { %4425 = vst [vmem:[#allocation63_spill] sm:$0xff] %v2773_v15 }
  0xab   : > { %4431 = vst [vmem:[#allocation69_spill] sm:$0xff] %v2805_v40 }
  0xad   : > { %655 = vrot.lane.b32.xlu2 %v2776_v51, %s2184_s22  ;;  %v2808_v51 = vsel %vm398_vm1, %v469_v3, %v470_v55  ;;  %v2824_v55 = vsel %vm398_vm1, %v475_v53, %v477_v45 }
  0xae   : > { %653 = vrot.lane.b32.xlu1 %v2779_v14, %s2184_s22  ;;  %651 = vrot.lane.b32.xlu0 %v2782_v27, %s2184_s22  ;;  %4434 = vst [vmem:[#allocation72_spill] sm:$0xff] %v2824_v55 }
  0xaf   : > { %v2792_v29 = vpop.permute.xlu2 %557 }
  0xb0   : > { %4429 = vst [vmem:[#allocation67_spill] sm:$0xff] %v2792_v29  ;;  %v2797_v62 = vpop.permute.xlu1 %537  ;;  %v2799_v15 = vpop.permute.xlu0 %535 }
  0xb1   : > { %4430 = vst [vmem:[#allocation68_spill] sm:$0xff] %v2797_v62 }
  0xb5   : > { %661 = vrot.lane.b32.xlu2 %v2802_v38, %s2184_s22 }
  0xb6   : > { %659 = vrot.lane.b32.xlu1 %v2805_v40, %s2184_s22  ;;  %657 = vrot.lane.b32.xlu0 %v2808_v51, %s2184_s22 }
  0xb7   : > { %v2816_v18 = vpop.permute.xlu2 %563 }
  0xb8   : > { %4432 = vst [vmem:[#allocation70_spill] sm:$0xff] %v2816_v18  ;;  %v2819_v29 = vpop.permute.xlu1 %543  ;;  %v2821_v57 = vpop.permute.xlu0 %541 }
  0xb9   : > { %4433 = vst [vmem:[#allocation71_spill] sm:$0xff] %v2819_v29 }
  0xbd   : > { %699 = vrot.lane.b32.xlu2 %v2244_v5, %s2185_s23 }
  0xbe   : > { %697 = vrot.lane.b32.xlu1 %v2239_v2, %s2185_s23  ;;  %663 = vrot.lane.b32.xlu0 %v2824_v55, %s2184_s22 }
  0xbf   : > { %v2832_v3 = vpop.permute.xlu2 %601 }
  0xc0   : > { %4435 = vst [vmem:[#allocation73_spill] sm:$0xff] %v2832_v3  ;;  %v2834_v33 = vpop.permute.xlu1 %549  ;;  %v2836_v18 = vpop.permute.xlu0 %547 }
  0xc1   : > { %4436 = vst [vmem:[#allocation74_spill] sm:$0xff] %v2834_v33 }
  0xc5   : > { %705 = vrot.lane.b32.xlu2 %v2300_v28, %s2185_s23 }
  0xc6   : > { %703 = vrot.lane.b32.xlu1 %v2236_v1, %s2185_s23  ;;  %701 = vrot.lane.b32.xlu0 %v2233_v0, %s2185_s23 }
  0xc7   : > { %v2844_v5 = vpop.permute.xlu2 %607 }
  0xc8   : > { %4437 = vst [vmem:[#allocation75_spill] sm:$0xff] %v2844_v5  ;;  %v2846_v2 = vpop.permute.xlu1 %555  ;;  %v2848_v53 = vpop.permute.xlu0 %553 }
  0xc9   : > { %4438 = vst [vmem:[#allocation76_spill] sm:$0xff] %v2846_v2 }
  0xcd   : > { %711 = vrot.lane.b32.xlu2 %v2291_v25, %s2185_s23 }
  0xce   : > { %709 = vrot.lane.b32.xlu1 %v2288_v24, %s2185_s23  ;;  %707 = vrot.lane.b32.xlu0 %v2294_v26, %s2185_s23 }
  0xcf   : > { %v2856_v45 = vpop.permute.xlu2 %613 }
  0xd0   : > { %4439 = vst [vmem:[#allocation77_spill] sm:$0xff] %v2856_v45  ;;  %v2858_v1 = vpop.permute.xlu1 %561  ;;  %v2860_v3 = vpop.permute.xlu0 %559 }
  0xd1   : > { %4440 = vst [vmem:[#allocation78_spill] sm:$0xff] %v2858_v1 }
  0xd2   : > { %4441 = vst [vmem:[#allocation79_spill] sm:$0xff] %v2860_v3 }
  0xd5   : > { %717 = vrot.lane.b32.xlu2 %v2365_v52, %s2185_s23 }
  0xd6   : > { %715 = vrot.lane.b32.xlu1 %v2322_v37, %s2185_s23  ;;  %713 = vrot.lane.b32.xlu0 %v2328_v39, %s2185_s23 }
  0xd7   : > { %v2868_v25 = vpop.permute.xlu2 %619 }
  0xd8   : > { %4442 = vst [vmem:[#allocation80_spill] sm:$0xff] %v2868_v25  ;;  %v2870_v24 = vpop.permute.xlu1 %567  ;;  %v2872_v5 = vpop.permute.xlu0 %565 }
  0xd9   : > { %4443 = vst [vmem:[#allocation81_spill] sm:$0xff] %v2870_v24 }
  0xda   : > { %4444 = vst [vmem:[#allocation82_spill] sm:$0xff] %v2872_v5 }
  0xdd   : > { %723 = vrot.lane.b32.xlu2 %v2356_v49, %s2185_s23 }
  0xde   : > { %721 = vrot.lane.b32.xlu1 %v2353_v48, %s2185_s23  ;;  %719 = vrot.lane.b32.xlu0 %v2359_v50, %s2185_s23 }
  0xdf   : > { %v2880_v45 = vpop.permute.xlu2 %625 }
  0xe0   : > { %4445 = vst [vmem:[#allocation83_spill] sm:$0xff] %v2880_v45  ;;  %v2882_v37 = vpop.permute.xlu1 %605  ;;  %v2884_v39 = vpop.permute.xlu0 %603 }
  0xe1   : > { %4446 = vst [vmem:[#allocation84_spill] sm:$0xff] %v2882_v37 }
  0xe2   : > { %4447 = vst [vmem:[#allocation85_spill] sm:$0xff] %v2884_v39 }
  0xe5   : > { %729 = vrot.lane.b32.xlu2 %v2431_v30, %s2185_s23 }
  0xe6   : > { %727 = vrot.lane.b32.xlu1 %v2388_v61, %s2185_s23  ;;  %725 = vrot.lane.b32.xlu0 %v2394_v63, %s2185_s23 }
  0xe7   : > { %v2892_v25 = vpop.permute.xlu2 %631 }
  0xe8   : > { %v2894_v24 = vpop.permute.xlu1 %611  ;;  %v2896_v1 = vpop.permute.xlu0 %609 }
  0xe9   : > { %4448 = vst [vmem:[#allocation86_spill] sm:$0xff] %v2894_v24 }
  0xea   : > { %4449 = vst [vmem:[#allocation87_spill] sm:$0xff] %v2896_v1 }
  0xed   : > { %735 = vrot.lane.b32.xlu2 %v2422_v20, %s2185_s23 }
  0xee   : > { %733 = vrot.lane.b32.xlu1 %v2419_v19, %s2185_s23  ;;  %731 = vrot.lane.b32.xlu0 %v2425_v23, %s2185_s23 }
  0xef   : > { %v2904_v45 = vpop.permute.xlu2 %637 }
  0xf0   : > { %v2906_v61 = vpop.permute.xlu1 %617  ;;  %v2908_v63 = vpop.permute.xlu0 %615 }
  0xf1   : > { %4450 = vst [vmem:[#allocation88_spill] sm:$0xff] %v2906_v61  ;;  %v2950_v61 = vld [vmem:[%s2230_s20 + $0x180] sm:$0xff] }
  0xf2   : > { %4451 = vst [vmem:[#allocation89_spill] sm:$0xff] %v2908_v63 }
  0xf5   : > { %741 = vrot.lane.b32.xlu2 %v2497_v6, %s2185_s23 }
  0xf6   : > { %739 = vrot.lane.b32.xlu1 %v2454_v54, %s2185_s23  ;;  %737 = vrot.lane.b32.xlu0 %v2460_v56, %s2185_s23 }
  0xf7   : > { %v2916_v24 = vpop.permute.xlu2 %643 }
  0xf8   : > { %v2918_v23 = vpop.permute.xlu1 %623  ;;  %v2920_v1 = vpop.permute.xlu0 %621 }
  0xf9   : > { %4452 = vst [vmem:[#allocation90_spill] sm:$0xff] %v2918_v23 }
  0xfa   : > { %4453 = vst [vmem:[#allocation91_spill] sm:$0xff] %v2920_v1  ;;  %v2947_v1 = vld [vmem:[%s2230_s20 + $0x188] sm:$0xff] }
  0xfd   : > { %747 = vrot.lane.b32.xlu2 %v2488_v43, %s2185_s23 }
  0xfe   : > { %745 = vrot.lane.b32.xlu1 %v2485_v42, %s2185_s23  ;;  %743 = vrot.lane.b32.xlu0 %v2491_v11, %s2185_s23 }
  0xff   : > { %v2928_v54 = vpop.permute.xlu2 %649 }
 0x100   : > { %v2930_v56 = vpop.permute.xlu1 %629  ;;  %v2932_v63 = vpop.permute.xlu0 %627 }
 0x105   : > { %753 = vrot.lane.b32.xlu2 %v2557_v34, %s2185_s23 }
 0x106   : > { %751 = vrot.lane.b32.xlu1 %v2520_v41, %s2185_s23  ;;  %749 = vrot.lane.b32.xlu0 %v2526_v17, %s2185_s23 }
 0x107   : > { %v2940_v23 = vpop.permute.xlu2 %655 }
 0x108   : > { %4454 = vst [vmem:[#allocation92_spill] sm:$0xff] %v2940_v23  ;;  %v2942_v42 = vpop.permute.xlu1 %635  ;;  %v2944_v11 = vpop.permute.xlu0 %633 }
 0x109   : > { %4455 = vst [vmem:[#allocation93_spill] sm:$0xff] %v2942_v42 }
 0x10a   : > { %4456 = vst [vmem:[#allocation94_spill] sm:$0xff] %v2944_v11  ;;  %v4488_v11 = vld [vmem:[#allocation16_spill] sm:$0xff] }
 0x10d   : > { %759 = vrot.lane.b32.xlu2 %v2947_v1, %s2185_s23 }
 0x10e   : > { %757 = vrot.lane.b32.xlu1 %v2950_v61, %s2185_s23  ;;  %755 = vrot.lane.b32.xlu0 %v2551_v31, %s2185_s23 }
 0x10f   : > { %v2958_v17 = vpop.permute.xlu2 %661 }
 0x110   : > { %4457 = vst [vmem:[#allocation95_spill] sm:$0xff] %v2958_v17  ;;  %v2960_v41 = vpop.permute.xlu1 %641  ;;  %v2962_v37 = vpop.permute.xlu0 %639 }
 0x111   : > { %4458 = vst [vmem:[#allocation96_spill] sm:$0xff] %v2960_v41 }
 0x112   : > { %4459 = vst [vmem:[#allocation97_spill] sm:$0xff] %v2962_v37 }
 0x115   : > { %797 = vrot.lane.b32.xlu2 %v2260_v13, %s2186_s24 }
 0x116   : > { %795 = vrot.lane.b32.xlu1 %v2284_v22, %s2186_s24  ;;  %793 = vrot.lane.b32.xlu0 %v2271_v16, %s2186_s24 }
 0x117   : > { %v2970_v39 = vpop.permute.xlu2 %699 }
 0x118   : > { %4460 = vst [vmem:[#allocation98_spill] sm:$0xff] %v2970_v39  ;;  %v2972_v2 = vpop.permute.xlu1 %647  ;;  %v2974_v31 = vpop.permute.xlu0 %645  ;;  %v4466_v39 = vld [vmem:[#allocation5_spill] sm:$0xff] }
 0x119   : > { %4461 = vst [vmem:[#allocation99_spill] sm:$0xff] %v2972_v2 }
 0x11a   : > { %4462 = vst [vmem:[#allocation100_spill] sm:$0xff] %v2974_v31  ;;  %v4467_v31 = vld [vmem:[#allocation2_spill] sm:$0xff] }
 0x11d   : > { %803 = vrot.lane.b32.xlu2 %v2316_v35, %s2186_s24 }
 0x11e   : > { %801 = vrot.lane.b32.xlu1 %v2319_v36, %s2186_s24  ;;  %799 = vrot.lane.b32.xlu0 %v2281_v21, %s2186_s24 }
 0x11f   : > { %v2982_v33 = vpop.permute.xlu2 %705 }
 0x120   : > { %4463 = vst [vmem:[#allocation101_spill] sm:$0xff] %v2982_v33  ;;  %v2984_v22 = vpop.permute.xlu1 %653  ;;  %v2986_v16 = vpop.permute.xlu0 %651  ;;  %v4471_v33 = vld [vmem:[#allocation7_spill] sm:$0xff] }
 0x121   : > { %4464 = vst [vmem:[#allocation102_spill] sm:$0xff] %v2984_v22 }
 0x122   : > { %4465 = vst [vmem:[#allocation103_spill] sm:$0xff] %v2986_v16  ;;  %v4472_v16 = vld [vmem:[#allocation8_spill] sm:$0xff] }
 0x125   : > { %809 = vrot.lane.b32.xlu2 %v2347_v46, %s2186_s24  ;;  %v4473_v46 = vld [vmem:[#allocation3_spill] sm:$0xff] }
 0x126   : > { %807 = vrot.lane.b32.xlu1 %v4466_v39, %s2186_s24  ;;  %805 = vrot.lane.b32.xlu0 %v4467_v31, %s2186_s24 }
 0x127   : > { %v2994_v2 = vpop.permute.xlu2 %711 }
 0x128   : > { %4468 = vst [vmem:[#allocation2_spill] sm:$0xff] %v2994_v2  ;;  %v2996_v37 = vpop.permute.xlu1 %659  ;;  %v2998_v41 = vpop.permute.xlu0 %657  ;;  %v4477_v2 = vld [vmem:[#allocation10_spill] sm:$0xff] }
 0x129   : > { %4469 = vst [vmem:[#allocation104_spill] sm:$0xff] %v2996_v37  ;;  %v4479_v37 = vld [vmem:[#allocation6_spill] sm:$0xff] }
 0x12a   : > { %4470 = vst [vmem:[#allocation105_spill] sm:$0xff] %v2998_v41  ;;  %v4478_v41 = vld [vmem:[#allocation11_spill] sm:$0xff] }
 0x12d   : > { %815 = vrot.lane.b32.xlu2 %v4471_v33, %s2186_s24 }
 0x12e   : > { %813 = vrot.lane.b32.xlu1 %v4472_v16, %s2186_s24  ;;  %811 = vrot.lane.b32.xlu0 %v4473_v46, %s2186_s24 }
 0x12f   : > { %v3006_v22 = vpop.permute.xlu2 %717 }
 0x130   : > { %4474 = vst [vmem:[#allocation7_spill] sm:$0xff] %v3006_v22  ;;  %v3008_v39 = vpop.permute.xlu1 %697  ;;  %v3010_v17 = vpop.permute.xlu0 %663  ;;  %v4482_v22 = vld [vmem:[#allocation13_spill] sm:$0xff] }
 0x131   : > { %4475 = vst [vmem:[#allocation8_spill] sm:$0xff] %v3008_v39  ;;  %v4483_v39 = vld [vmem:[#allocation14_spill] sm:$0xff] }
 0x132   : > { %4476 = vst [vmem:[#allocation106_spill] sm:$0xff] %v3010_v17 }
 0x135   : > { %821 = vrot.lane.b32.xlu2 %v4477_v2, %s2186_s24  ;;  %v4484_v2 = vld [vmem:[#allocation9_spill] sm:$0xff] }
 0x136   : > { %819 = vrot.lane.b32.xlu1 %v4478_v41, %s2186_s24  ;;  %817 = vrot.lane.b32.xlu0 %v4479_v37, %s2186_s24 }
 0x137   : > { %v3018_v29 = vpop.permute.xlu2 %723 }
 0x138   : > { %v3020_v34 = vpop.permute.xlu1 %703  ;;  %v3022_v46 = vpop.permute.xlu0 %701 }
 0x139   : > { %4480 = vst [vmem:[#allocation6_spill] sm:$0xff] %v3020_v34  ;;  %v4489_v34 = vld [vmem:[#allocation17_spill] sm:$0xff] }
 0x13a   : > { %4481 = vst [vmem:[#allocation107_spill] sm:$0xff] %v3022_v46 }
 0x13d   : > { %827 = vrot.lane.b32.xlu2 %v4482_v22, %s2186_s24  ;;  %v4490_v22 = vld [vmem:[#allocation12_spill] sm:$0xff] }
 0x13e   : > { %825 = vrot.lane.b32.xlu1 %v4483_v39, %s2186_s24  ;;  %823 = vrot.lane.b32.xlu0 %v4484_v2, %s2186_s24 }
 0x13f   : > { %v3030_v17 = vpop.permute.xlu2 %729 }
 0x140   : > { %4485 = vst [vmem:[#allocation108_spill] sm:$0xff] %v3030_v17  ;;  %v3032_v41 = vpop.permute.xlu1 %709  ;;  %v3034_v5 = vpop.permute.xlu0 %707 }
 0x141   : > { %4486 = vst [vmem:[#allocation109_spill] sm:$0xff] %v3032_v41  ;;  %v4494_v41 = vld [vmem:[#allocation20_spill] sm:$0xff] }
 0x142   : > { %4487 = vst [vmem:[#allocation110_spill] sm:$0xff] %v3034_v5  ;;  %v4495_v5 = vld [vmem:[#allocation21_spill] sm:$0xff] }
 0x145   : > { %833 = vrot.lane.b32.xlu2 %v4488_v11, %s2186_s24  ;;  %v4496_v11 = vld [vmem:[#allocation15_spill] sm:$0xff] }
 0x146   : > { %831 = vrot.lane.b32.xlu1 %v4489_v34, %s2186_s24  ;;  %829 = vrot.lane.b32.xlu0 %v4490_v22, %s2186_s24 }
 0x147   : > { %v3042_v39 = vpop.permute.xlu2 %735 }
 0x148   : > { %4491 = vst [vmem:[#allocation12_spill] sm:$0xff] %v3042_v39  ;;  %v3044_v46 = vpop.permute.xlu1 %715  ;;  %v3046_v2 = vpop.permute.xlu0 %713  ;;  %v4500_v39 = vld [vmem:[#allocation23_spill] sm:$0xff] }
 0x149   : > { %4492 = vst [vmem:[#allocation111_spill] sm:$0xff] %v3044_v46 }
 0x14a   : > { %4493 = vst [vmem:[#allocation112_spill] sm:$0xff] %v3046_v2 }
 0x14d   : > { %839 = vrot.lane.b32.xlu2 %v4494_v41, %s2186_s24  ;;  %v4501_v41 = vld [vmem:[#allocation19_spill] sm:$0xff] }
 0x14e   : > { %837 = vrot.lane.b32.xlu1 %v4495_v5, %s2186_s24  ;;  %835 = vrot.lane.b32.xlu0 %v4496_v11, %s2186_s24  ;;  %v3073_v11 = vld [vmem:[%s2230_s20 + $0x190] sm:$0x3] }
 0x14f   : > { %v3054_v17 = vpop.permute.xlu2 %741 }
 0x150   : > { %4497 = vst [vmem:[#allocation113_spill] sm:$0xff] %v3054_v17  ;;  %v3056_v42 = vpop.permute.xlu1 %721  ;;  %v3058_v34 = vpop.permute.xlu0 %719 }
 0x151   : > { %4498 = vst [vmem:[#allocation114_spill] sm:$0xff] %v3056_v42  ;;  %v4503_v42 = vld [vmem:[#allocation27_spill] sm:$0xff] }
 0x152   : > { %4499 = vst [vmem:[#allocation115_spill] sm:$0xff] %v3058_v34  ;;  %v4504_v34 = vld [vmem:[#allocation22_spill] sm:$0xff] }
 0x155   : > { %845 = vrot.lane.b32.xlu2 %v4500_v39, %s2186_s24  ;;  %v485_v39 = vrot.slane %v3073_v11, 1 }
 0x156   : > { %843 = vrot.lane.b32.xlu1 %v2548_v58, %s2186_s24  ;;  %841 = vrot.lane.b32.xlu0 %v4501_v41, %s2186_s24  ;;  %v483_v41 = vrot.slane %v2947_v1, 1 }
 0x157   : > { %v3066_v46 = vpop.permute.xlu2 %747 }
 0x158   : > { %4502 = vst [vmem:[#allocation116_spill] sm:$0xff] %v3066_v46  ;;  %v3068_v5 = vpop.permute.xlu1 %727  ;;  %v3070_v2 = vpop.permute.xlu0 %725  ;;  %v482_v46 = vrot.slane %v2950_v61, 1 }
 0x15d   : > { %851 = vrot.lane.b32.xlu2 %v2572_v60, %s2186_s24  ;;  %v3091_v60 = vsel %vm317_vm0, %v483_v41, %v485_v39 }
 0x15e   : > { %849 = vrot.lane.b32.xlu1 %v4503_v42, %s2186_s24  ;;  %847 = vrot.lane.b32.xlu0 %v4504_v34, %s2186_s24  ;;  %4507 = vst [vmem:[#allocation119_spill] sm:$0xff] %v3091_v60  ;;  %v3094_v42 = vsel %vm317_vm0, %v482_v46, %v483_v41  ;;  %v4511_v46 = vld [vmem:[#allocation28_spill] sm:$0xff] }
 0x15f   : > { %v3081_v58 = vpop.permute.xlu2 %753  ;;  %4508 = vst [vmem:[#allocation120_spill] sm:$0xff] %v3094_v42 }
 0x160   : > { %4505 = vst [vmem:[#allocation117_spill] sm:$0xff] %v3081_v58  ;;  %v3086_v17 = vpop.permute.xlu1 %733  ;;  %v3088_v23 = vpop.permute.xlu0 %731 }
 0x161   : > { %4506 = vst [vmem:[#allocation118_spill] sm:$0xff] %v3088_v23 }
 0x165   : > { %889 = vrot.lane.b32.xlu2 %v2590_v10, %s2187_s25 }
 0x166   : > { %855 = vrot.lane.b32.xlu1 %v3091_v60, %s2186_s24  ;;  %853 = vrot.lane.b32.xlu0 %v3094_v42, %s2186_s24  ;;  %v4514_v60 = vld [vmem:[#allocation34_spill] sm:$0xff]  ;;  %s214_s24 = scalar_lea.vmem %s4276_s4, %s4682_s16 }
 0x167   : > { %v3102_v34 = vpop.permute.xlu2 %759  ;;  %v4515_v42 = vld [vmem:[#allocation30_spill] sm:$0xff] }
 0x168   : > { %4509 = vst [vmem:[#allocation121_spill] sm:$0xff] %v3102_v34  ;;  %v3104_v58 = vpop.permute.xlu1 %739  ;;  %v3106_v23 = vpop.permute.xlu0 %737 }
 0x169   : > { %4510 = vst [vmem:[#allocation122_spill] sm:$0xff] %v3106_v23 }
 0x16d   : > { %895 = vrot.lane.b32.xlu2 %v2609_v9, %s2187_s25 }
 0x16e   : > { %893 = vrot.lane.b32.xlu1 %v2612_v47, %s2187_s25  ;;  %891 = vrot.lane.b32.xlu0 %v4511_v46, %s2187_s25 }
 0x16f   : > { %v3114_v10 = vpop.permute.xlu2 %797 }
 0x170   : > { %4512 = vst [vmem:[#allocation28_spill] sm:$0xff] %v3114_v10  ;;  %v3116_v39 = vpop.permute.xlu1 %745  ;;  %v3118_v41 = vpop.permute.xlu0 %743  ;;  %v4518_v10 = vld [vmem:[#allocation37_spill] sm:$0xff] }
 0x171   : > { %4513 = vst [vmem:[#allocation123_spill] sm:$0xff] %v3118_v41  ;;  %v4519_v41 = vld [vmem:[#allocation38_spill] sm:$0xff] }
 0x175   : > { %901 = vrot.lane.b32.xlu2 %v2630_v44, %s2187_s25  ;;  %v4520_v44 = vld [vmem:[#allocation32_spill] sm:$0xff] }
 0x176   : > { %899 = vrot.lane.b32.xlu1 %v4514_v60, %s2187_s25  ;;  %897 = vrot.lane.b32.xlu0 %v4515_v42, %s2187_s25 }
 0x177   : > { %v3126_v34 = vpop.permute.xlu2 %803 }
 0x178   : > { %4516 = vst [vmem:[#allocation34_spill] sm:$0xff] %v3126_v34  ;;  %v3128_v23 = vpop.permute.xlu1 %751  ;;  %v3130_v46 = vpop.permute.xlu0 %749  ;;  %v4524_v34 = vld [vmem:[#allocation36_spill] sm:$0xff] }
 0x179   : > { %4517 = vst [vmem:[#allocation30_spill] sm:$0xff] %v3130_v46 }
 0x17d   : > { %907 = vrot.lane.b32.xlu2 %v4518_v10, %s2187_s25 }
 0x17e   : > { %905 = vrot.lane.b32.xlu1 %v4519_v41, %s2187_s25  ;;  %903 = vrot.lane.b32.xlu0 %v4520_v44, %s2187_s25 }
 0x17f   : > { %v3138_v62 = vpop.permute.xlu2 %809 }
 0x180   : > { %4521 = vst [vmem:[#allocation124_spill] sm:$0xff] %v3138_v62  ;;  %v3140_v43 = vpop.permute.xlu1 %757  ;;  %v3142_v3 = vpop.permute.xlu0 %755  ;;  %v4528_v62 = vld [vmem:[#allocation49_spill] sm:$0xff] }
 0x181   : > { %4522 = vst [vmem:[#allocation125_spill] sm:$0xff] %v3140_v43 }
 0x182   : > { %4523 = vst [vmem:[#allocation126_spill] sm:$0xff] %v3142_v3  ;;  %v4529_v3 = vld [vmem:[#allocation42_spill] sm:$0xff] }
 0x185   : > { %913 = vrot.lane.b32.xlu2 %v2677_v59, %s2187_s25 }
 0x186   : > { %911 = vrot.lane.b32.xlu1 %v2680_v4, %s2187_s25  ;;  %909 = vrot.lane.b32.xlu0 %v4524_v34, %s2187_s25 }
 0x187   : > { %v3150_v10 = vpop.permute.xlu2 %815 }
 0x188   : > { %4525 = vst [vmem:[#allocation36_spill] sm:$0xff] %v3150_v10  ;;  %v3152_v41 = vpop.permute.xlu1 %795  ;;  %v3154_v46 = vpop.permute.xlu0 %793  ;;  %v4532_v10 = vld [vmem:[#allocation47_spill] sm:$0xff] }
 0x189   : > { %4526 = vst [vmem:[#allocation127_spill] sm:$0xff] %v3152_v41 }
 0x18a   : > { %4527 = vst [vmem:[#allocation128_spill] sm:$0xff] %v3154_v46 }
 0x18d   : > { %919 = vrot.lane.b32.xlu2 %v2703_v32, %s2187_s25 }
 0x18e   : > { %917 = vrot.lane.b32.xlu1 %v4528_v62, %s2187_s25  ;;  %915 = vrot.lane.b32.xlu0 %v4529_v3, %s2187_s25 }
 0x18f   : > { %v3162_v44 = vpop.permute.xlu2 %821 }
 0x190   : > { %v3164_v43 = vpop.permute.xlu1 %801  ;;  %v3166_v59 = vpop.permute.xlu0 %799 }
 0x191   : > { %4530 = vst [vmem:[#allocation129_spill] sm:$0xff] %v3164_v43  ;;  %v4535_v43 = vld [vmem:[#allocation60_spill] sm:$0xff] }
 0x192   : > { %4531 = vst [vmem:[#allocation130_spill] sm:$0xff] %v3166_v59  ;;  %v4536_v59 = vld [vmem:[#allocation53_spill] sm:$0xff] }
 0x195   : > { %925 = vrot.lane.b32.xlu2 %v2728_v7, %s2187_s25 }
 0x196   : > { %923 = vrot.lane.b32.xlu1 %v2731_v8, %s2187_s25  ;;  %921 = vrot.lane.b32.xlu0 %v4532_v10, %s2187_s25 }
 0x197   : > { %v3174_v32 = vpop.permute.xlu2 %827 }
 0x198   : > { %v3176_v62 = vpop.permute.xlu1 %807  ;;  %v3178_v41 = vpop.permute.xlu0 %805 }
 0x199   : > { %4533 = vst [vmem:[#allocation131_spill] sm:$0xff] %v3176_v62  ;;  %v4539_v62 = vld [vmem:[#allocation58_spill] sm:$0xff] }
 0x19a   : > { %4534 = vst [vmem:[#allocation132_spill] sm:$0xff] %v3178_v41 }
 0x19d   : > { %931 = vrot.lane.b32.xlu2 %v2754_v12, %s2187_s25 }
 0x19e   : > { %929 = vrot.lane.b32.xlu1 %v4535_v43, %s2187_s25  ;;  %927 = vrot.lane.b32.xlu0 %v4536_v59, %s2187_s25 }
 0x19f   : > { %v3186_v46 = vpop.permute.xlu2 %833 }
 0x1a0   : > { %v3188_v8 = vpop.permute.xlu1 %813  ;;  %v3190_v10 = vpop.permute.xlu0 %811 }
 0x1a1   : > { %4537 = vst [vmem:[#allocation53_spill] sm:$0xff] %v3188_v8  ;;  %v487_v8 = vrot.slane %v2950_v61, 2  ;;  %v490_v61 = vrot.slane %v3073_v11, 2 }
 0x1a2   : > { %4538 = vst [vmem:[#allocation133_spill] sm:$0xff] %v3190_v10  ;;  %v488_v10 = vrot.slane %v2947_v1, 2 }
 0x1a5   : > { %937 = vrot.lane.b32.xlu2 %v2779_v14, %s2187_s25  ;;  %v4541_v14 = vld [vmem:[#allocation64_spill] sm:$0xff] }
 0x1a6   : > { %935 = vrot.lane.b32.xlu1 %v2782_v27, %s2187_s25  ;;  %933 = vrot.lane.b32.xlu0 %v4539_v62, %s2187_s25 }
 0x1a7   : > { %v3198_v41 = vpop.permute.xlu2 %839 }
 0x1a8   : > { %v3200_v12 = vpop.permute.xlu1 %819  ;;  %v3202_v43 = vpop.permute.xlu0 %817 }
 0x1a9   : > { %4540 = vst [vmem:[#allocation134_spill] sm:$0xff] %v3202_v43  ;;  %v3217_v43 = vsel %vm398_vm1, %v487_v8, %v488_v10  ;;  %v3231_v8 = vsel %vm398_vm1, %v488_v10, %v490_v61  ;;  %v3246_v10 = vld [vmem:[%s2230_s20 + $0x38] sm:$0xff] }
 0x1aa   : > { %4542 = vst [vmem:[#allocation135_spill] sm:$0xff] %v3217_v43 }
 0x1ab   : > { %4543 = vst [vmem:[#allocation136_spill] sm:$0xff] %v3231_v8 }
 0x1ad   : > { %943 = vrot.lane.b32.xlu2 %v2805_v40, %s2187_s25 }
 0x1ae   : > { %941 = vrot.lane.b32.xlu1 %v2808_v51, %s2187_s25  ;;  %939 = vrot.lane.b32.xlu0 %v4541_v14, %s2187_s25 }
 0x1af   : > { %v3212_v27 = vpop.permute.xlu2 %845 }
 0x1b0   : > { %v3214_v62 = vpop.permute.xlu1 %825  ;;  %v824_v3 = vpop.permute.xlu0 %823 }
 0x1b5   : > { %949 = vrot.lane.b32.xlu2 %v3217_v43, %s2187_s25 }
 0x1b6   : > { %947 = vrot.lane.b32.xlu1 %v2824_v55, %s2187_s25  ;;  %945 = vrot.lane.b32.xlu0 %v2802_v38, %s2187_s25 }
 0x1b7   : > { %v3225_v1 = vpop.permute.xlu2 %851 }
 0x1b8   : > { %v3228_v14 = vpop.permute.xlu1 %831  ;;  %v830_v40 = vpop.permute.xlu0 %829 }
 0x1bd   : > { %1081 = vrot.lane.b32.xlu2 %v2260_v13, %s2188_s26 }
 0x1be   : > { %985 = vrot.lane.b32.xlu1 %v2233_v0, %s2189_s27  ;;  %951 = vrot.lane.b32.xlu0 %v3231_v8, %s2187_s25 }
 0x1bf   : > { %v3239_v43 = vpop.permute.xlu2 %889 }
 0x1c0   : > { %v3241_v11 = vpop.permute.xlu1 %837  ;;  %v836_v55 = vpop.permute.xlu0 %835 }
 0x1c5   : > { %1083 = vrot.lane.b32.xlu2 %v2281_v21, %s2188_s26 }
 0x1c6   : > { %987 = vrot.lane.b32.xlu1 %v3246_v10, %s2189_s27  ;;  %1177 = vrot.lane.b32.xlu0 %v2612_v47, %s2190_s28 }
 0x1c7   : > { %v3252_v0 = vpop.permute.xlu2 %895 }
 0x1c8   : > { %v3254_v13 = vpop.permute.xlu1 %843  ;;  %v3256_v61 = vpop.permute.xlu0 %841 }
 0x1cd   : > { %1001 = vrot.lane.b32.xlu2 %v2365_v52, %s2189_s27 }
 0x1ce   : > { %989 = vrot.lane.b32.xlu1 %v2300_v28, %s2189_s27  ;;  %1179 = vrot.lane.b32.xlu0 %v2609_v9, %s2190_s28 }
 0x1cf   : > { %v3264_v21 = vpop.permute.xlu2 %901 }
 0x1d0   : > { %4544 = vst [vmem:[#allocation137_spill] sm:$0xff] %v3264_v21  ;;  %v3266_v8 = vpop.permute.xlu1 %849  ;;  %v3268_v47 = vpop.permute.xlu0 %847  ;;  %v1289_v21 = vsel %vm1273_vm2, %v2356_v49, %v2799_v15 }
 0x1d5   : > { %1181 = vrot.lane.b32.xlu2 %v4515_v42, %s2190_s28 }
 0x1d6   : > { %1097 = vrot.lane.b32.xlu1 %v4472_v16, %s2188_s26  ;;  %1085 = vrot.lane.b32.xlu0 %v2319_v36, %s2188_s26 }
 0x1d7   : > { %v3276_v52 = vpop.permute.xlu2 %907 }
 0x1d8   : > { %v3278_v28 = vpop.permute.xlu1 %855  ;;  %v3280_v9 = vpop.permute.xlu0 %853 }
 0x1dd   : > { %1003 = vrot.lane.b32.xlu2 %v2359_v50, %s2189_s27  ;;  %v1322_v50 = vsel %vm1306_vm3, %v1289_v21, %v2892_v25 }
 0x1de   : > { %991 = vrot.lane.b32.xlu1 %v2294_v26, %s2189_s27  ;;  %1193 = vrot.lane.b32.xlu0 %v4524_v34, %s2190_s28  ;;  %v1355_v26 = vsel %vm1339_vm4, %v1322_v50, %v3068_v5  ;;  %v1292_v5 = vsel %vm1273_vm2, %v2431_v30, %v2821_v57 }
 0x1df   : > { %v3288_v42 = vpop.permute.xlu2 %913  ;;  %v1388_v34 = vsel %vm1372_vm5, %v1355_v26, %v824_v3  ;;  %v2144_v26 = vld [vmem:[%s2230_s20 + $0xa8] sm:$0xff] }
 0x1e0   : > { %v3290_v16 = vpop.permute.xlu1 %893  ;;  %v3292_v36 = vpop.permute.xlu0 %891 }
 0x1e5   : > { %1017 = vrot.lane.b32.xlu2 %v2419_v19, %s2189_s27 }
 0x1e6   : > { %1099 = vrot.lane.b32.xlu1 %v4471_v33, %s2188_s26  ;;  %1087 = vrot.lane.b32.xlu0 %v2316_v35, %s2188_s26  ;;  %v1325_v33 = vsel %vm1306_vm3, %v1292_v5, %v2904_v45  ;;  %v1295_v45 = vsel %vm1273_vm2, %v2422_v20, %v2836_v18  ;;  %v2145_v5 = vld [vmem:[%s2230_s20 + $0x98] sm:$0xff] }
 0x1e7   : > { %v920_v49 = vpop.permute.xlu2 %919  ;;  %v1358_v35 = vsel %vm1339_vm4, %v1325_v33, %v3086_v17 }
 0x1e8   : > { %v3308_v15 = vpop.permute.xlu1 %899  ;;  %v3311_v25 = vsel %vm1405_vm6, %v1388_v34, %v920_v49  ;;  %v3313_v19 = vpop.permute.xlu0 %897  ;;  %v1391_v3 = vsel %vm1372_vm5, %v1358_v35, %v830_v40  ;;  %v3346_v40 = vld [vmem:[%s2230_s20 + $0x60] sm:$0xff]  ;;  %v4545_v34 = vld [vmem:[#allocation44_spill] sm:$0xff] }
 0x1e9   : > { %v1288_v49 = vsel %vm1273_vm2, %v2144_v26, %v4545_v34  ;;  %v4551_v26 = vld [vmem:[#allocation92_spill] sm:$0xff] }
 0x1ea   : > { %v1321_v35 = vsel %vm1306_vm3, %v1288_v49, %v2930_v56  ;;  %v4552_v49 = vld [vmem:[#allocation17_spill] sm:$0xff] }
 0x1ed   : > { %1113 = vrot.lane.b32.xlu2 %v4490_v22, %s2188_s26 }
 0x1ee   : > { %1195 = vrot.lane.b32.xlu1 %v2680_v4, %s2190_s28  ;;  %1183 = vrot.lane.b32.xlu0 %v4514_v60, %s2190_s28  ;;  %v1328_v4 = vsel %vm1306_vm3, %v1295_v45, %v2916_v24  ;;  %v4547_v45 = vld [vmem:[#allocation79_spill] sm:$0xff] }
 0x1ef   : > { %v926_v21 = vpop.permute.xlu2 %925  ;;  %v1361_v60 = vsel %vm1339_vm4, %v1328_v4, %v3104_v58  ;;  %v1298_v58 = vsel %vm1273_vm2, %v2497_v6, %v2848_v53 }
 0x1f0   : > { %v3329_v50 = vpop.permute.xlu1 %905  ;;  %v3332_v30 = vsel %vm1405_vm6, %v1391_v3, %v926_v21  ;;  %v3334_v57 = vpop.permute.xlu0 %903  ;;  %v1394_v17 = vsel %vm1372_vm5, %v1361_v60, %v836_v55  ;;  %v1331_v33 = vsel %vm1306_vm3, %v1298_v58, %v2928_v54  ;;  %v1354_v54 = vsel %vm1339_vm4, %v1321_v35, %v3070_v2  ;;  %v3406_v60 = vld [vmem:[%s2230_s20 + $0xc8] sm:$0xff] }
 0x1f1   : > { %v1364_v53 = vsel %vm1339_vm4, %v1331_v33, %v3116_v39  ;;  %v1387_v39 = vsel %vm1372_vm5, %v1354_v54, %v3162_v44  ;;  %v4549_v44 = vld [vmem:[#allocation50_spill] sm:$0xff] }
 0x1f5   : > { %1005 = vrot.lane.b32.xlu2 %v2353_v48, %s2189_s27 }
 0x1f6   : > { %993 = vrot.lane.b32.xlu1 %v3346_v40, %s2189_s27  ;;  %1209 = vrot.lane.b32.xlu0 %v2728_v7, %s2190_s28  ;;  %v4546_v7 = vld [vmem:[#allocation62_spill] sm:$0xff] }
 0x1f7   : > { %v932_v18 = vpop.permute.xlu2 %931  ;;  %v1287_v55 = vsel %vm1273_vm2, %v2145_v5, %v4546_v7  ;;  %v4553_v5 = vld [vmem:[#allocation93_spill] sm:$0xff] }
 0x1f8   : > { %v3353_v22 = vpop.permute.xlu1 %911  ;;  %v3356_v24 = vsel %vm1405_vm6, %v1394_v17, %v932_v18  ;;  %v3358_v48 = vpop.permute.xlu0 %909  ;;  %v1320_v6 = vsel %vm1306_vm3, %v1287_v55, %v2932_v63  ;;  %v1397_v63 = vsel %vm1372_vm5, %v1364_v53, %v3256_v61  ;;  %v4548_v61 = vld [vmem:[#allocation18_spill] sm:$0xff]  ;;  %v4550_v18 = vld [vmem:[#allocation68_spill] sm:$0xff]  ;;  %v4556_v53 = vld [vmem:[#allocation33_spill] sm:$0xff] }
 0x1f9   : > { %v1301_v4 = vsel %vm1273_vm2, %v4548_v61, %v4547_v45  ;;  %v3412_v17 = vld [vmem:[%s2230_s20 + $0xc0] sm:$0xff] }
 0x1fa   : > { %v1290_v58 = vsel %vm1273_vm2, %v3412_v17, %v4550_v18  ;;  %v1334_v34 = vsel %vm1306_vm3, %v1301_v4, %v4551_v26  ;;  %v4554_v55 = vld [vmem:[#allocation94_spill] sm:$0xff] }
 0x1fb   : > { %v1323_v33 = vsel %vm1306_vm3, %v1290_v58, %v4554_v55  ;;  %v1367_v35 = vsel %vm1339_vm4, %v1334_v34, %v3128_v23  ;;  %v4561_v58 = vld [vmem:[#allocation55_spill] sm:$0xff]  ;;  %v3457_v26 = vld [vmem:[%s2230_s20 + $0xe0] sm:$0xff]  ;;  %v2150_v55 = vld [vmem:[%s2230_s20 + $0xb0] sm:$0xff] }
 0x1fc   : > { %v4562_v34 = vld [vmem:[#allocation71_spill] sm:$0xff] }
 0x1fd   : > { %1019 = vrot.lane.b32.xlu2 %v2422_v20, %s2189_s27  ;;  %v1353_v20 = vsel %vm1339_vm4, %v1320_v6, %v3018_v29  ;;  %v4555_v6 = vld [vmem:[#allocation43_spill] sm:$0xff] }
 0x1fe   : > { %1101 = vrot.lane.b32.xlu1 %v4479_v37, %s2188_s26  ;;  %1089 = vrot.lane.b32.xlu0 %v4467_v31, %s2188_s26  ;;  %v1386_v37 = vsel %vm1372_vm5, %v1353_v20, %v3200_v12  ;;  %v1291_v12 = vsel %vm1273_vm2, %v3406_v60, %v4549_v44  ;;  %v4557_v20 = vld [vmem:[#allocation108_spill] sm:$0xff] }
 0x1ff   : > { %v938_v56 = vpop.permute.xlu2 %937  ;;  %v1324_v7 = vsel %vm1306_vm3, %v1291_v12, %v4553_v5  ;;  %v1356_v54 = vsel %vm1339_vm4, %v1323_v33, %v4557_v20  ;;  %v4560_v12 = vld [vmem:[#allocation25_spill] sm:$0xff]  ;;  %v4563_v5 = vld [vmem:[#allocation95_spill] sm:$0xff]  ;;  %v4564_v33 = vld [vmem:[#allocation96_spill] sm:$0xff] }
 0x200   : > { %v918_v3 = vpop.permute.xlu1 %917  ;;  %v3394_v21 = vsel %vm1405_vm6, %v1397_v63, %v938_v56  ;;  %v916_v31 = vpop.permute.xlu0 %915  ;;  %v4558_v63 = vld [vmem:[#allocation118_spill] sm:$0xff]  ;;  %v4566_v20 = vld [vmem:[#allocation125_spill] sm:$0xff] }
 0x201   : > { %v3397_v29 = vsel %vm1405_vm6, %v1387_v39, %v918_v3  ;;  %v3400_v2 = vsel %vm1405_vm6, %v1386_v37, %v916_v31  ;;  %v1357_v56 = vsel %vm1339_vm4, %v1324_v7, %v4558_v63  ;;  %v1400_v39 = vsel %vm1372_vm5, %v1367_v35, %v3268_v47  ;;  %v4559_v47 = vld [vmem:[#allocation82_spill] sm:$0xff]  ;;  %v3473_v63 = vld [vmem:[%s2230_s20 + $0x68] sm:$0xff] }
 0x202   : > { %v1390_v23 = vsel %vm1372_vm5, %v1357_v56, %v3174_v32  ;;  %v1389_v3 = vsel %vm1372_vm5, %v1356_v54, %v3214_v62  ;;  %v1304_v18 = vsel %vm1273_vm2, %v4560_v12, %v4559_v47  ;;  %v2148_v32 = vld [vmem:[%s2230_s20 + $0xf0] sm:$0xff] }
 0x203   : > { %v1294_v62 = vsel %vm1273_vm2, %v2148_v32, %v4561_v58  ;;  %v1337_v7 = vsel %vm1306_vm3, %v1304_v18, %v4563_v5  ;;  %v4567_v56 = vld [vmem:[#allocation12_spill] sm:$0xff]  ;;  %v1541_v32 = vld [vmem:[%s4273_s1 + $0x20] sm:$0xf]  ;;  %v2153_v5 = vld [vmem:[%s2230_s20 + $0x108] sm:$0xff] }
 0x204   : > { %v1327_v35 = vsel %vm1306_vm3, %v1294_v62, %v4564_v33  ;;  %v1370_v54 = vsel %vm1339_vm4, %v1337_v7, %v4566_v20  ;;  %2074 = vmatpush.msk.msra.mxu0 %vm1639_vm7, %v1541_v32  ;;  %2110 = vmatpush.msk.msra.mxu1 %vm1639_vm7, %v1541_v32  ;;  %v1539_v58 = vld [vmem:[%s4273_s1 + $0x10] sm:$0xff]  ;;  %v4570_v7 = vld [vmem:[#allocation74_spill] sm:$0xff]  ;;  %v4571_v33 = vld [vmem:[#allocation99_spill] sm:$0xff] }
 0x205   : > { %1115 = vrot.lane.b32.xlu2 %v4552_v49, %s2188_s26  ;;  %v1293_v49 = vsel %vm1273_vm2, %v3457_v26, %v4562_v34  ;;  %2111 = vmatpush.msk.msra.mxu2 %vm1639_vm7, %v1541_v32  ;;  %v3508_v62 = vld [vmem:[%s2230_s20 + $0x110] sm:$0xff]  ;;  %v4569_v34 = vld [vmem:[#allocation61_spill] sm:$0xff]  ;;  %v4573_v20 = vld [vmem:[#allocation11_spill] sm:$0xff] }
 0x206   : > { %1197 = vrot.lane.b32.xlu1 %v4555_v6, %s2190_s28  ;;  %1185 = vrot.lane.b32.xlu0 %v4556_v53, %s2190_s28  ;;  %v4565_v6 = vld [vmem:[#allocation97_spill] sm:$0xff] }
 0x207   : > { %v944_v37 = vpop.permute.xlu2 %943  ;;  %v1326_v53 = vsel %vm1306_vm3, %v1293_v49, %v4565_v6  ;;  %2112 = vmatpush.msk.msra.mxu3 %vm1639_vm7, %v1541_v32  ;;  %v1297_v49 = vsel %vm1273_vm2, %v3508_v62, %v4569_v34  ;;  %v4572_v6 = vld [vmem:[#allocation100_spill] sm:$0xff]  ;;  %v1537_v32 = vld [vmem:[%s4273_s1] sm:$0xff] }
 0x208   : > { %v924_v31 = vpop.permute.xlu1 %923  ;;  %v3442_v45 = vsel %vm1405_vm6, %v1400_v39, %v944_v37  ;;  %v922_v61 = vpop.permute.xlu0 %921  ;;  %v1359_v39 = vsel %vm1339_vm4, %v1326_v53, %v4567_v56  ;;  %v4568_v37 = vld [vmem:[#allocation122_spill] sm:$0xff]  ;;  %v1538_v56 = vld [vmem:[%s4273_s1 + $0x8] sm:$0xff] }
 0x209   : > { %v3445_v4 = vsel %vm1405_vm6, %v1390_v23, %v924_v31  ;;  %v3448_v44 = vsel %vm1405_vm6, %v1389_v3, %v922_v61  ;;  %v1360_v23 = vsel %vm1339_vm4, %v1327_v35, %v4568_v37  ;;  %v1403_v3 = vsel %vm1372_vm5, %v1370_v54, %v3280_v9  ;;  %v4574_v54 = vld [vmem:[#allocation5_spill] sm:$0xff] }
 0x20a   : > { %v1393_v61 = vsel %vm1372_vm5, %v1360_v23, %v3186_v46  ;;  %v1392_v47 = vsel %vm1372_vm5, %v1359_v39, %v3228_v14  ;;  %v1540_v14 = vld [vmem:[%s4273_s1 + $0x18] sm:$0xff]  ;;  %v1330_v35 = vsel %vm1306_vm3, %v1297_v49, %v4571_v33  ;;  %v4576_v23 = vld [vmem:[#allocation123_spill] sm:$0xff]  ;;  %v4580_v33 = vld [vmem:[#allocation102_spill] sm:$0xff] }
 0x20b   : > { %1655 = vmatpush.msra.mxu0 %v1540_v14  ;;  %2113 = vmatpush.msra.mxu1 %v1540_v14  ;;  %v4575_v39 = vld [vmem:[#allocation113_spill] sm:$0xff]  ;;  %v3554_v49 = vld [vmem:[%s2230_s20 + $0x128] sm:$0xff] }
 0x20c   : > { %2114 = vmatpush.msra.mxu2 %v1540_v14  ;;  %2115 = vmatpush.msra.mxu3 %v1540_v14 }
 0x20d   : > { %1007 = vrot.lane.b32.xlu2 %v2150_v55, %s2189_s27  ;;  %v1296_v55 = vsel %vm1273_vm2, %v2153_v5, %v4570_v7  ;;  %1656 = vmatpush.msra.mxu0 %v1539_v58 }
 0x20e   : > { %995 = vrot.lane.b32.xlu1 %v3473_v63, %s2189_s27  ;;  %1211 = vrot.lane.b32.xlu0 %v4536_v59, %s2190_s28  ;;  %v1329_v53 = vsel %vm1306_vm3, %v1296_v55, %v4572_v6  ;;  %v4579_v55 = vld [vmem:[#allocation42_spill] sm:$0xff]  ;;  %v4581_v6 = vld [vmem:[#allocation103_spill] sm:$0xff] }
 0x20f   : > { %v950_v31 = vpop.permute.xlu2 %949  ;;  %v1362_v37 = vsel %vm1339_vm4, %v1329_v53, %v4575_v39  ;;  %1657 = vmatpush.msra.mxu0 %v1538_v56  ;;  %2116 = vmatpush.msra.mxu1 %v1539_v58 }
 0x210   : > { %v930_v12 = vpop.permute.xlu1 %929  ;;  %v3490_v18 = vsel %vm1405_vm6, %v1403_v3, %v950_v31  ;;  %v928_v59 = vpop.permute.xlu0 %927  ;;  %v1363_v3 = vsel %vm1339_vm4, %v1330_v35, %v4576_v23  ;;  %2117 = vmatpush.msra.mxu2 %v1539_v58  ;;  %2118 = vmatpush.msra.mxu3 %v1539_v58 }
 0x211   : > { %v3496_v9 = vsel %vm1405_vm6, %v1393_v61, %v930_v12  ;;  %v3499_v46 = vsel %vm1405_vm6, %v1392_v47, %v928_v59  ;;  %v1396_v61 = vsel %vm1372_vm5, %v1363_v3, %v3198_v41  ;;  %v1395_v47 = vsel %vm1372_vm5, %v1362_v37, %v3241_v11  ;;  %1658 = vmatpush.msra.mxu0 %v1537_v32  ;;  %v3548_v41 = vld [vmem:[%s2230_s20 + $0x138] sm:$0xff]  ;;  %v4577_v11 = vld [vmem:[#allocation67_spill] sm:$0xff]  ;;  %v4584_v37 = vld [vmem:[#allocation30_spill] sm:$0xff] }
 0x212   : > { %2119 = vmatpush.msra.mxu1 %v1538_v56  ;;  %2120 = vmatpush.msra.mxu2 %v1538_v56  ;;  %v1300_v58 = vsel %vm1273_vm2, %v3548_v41, %v4577_v11 }
 0x213   : > { %2121 = vmatpush.msra.mxu3 %v1538_v56  ;;  %v1333_v35 = vsel %vm1306_vm3, %v1300_v58, %v4580_v33  ;;  %v4583_v56 = vld [vmem:[#allocation116_spill] sm:$0xff]  ;;  %v2157_v58 = vld [vmem:[%s2230_s20 + $0x158] sm:$0xff] }
 0x214   : > { %2122 = vmatpush.msra.mxu1 %v1537_v32  ;;  %2123 = vmatpush.msra.mxu2 %v1537_v32  ;;  %v1366_v23 = vsel %vm1339_vm4, %v1333_v35, %v4584_v37 }
 0x215   : > { %1021 = vrot.lane.b32.xlu2 %v2153_v5, %s2189_s27  ;;  %2124 = vmatpush.msra.mxu3 %v1537_v32  ;;  %v4578_v5 = vld [vmem:[#allocation76_spill] sm:$0xff] }
 0x216   : > { %1103 = vrot.lane.b32.xlu1 %v4573_v20, %s2188_s26  ;;  %1091 = vrot.lane.b32.xlu0 %v4574_v54, %s2188_s26  ;;  %v1299_v7 = vsel %vm1273_vm2, %v3554_v49, %v4578_v5  ;;  %v4582_v20 = vld [vmem:[#allocation32_spill] sm:$0xff]  ;;  %v4585_v5 = vld [vmem:[#allocation70_spill] sm:$0xff] }
 0x217   : > { %v3532_v31 = vpop.permute.xlu2 %1081  ;;  %v1332_v53 = vsel %vm1306_vm3, %v1299_v7, %v4581_v6  ;;  %v2156_v54 = vld [vmem:[%s2230_s20 + $0x150] sm:$0xff]  ;;  %v1303_v7 = vsel %vm1273_vm2, %v2157_v58, %v4585_v5  ;;  %v4589_v6 = vld [vmem:[#allocation105_spill] sm:$0xff] }
 0x218   : > { %v936_v12 = vpop.permute.xlu1 %935  ;;  %v934_v59 = vpop.permute.xlu0 %933  ;;  %v1365_v39 = vsel %vm1339_vm4, %v1332_v53, %v4583_v56  ;;  %v4591_v56 = vld [vmem:[#allocation16_spill] sm:$0xff] }
 0x219   : > { %v3542_v14 = vsel %vm1405_vm6, %v1396_v61, %v936_v12  ;;  %v3545_v34 = vsel %vm1405_vm6, %v1395_v47, %v934_v59  ;;  %v1399_v61 = vsel %vm1372_vm5, %v1366_v23, %v3212_v27  ;;  %v1398_v47 = vsel %vm1372_vm5, %v1365_v39, %v3254_v13  ;;  %v4587_v27 = vld [vmem:[#allocation60_spill] sm:$0xff]  ;;  %v4592_v39 = vld [vmem:[#allocation117_spill] sm:$0xff] }
 0x21a   : > { %v4588_v13 = vld [vmem:[#allocation104_spill] sm:$0xff] }
 0x21b   : > { %v1336_v35 = vsel %vm1306_vm3, %v1303_v7, %v4588_v13 }
 0x21d   : > { %1199 = vrot.lane.b32.xlu2 %v4579_v55, %s2190_s28  ;;  %v4586_v55 = vld [vmem:[#allocation78_spill] sm:$0xff] }
 0x21e   : > { %1187 = vrot.lane.b32.xlu1 %v4582_v20, %s2190_s28  ;;  %1033 = vrot.lane.b32.xlu0 %v2156_v54, %s2189_s27  ;;  %v1302_v33 = vsel %vm1273_vm2, %v2156_v54, %v4586_v55  ;;  %v4590_v20 = vld [vmem:[#allocation23_spill] sm:$0xff]  ;;  %v4593_v54 = vld [vmem:[#allocation126_spill] sm:$0xff] }
 0x21f   : > { %v3573_v3 = vpop.permute.xlu2 %1083  ;;  %v1335_v53 = vsel %vm1306_vm3, %v1302_v33, %v4589_v6  ;;  %v1369_v23 = vsel %vm1339_vm4, %v1336_v35, %v4593_v54  ;;  %v3617_v33 = vld [vmem:[%s2230_s20 + $0x170] sm:$0xff]  ;;  %v3627_v35 = vld [vmem:[%s2230_s20 + $0x78] sm:$0xff] }
 0x220   : > { %v942_v12 = vpop.permute.xlu1 %941  ;;  %v940_v59 = vpop.permute.xlu0 %939  ;;  %v1368_v37 = vsel %vm1339_vm4, %v1335_v53, %v4592_v39  ;;  %v4596_v6 = vld [vmem:[#allocation121_spill] sm:$0xff] }
 0x221   : > { %v3580_v32 = vsel %vm1405_vm6, %v1399_v61, %v942_v12  ;;  %v3583_v11 = vsel %vm1405_vm6, %v1398_v47, %v940_v59  ;;  %v1402_v47 = vsel %vm1372_vm5, %v1369_v23, %v3225_v1  ;;  %v1401_v12 = vsel %vm1372_vm5, %v1368_v37, %v3266_v8  ;;  %v4595_v1 = vld [vmem:[#allocation106_spill] sm:$0xff]  ;;  %v4597_v39 = vld [vmem:[#allocation41_spill] sm:$0xff] }
 0x225   : > { %1213 = vrot.lane.b32.xlu2 %v4587_v27, %s2190_s28  ;;  %v4594_v27 = vld [vmem:[#allocation81_spill] sm:$0xff] }
 0x226   : > { %1129 = vrot.lane.b32.xlu1 %v4590_v20, %s2188_s26  ;;  %1117 = vrot.lane.b32.xlu0 %v4591_v56, %s2188_s26  ;;  %v1305_v13 = vsel %vm1273_vm2, %v3617_v33, %v4594_v27  ;;  %v2160_v56 = vld [vmem:[%s2230_s20] sm:$0xff]  ;;  %v4600_v27 = vld [vmem:[#allocation128_spill] sm:$0xff] }
 0x227   : > { %v3604_v61 = vpop.permute.xlu2 %1001  ;;  %v1338_v8 = vsel %vm1306_vm3, %v1305_v13, %v4595_v1  ;;  %v1274_v37 = vsel %vm1273_vm2, %v2160_v56, %v4597_v39  ;;  %v2161_v56 = vld [vmem:[%s2230_s20 + $0x8] sm:$0xff]  ;;  %v4603_v39 = vld [vmem:[#allocation46_spill] sm:$0xff] }
 0x228   : > { %v948_v59 = vpop.permute.xlu1 %947  ;;  %v946_v5 = vpop.permute.xlu0 %945  ;;  %v1371_v53 = vsel %vm1339_vm4, %v1338_v8, %v4596_v6  ;;  %v4601_v8 = vld [vmem:[#allocation10_spill] sm:$0xff]  ;;  %v4602_v6 = vld [vmem:[#allocation4_spill] sm:$0xff] }
 0x229   : > { %v3611_v7 = vsel %vm1405_vm6, %v1402_v47, %v948_v59  ;;  %v3614_v55 = vsel %vm1405_vm6, %v1401_v12, %v946_v5  ;;  %v4598_v47 = vld [vmem:[#allocation73_spill] sm:$0xff] }
 0x22a   : > { %v1307_v12 = vsel %vm1306_vm3, %v1274_v37, %v4598_v47 }
 0x22d   : > { %1009 = vrot.lane.b32.xlu2 %v3412_v17, %s2189_s27  ;;  %v1404_v17 = vsel %vm1372_vm5, %v1371_v53, %v3278_v28 }
 0x22e   : > { %997 = vrot.lane.b32.xlu1 %v3627_v35, %s2189_s27  ;;  %1225 = vrot.lane.b32.xlu0 %v2808_v51, %s2190_s28  ;;  %v4599_v51 = vld [vmem:[#allocation8_spill] sm:$0xff] }
 0x22f   : > { %v1182_v20 = vpop.permute.xlu2 %1181  ;;  %v1340_v5 = vsel %vm1339_vm4, %v1307_v12, %v4599_v51  ;;  %v4605_v12 = vld [vmem:[#allocation98_spill] sm:$0xff] }
 0x230   : > { %v986_v54 = vpop.permute.xlu1 %985  ;;  %v952_v23 = vpop.permute.xlu0 %951  ;;  %v1373_v13 = vsel %vm1372_vm5, %v1340_v5, %v4600_v27  ;;  %v4606_v5 = vld [vmem:[#allocation127_spill] sm:$0xff] }
 0x231   : > { %v3643_v59 = vsel %vm1405_vm6, %v1404_v17, %v952_v23  ;;  %v1406_v1 = vsel %vm1405_vm6, %v1373_v13, %v3239_v43  ;;  %v1275_v43 = vsel %vm1273_vm2, %v2161_v56, %v4603_v39 }
 0x232   : > { %v1439_v28 = vsel %vm1438_vm8, %v1406_v1, %v986_v54  ;;  %v4604_v54 = vld [vmem:[#allocation85_spill] sm:$0xff] }
 0x233   : > { %v1308_v23 = vsel %vm1306_vm3, %v1275_v43, %v4604_v54 }
 0x234   : > { %v1341_v51 = vsel %vm1339_vm4, %v1308_v23, %v4605_v12  ;;  %v4611_v23 = vld [vmem:[#allocation107_spill] sm:$0xff]  ;;  %v4613_v12 = vld [vmem:[#allocation28_spill] sm:$0xff] }
 0x235   : > { %1023 = vrot.lane.b32.xlu2 %v3508_v62, %s2189_s27  ;;  %v1472_v62 = vsel %vm1471_vm9, %v1439_v28, %v3532_v31  ;;  %v1374_v27 = vsel %vm1372_vm5, %v1341_v51, %v4606_v5  ;;  %v4607_v31 = vld [vmem:[#allocation49_spill] sm:$0xff]  ;;  %v4608_v28 = vld [vmem:[#allocation38_spill] sm:$0xff]  ;;  %v4615_v5 = vld [vmem:[#allocation15_spill] sm:$0xff] }
 0x236   : > { %1105 = vrot.lane.b32.xlu1 %v4601_v8, %s2188_s26  ;;  %1093 = vrot.lane.b32.xlu0 %v4602_v6, %s2188_s26  ;;  %v1407_v13 = vsel %vm1405_vm6, %v1374_v27, %v3292_v36  ;;  %v2162_v36 = vld [vmem:[%s2230_s20 + $0x18] sm:$0xff]  ;;  %v4614_v51 = vld [vmem:[#allocation22_spill] sm:$0xff] }
 0x237   : > { %v3658_v53 = vpop.permute.xlu2 %1003 }
 0x238   : > { %v988_v37 = vpop.permute.xlu1 %987  ;;  %v1178_v17 = vpop.permute.xlu0 %1177 }
 0x239   : > { %v1505_v47 = vsel %vm1504_vm10, %v1472_v62, %v1178_v17  ;;  %v1440_v1 = vsel %vm1438_vm8, %v1407_v13, %v988_v37  ;;  %v4609_v37 = vld [vmem:[#allocation40_spill] sm:$0xff] }
 0x23a   : > { %2075 = vmatmul.msk.f32.vlgmr.msra.gmra.mxu0 %vm1542_vm11, %v1505_v47  ;;  %v1473_v39 = vsel %vm1471_vm9, %v1440_v1, %v3573_v3  ;;  %v1276_v17 = vsel %vm1273_vm2, %v2162_v36, %v4609_v37  ;;  %v4610_v62 = vld [vmem:[#allocation84_spill] sm:$0xff]  ;;  %v4612_v47 = vld [vmem:[#allocation59_spill] sm:$0xff] }
 0x23b   : > { %v1309_v54 = vsel %vm1306_vm3, %v1276_v17, %v4610_v62  ;;  %v4617_v37 = vld [vmem:[#allocation88_spill] sm:$0xff] }
 0x23d   : > { %1201 = vrot.lane.b32.xlu2 %v4607_v31, %s2190_s28 }
 0x23e   : > { %1189 = vrot.lane.b32.xlu1 %v4608_v28, %s2190_s28  ;;  %1035 = vrot.lane.b32.xlu0 %v2157_v58, %s2189_s27  ;;  %v1342_v58 = vsel %vm1339_vm4, %v1309_v54, %v4611_v23  ;;  %v3722_v23 = vld [vmem:[%s2230_s20 + $0x80] sm:$0xff] }
 0x23f   : > { %v3681_v8 = vpop.permute.xlu2 %1017  ;;  %v1375_v3 = vsel %vm1372_vm5, %v1342_v58, %v4613_v12 }
 0x240   : > { %v990_v6 = vpop.permute.xlu1 %989  ;;  %v1180_v56 = vpop.permute.xlu0 %1179  ;;  %v1408_v27 = vsel %vm1405_vm6, %v1375_v3, %v3290_v16  ;;  %v4618_v16 = vld [vmem:[#allocation112_spill] sm:$0xff] }
 0x241   : > { %v1506_v43 = vsel %vm1504_vm10, %v1473_v39, %v1180_v56  ;;  %v1441_v1 = vsel %vm1438_vm8, %v1408_v27, %v990_v6  ;;  %v4616_v39 = vld [vmem:[#allocation35_spill] sm:$0xff]  ;;  %v4619_v6 = vld [vmem:[#allocation124_spill] sm:$0xff] }
 0x242   : > { %2076 = vmatmul.msk.f32.gmra.mxu0 %vm1542_vm11, %v1506_v43  ;;  %v1282_v43 = vsel %vm1273_vm2, %v3346_v40, %v4616_v39  ;;  %v4622_v27 = vld [vmem:[#allocation3_spill] sm:$0xff] }
 0x243   : > { %v1315_v17 = vsel %vm1306_vm3, %v1282_v43, %v4617_v37  ;;  %v4624_v43 = vld [vmem:[#allocation57_spill] sm:$0xff]  ;;  %v4625_v37 = vld [vmem:[#allocation75_spill] sm:$0xff] }
 0x244   : > { %v1348_v62 = vsel %vm1339_vm4, %v1315_v17, %v4618_v16  ;;  %v4626_v16 = vld [vmem:[#allocation80_spill] sm:$0xff] }
 0x245   : > { %1215 = vrot.lane.b32.xlu2 %v4612_v47, %s2190_s28  ;;  %v1381_v54 = vsel %vm1372_vm5, %v1348_v62, %v4619_v6  ;;  %v4627_v6 = vld [vmem:[#allocation6_spill] sm:$0xff] }
 0x246   : > { %1131 = vrot.lane.b32.xlu1 %v4614_v51, %s2188_s26  ;;  %1119 = vrot.lane.b32.xlu0 %v4615_v5, %s2188_s26  ;;  %v1414_v40 = vsel %vm1405_vm6, %v1381_v54, %v3329_v50  ;;  %v2164_v51 = vld [vmem:[%s2230_s20 + $0x120] sm:$0xff]  ;;  %v4621_v5 = vld [vmem:[#allocation9_spill] sm:$0xff] }
 0x247   : > { %v1114_v13 = vpop.permute.xlu2 %1113  ;;  %v1447_v58 = vsel %vm1438_vm8, %v1414_v40, %v3604_v61  ;;  %v4628_v40 = vld [vmem:[#allocation111_spill] sm:$0xff] }
 0x248   : > { %v1098_v31 = vpop.permute.xlu1 %1097  ;;  %v1086_v28 = vpop.permute.xlu0 %1085 }
 0x249   : > { %v1474_v56 = vsel %vm1471_vm9, %v1441_v1, %v1086_v28  ;;  %v1480_v12 = vsel %vm1471_vm9, %v1447_v58, %v1098_v31  ;;  %v2165_v28 = vld [vmem:[%s2230_s20 + $0x20] sm:$0xff] }
 0x24a   : > { %v1507_v36 = vsel %vm1504_vm10, %v1474_v56, %v1182_v20  ;;  %v4620_v20 = vld [vmem:[#allocation69_spill] sm:$0xff]  ;;  %v4629_v58 = vld [vmem:[#allocation130_spill] sm:$0xff] }
 0x24b   : > { %2077 = vmatmul.msk.f32.gmra.mxu0 %vm1542_vm11, %v1507_v36  ;;  %v4623_v56 = vld [vmem:[#allocation45_spill] sm:$0xff]  ;;  %v1283_v36 = vsel %vm1273_vm2, %v3473_v63, %v4624_v43  ;;  %v4631_v63 = vld [vmem:[#allocation48_spill] sm:$0xff] }
 0x24c   : > { %v1277_v39 = vsel %vm1273_vm2, %v2165_v28, %v4623_v56  ;;  %v1316_v62 = vsel %vm1306_vm3, %v1283_v36, %v4626_v16  ;;  %v2166_v28 = vld [vmem:[%s2230_s20 + $0x168] sm:$0xff] }
 0x24d   : > { %1011 = vrot.lane.b32.xlu2 %v3406_v60, %s2189_s27  ;;  %v1310_v17 = vsel %vm1306_vm3, %v1277_v39, %v4625_v37 }
 0x24e   : > { %999 = vrot.lane.b32.xlu1 %v3722_v23, %s2189_s27  ;;  %1227 = vrot.lane.b32.xlu0 %v4620_v20, %s2190_s28  ;;  %v1343_v54 = vsel %vm1339_vm4, %v1310_v17, %v4627_v6  ;;  %v1349_v20 = vsel %vm1339_vm4, %v1316_v62, %v4628_v40 }
 0x24f   : > { %v3730_v47 = vpop.permute.xlu2 %1005 }
 0x250   : > { %v992_v60 = vpop.permute.xlu1 %991  ;;  %v1194_v3 = vpop.permute.xlu0 %1193 }
 0x251   : > { %v1513_v50 = vsel %vm1504_vm10, %v1480_v12, %v1194_v3  ;;  %v1376_v12 = vsel %vm1372_vm5, %v1343_v54, %v4629_v58  ;;  %v4630_v3 = vld [vmem:[#allocation133_spill] sm:$0xff]  ;;  %v4636_v58 = vld [vmem:[#allocation14_spill] sm:$0xff] }
 0x252   : > { %2083 = vmatmul.msk.f32.vlgmr.msra.gmra.mxu1 %vm1542_vm11, %v1513_v50  ;;  %v1382_v50 = vsel %vm1372_vm5, %v1349_v20, %v4630_v3 }
 0x255   : > { %1025 = vrot.lane.b32.xlu2 %v2164_v51, %s2189_s27  ;;  %v1409_v51 = vsel %vm1405_vm6, %v1376_v12, %v3252_v0  ;;  %v2167_v12 = vld [vmem:[%s2230_s20 + $0xd8] sm:$0xff] }
 0x256   : > { %1107 = vrot.lane.b32.xlu1 %v4621_v5, %s2188_s26  ;;  %1095 = vrot.lane.b32.xlu0 %v4622_v27, %s2188_s26  ;;  %v1415_v5 = vsel %vm1405_vm6, %v1382_v50, %v3276_v52  ;;  %v4632_v27 = vld [vmem:[#allocation37_spill] sm:$0xff]  ;;  %v1442_v39 = vsel %vm1438_vm8, %v1409_v51, %v992_v60  ;;  %v4634_v60 = vld [vmem:[#allocation27_spill] sm:$0xff]  ;;  %v4638_v51 = vld [vmem:[#allocation56_spill] sm:$0xff] }
 0x257   : > { %v3741_v61 = vpop.permute.xlu2 %1019  ;;  %v1448_v56 = vsel %vm1438_vm8, %v1415_v5, %v3658_v53  ;;  %v4633_v53 = vld [vmem:[#allocation58_spill] sm:$0xff]  ;;  %v4637_v50 = vld [vmem:[#allocation29_spill] sm:$0xff]  ;;  %v1284_v5 = vsel %vm1273_vm2, %v3627_v35, %v4638_v51  ;;  %v4645_v35 = vld [vmem:[#allocation47_spill] sm:$0xff] }
 0x258   : > { %v1100_v1 = vpop.permute.xlu1 %1099  ;;  %v1088_v31 = vpop.permute.xlu0 %1087 }
 0x259   : > { %v1481_v36 = vsel %vm1471_vm9, %v1448_v56, %v1100_v1  ;;  %v1475_v37 = vsel %vm1471_vm9, %v1442_v39, %v1088_v31  ;;  %v4635_v1 = vld [vmem:[#allocation21_spill] sm:$0xff]  ;;  %v1455_v31 = vsel %vm1438_vm8, %v3448_v44, %v3681_v8  ;;  %v4640_v56 = vld [vmem:[#allocation91_spill] sm:$0xff] }
 0x25a   : > { %v1488_v6 = vsel %vm1471_vm9, %v1455_v31, %v1114_v13  ;;  %v2168_v13 = vld [vmem:[%s2230_s20 + $0x30] sm:$0xff]  ;;  %v1317_v39 = vsel %vm1306_vm3, %v1284_v5, %v4640_v56  ;;  %v4649_v5 = vld [vmem:[#allocation39_spill] sm:$0xff] }
 0x25d   : > { %1203 = vrot.lane.b32.xlu2 %v4631_v63, %s2190_s28  ;;  %v1278_v63 = vsel %vm1273_vm2, %v2168_v13, %v4637_v50 }
 0x25e   : > { %1191 = vrot.lane.b32.xlu1 %v4632_v27, %s2190_s28  ;;  %1037 = vrot.lane.b32.xlu0 %v2166_v28, %s2189_s27  ;;  %v4639_v27 = vld [vmem:[#allocation87_spill] sm:$0xff] }
 0x25f   : > { %v1116_v43 = vpop.permute.xlu2 %1115  ;;  %v1311_v28 = vsel %vm1306_vm3, %v1278_v63, %v4639_v27  ;;  %v1285_v27 = vsel %vm1273_vm2, %v3722_v23, %v4649_v5  ;;  %v2170_v5 = vld [vmem:[%s2230_s20 + $0x188] sm:$0xff] }
 0x260   : > { %v1196_v0 = vpop.permute.xlu1 %1195  ;;  %v1184_v17 = vpop.permute.xlu0 %1183 }
 0x261   : > { %v1508_v52 = vsel %vm1504_vm10, %v1475_v37, %v1184_v17  ;;  %v1514_v16 = vsel %vm1504_vm10, %v1481_v36, %v1196_v0  ;;  %v4641_v36 = vld [vmem:[#allocation101_spill] sm:$0xff]  ;;  %v4642_v37 = vld [vmem:[#allocation7_spill] sm:$0xff] }
 0x262   : > { %2078 = vmatmul.msk.f32.gmra.mxu0 %vm1542_vm11, %v1508_v52  ;;  %2084 = vmatmul.msk.f32.gmra.mxu1 %vm1542_vm11, %v1514_v16  ;;  %v1350_v0 = vsel %vm1339_vm4, %v1317_v39, %v4642_v37  ;;  %v4643_v17 = vld [vmem:[#allocation129_spill] sm:$0xff]  ;;  %v4651_v39 = vld [vmem:[#allocation115_spill] sm:$0xff] }
 0x263   : > { %v4644_v16 = vld [vmem:[#allocation53_spill] sm:$0xff] }
 0x265   : > { %1217 = vrot.lane.b32.xlu2 %v4633_v53, %s2190_s28  ;;  %v1383_v53 = vsel %vm1372_vm5, %v1350_v0, %v4644_v16 }
 0x266   : > { %1133 = vrot.lane.b32.xlu1 %v4634_v60, %s2188_s26  ;;  %1121 = vrot.lane.b32.xlu0 %v4635_v1, %s2188_s26  ;;  %v1416_v1 = vsel %vm1405_vm6, %v1383_v53, %v3358_v48  ;;  %v4655_v53 = vld [vmem:[#allocation31_spill] sm:$0xff] }
 0x267   : > { %v1008_v62 = vpop.permute.xlu2 %1007  ;;  %v1449_v31 = vsel %vm1438_vm8, %v1416_v1, %v3730_v47  ;;  %v4648_v47 = vld [vmem:[#allocation20_spill] sm:$0xff] }
 0x268   : > { %v994_v54 = vpop.permute.xlu1 %993  ;;  %v1210_v40 = vpop.permute.xlu0 %1209 }
 0x269   : > { %v1521_v20 = vsel %vm1504_vm10, %v1488_v6, %v1210_v40 }
 0x26a   : > { %2091 = vmatmul.msk.f32.vlgmr.msra.gmra.mxu2 %vm1542_vm11, %v1521_v20 }
 0x26d   : > { %1109 = vrot.lane.b32.xlu2 %v4636_v58, %s2188_s26 }
 0x26e   : > { %1013 = vrot.lane.b32.xlu1 %v2167_v12, %s2189_s27  ;;  %1229 = vrot.lane.b32.xlu0 %v2802_v38, %s2190_s28  ;;  %v1344_v38 = vsel %vm1339_vm4, %v1311_v28, %v4641_v36  ;;  %v4650_v28 = vld [vmem:[#allocation90_spill] sm:$0xff] }
 0x26f   : > { %v3798_v3 = vpop.permute.xlu2 %1021  ;;  %v1377_v52 = vsel %vm1372_vm5, %v1344_v38, %v4643_v17  ;;  %v1318_v56 = vsel %vm1306_vm3, %v1285_v27, %v4650_v28  ;;  %v4654_v38 = vld [vmem:[#allocation72_spill] sm:$0xff]  ;;  %v2171_v27 = vld [vmem:[%s2230_s20 + $0x140] sm:$0xff]  ;;  %v4663_v28 = vld [vmem:[#allocation135_spill] sm:$0xff] }
 0x270   : > { %v1102_v44 = vpop.permute.xlu1 %1101  ;;  %v1090_v8 = vpop.permute.xlu0 %1089  ;;  %v1410_v60 = vsel %vm1405_vm6, %v1377_v52, %v3313_v19  ;;  %v1351_v36 = vsel %vm1339_vm4, %v1318_v56, %v4651_v39 }
 0x271   : > { %v1443_v6 = vsel %vm1438_vm8, %v1410_v60, %v994_v54  ;;  %v1482_v20 = vsel %vm1471_vm9, %v1449_v31, %v1102_v44  ;;  %v1456_v54 = vsel %vm1438_vm8, %v3445_v4, %v3741_v61  ;;  %v4652_v4 = vld [vmem:[#allocation13_spill] sm:$0xff]  ;;  %v4653_v61 = vld [vmem:[#allocation36_spill] sm:$0xff]  ;;  %v4656_v60 = vld [vmem:[#allocation86_spill] sm:$0xff] }
 0x272   : > { %v1476_v58 = vsel %vm1471_vm9, %v1443_v6, %v1090_v8  ;;  %v1489_v8 = vsel %vm1471_vm9, %v1456_v54, %v1116_v43  ;;  %v1384_v43 = vsel %vm1372_vm5, %v1351_v36, %v4653_v61  ;;  %v4657_v31 = vld [vmem:[#allocation110_spill] sm:$0xff]  ;;  %v1457_v54 = vsel %vm1438_vm8, %v3332_v30, %v3798_v3  ;;  %v4664_v61 = vld [vmem:[#allocation63_spill] sm:$0xff] }
 0x273   : > { %v1417_v23 = vsel %vm1405_vm6, %v1384_v43, %v3353_v22  ;;  %v4658_v6 = vld [vmem:[#allocation34_spill] sm:$0xff] }
 0x274   : > { %v1450_v0 = vsel %vm1438_vm8, %v1417_v23, %v1008_v62 }
 0x275   : > { %1205 = vrot.lane.b32.xlu2 %v4645_v35, %s2190_s28  ;;  %v1279_v35 = vsel %vm1273_vm2, %v3246_v10, %v4655_v53  ;;  %v2169_v10 = vld [vmem:[%s2230_s20 + $0x180] sm:$0xff] }
 0x276   : > { %1039 = vrot.lane.b32.xlu1 %v3617_v33, %s2189_s27  ;;  %1027 = vrot.lane.b32.xlu0 %v3554_v49, %s2189_s27  ;;  %v4646_v49 = vld [vmem:[#allocation66_spill] sm:$0xff]  ;;  %v1312_v1 = vsel %vm1306_vm3, %v1279_v35, %v4656_v60  ;;  %v4670_v60 = vld [vmem:[#allocation24_spill] sm:$0xff] }
 0x277   : > { %v1200_v40 = vpop.permute.xlu2 %1199  ;;  %v4647_v33 = vld [vmem:[#allocation26_spill] sm:$0xff]  ;;  %v1345_v22 = vsel %vm1339_vm4, %v1312_v1, %v4657_v31 }
 0x278   : > { %v1198_v19 = vpop.permute.xlu1 %1197  ;;  %v1186_v12 = vpop.permute.xlu0 %1185  ;;  %v1378_v62 = vsel %vm1372_vm5, %v1345_v22, %v4658_v6  ;;  %v4668_v53 = vld [vmem:[#allocation134_spill] sm:$0xff] }
 0x279   : > { %v1509_v48 = vsel %vm1504_vm10, %v1476_v58, %v1186_v12  ;;  %v1515_v13 = vsel %vm1504_vm10, %v1482_v20, %v1198_v19  ;;  %v4659_v20 = vld [vmem:[#allocation54_spill] sm:$0xff]  ;;  %v1411_v58 = vsel %vm1405_vm6, %v1378_v62, %v3308_v15  ;;  %v4660_v15 = vld [vmem:[#allocation65_spill] sm:$0xff] }
 0x27a   : > { %2079 = vmatmul.msk.f32.gmra.mxu0 %vm1542_vm11, %v1509_v48  ;;  %2085 = vmatmul.msk.f32.gmra.mxu1 %vm1542_vm11, %v1515_v13 }
 0x27d   : > { %1219 = vrot.lane.b32.xlu2 %v4646_v49, %s2190_s28 }
 0x27e   : > { %1135 = vrot.lane.b32.xlu1 %v4647_v33, %s2188_s26  ;;  %1123 = vrot.lane.b32.xlu0 %v4648_v47, %s2188_s26  ;;  %v4661_v33 = vld [vmem:[#allocation120_spill] sm:$0xff] }
 0x27f   : > { %v1214_v44 = vpop.permute.xlu2 %1213 }
 0x280   : > { %v996_v50 = vpop.permute.xlu1 %995  ;;  %v1212_v63 = vpop.permute.xlu0 %1211 }
 0x281   : > { %v1522_v51 = vsel %vm1504_vm10, %v1489_v8, %v1212_v63 }
 0x282   : > { %2092 = vmatmul.msk.f32.gmra.mxu2 %vm1542_vm11, %v1522_v51 }
 0x285   : > { %1111 = vrot.lane.b32.xlu2 %v4652_v4, %s2188_s26  ;;  %v2172_v4 = vld [vmem:[%s2230_s20 + $0x90] sm:$0xff] }
 0x286   : > { %1015 = vrot.lane.b32.xlu1 %v3457_v26, %s2189_s27  ;;  %1231 = vrot.lane.b32.xlu0 %v4654_v38, %s2190_s28  ;;  %v1286_v43 = vsel %vm1273_vm2, %v2172_v4, %v4664_v61  ;;  %v4665_v38 = vld [vmem:[#allocation83_spill] sm:$0xff] }
 0x287   : > { %v1010_v37 = vpop.permute.xlu2 %1009  ;;  %v1319_v23 = vsel %vm1306_vm3, %v1286_v43, %v4665_v38 }
 0x288   : > { %v1104_v17 = vpop.permute.xlu1 %1103  ;;  %v1092_v52 = vpop.permute.xlu0 %1091 }
 0x289   : > { %v1483_v16 = vsel %vm1471_vm9, %v1450_v0, %v1104_v17  ;;  %v4666_v0 = vld [vmem:[#allocation114_spill] sm:$0xff]  ;;  %v266_v17 = vld [vmem:[%s2230_s20 + $0x198] sm:$0xff] }
 0x28a   : > { %v1516_v26 = vsel %vm1504_vm10, %v1483_v16, %v1200_v40  ;;  %v1444_v40 = vsel %vm1438_vm8, %v1411_v58, %v996_v50  ;;  %v4667_v16 = vld [vmem:[#allocation64_spill] sm:$0xff]  ;;  %v495_v1 = vrot.slane %v266_v17, 1 }
 0x28b   : > { %2086 = vmatmul.msk.f32.gmra.mxu1 %vm1542_vm11, %v1516_v26  ;;  %v1477_v12 = vsel %vm1471_vm9, %v1444_v40, %v1092_v52  ;;  %v267_v52 = vld [vmem:[%s2230_s20 + $0x1a0] sm:$0xff]  ;;  %v4669_v26 = vld [vmem:[#allocation119_spill] sm:$0xff] }
 0x28c   : > { %v496_v31 = vrot.slane %v267_v52, 1  ;;  %v2173_v40 = vld [vmem:[%s2230_s20 + $0x48] sm:$0xff] }
 0x28d   : > { %1207 = vrot.lane.b32.xlu2 %v4659_v20, %s2190_s28 }
 0x28e   : > { %1041 = vrot.lane.b32.xlu1 %v2169_v10, %s2189_s27  ;;  %1029 = vrot.lane.b32.xlu0 %v3548_v41, %s2189_s27  ;;  %v4662_v41 = vld [vmem:[#allocation19_spill] sm:$0xff] }
 0x28f   : > { %v3888_v19 = vpop.permute.xlu2 %1023 }
 0x290   : > { %v1188_v48 = vpop.permute.xlu1 %1187  ;;  %v1034_v13 = vpop.permute.xlu0 %1033 }
 0x291   : > { %v1510_v49 = vsel %vm1504_vm10, %v1477_v12, %v1188_v48  ;;  %v1463_v30 = vsel %vm1438_vm8, %v3394_v21, %v1034_v13  ;;  %v1352_v21 = vsel %vm1339_vm4, %v1319_v23, %v4666_v0  ;;  %v4671_v12 = vld [vmem:[#allocation52_spill] sm:$0xff]  ;;  %v1458_v23 = vsel %vm1438_vm8, %v3499_v46, %v3888_v19 }
 0x292   : > { %2080 = vmatmul.msk.f32.gmra.mxu0 %vm1542_vm11, %v1510_v49  ;;  %v1385_v35 = vsel %vm1372_vm5, %v1352_v21, %v4668_v53  ;;  %v1280_v48 = vsel %vm1273_vm2, %v2173_v40, %v4671_v12  ;;  %v497_v49 = vsel %vm317_vm0, %v495_v1, %v496_v31 }
 0x293   : > { %v1418_v22 = vsel %vm1405_vm6, %v1385_v35, %v3288_v42  ;;  %v4673_v42 = vld [vmem:[#allocation109_spill] sm:$0xff] }
 0x294   : > { %v1451_v6 = vsel %vm1438_vm8, %v1418_v22, %v1010_v37 }
 0x295   : > { %1221 = vrot.lane.b32.xlu2 %v4660_v15, %s2190_s28  ;;  %v4672_v15 = vld [vmem:[#allocation77_spill] sm:$0xff] }
 0x296   : > { %1137 = vrot.lane.b32.xlu1 %v4661_v33, %s2188_s26  ;;  %1125 = vrot.lane.b32.xlu0 %v4662_v41, %s2188_s26  ;;  %v1313_v33 = vsel %vm1306_vm3, %v1280_v48, %v4672_v15  ;;  %v4674_v41 = vld [vmem:[#allocation132_spill] sm:$0xff] }
 0x297   : > { %v1202_v47 = vpop.permute.xlu2 %1201  ;;  %v1346_v37 = vsel %vm1339_vm4, %v1313_v33, %v4673_v42 }
 0x298   : > { %v1130_v8 = vpop.permute.xlu1 %1129  ;;  %v1118_v50 = vpop.permute.xlu0 %1117 }
 0x299   : > { %v1490_v63 = vsel %vm1471_vm9, %v1457_v54, %v1118_v50  ;;  %v1496_v56 = vsel %vm1471_vm9, %v1463_v30, %v1130_v8  ;;  %v1379_v54 = vsel %vm1372_vm5, %v1346_v37, %v4674_v41  ;;  %v268_v8 = vld [vmem:[%s2230_s20 + $0x1a8] sm:$0x3]  ;;  %v4675_v50 = vld [vmem:[#allocation137_spill] sm:$0xff]  ;;  %v2174_v37 = vld [vmem:[%s2230_s20 + $0x50] sm:$0xff] }
 0x29a   : > { %v1523_v51 = vsel %vm1504_vm10, %v1490_v63, %v1214_v44  ;;  %v4676_v63 = vld [vmem:[#allocation136_spill] sm:$0xff]  ;;  %v503_v38 = vrot.slane %v268_v8, 2  ;;  %v4677_v41 = vld [vmem:[#allocation51_spill] sm:$0xff] }
 0x29b   : > { %2093 = vmatmul.msk.f32.gmra.mxu2 %vm1542_vm11, %v1523_v51  ;;  %v498_v51 = vrot.slane %v268_v8, 1 }
 0x29d   : > { %1043 = vrot.lane.b32.xlu2 %v2170_v5, %s2189_s27  ;;  %v499_v4 = vsel %vm317_vm0, %v496_v31, %v498_v51 }
 0x29e   : > { %1031 = vrot.lane.b32.xlu1 %v2171_v27, %s2189_s27  ;;  %1233 = vrot.lane.b32.xlu0 %v4663_v28, %s2190_s28  ;;  %v500_v27 = vrot.slane %v266_v17, 2  ;;  %v501_v28 = vrot.slane %v267_v52, 2 }
 0x29f   : > { %v1216_v3 = vpop.permute.xlu2 %1215 }
 0x2a0   : > { %v998_v44 = vpop.permute.xlu1 %997  ;;  %v1226_v39 = vpop.permute.xlu0 %1225  ;;  %v502_v43 = vsel %vm398_vm1, %v500_v27, %v501_v28  ;;  %v4680_v27 = vld [vmem:[#allocation131_spill] sm:$0xff] }
 0x2a1   : > { %v1529_v36 = vsel %vm1504_vm10, %v1496_v56, %v1226_v39 }
 0x2a2   : > { %2099 = vmatmul.msk.f32.vlgmr.msra.gmra.mxu3 %vm1542_vm11, %v1529_v36 }
 0x2a5   : > { %1223 = vrot.lane.b32.xlu2 %v4667_v16, %s2190_s28 }
 0x2a6   : > { %1139 = vrot.lane.b32.xlu1 %v4669_v26, %s2188_s26  ;;  %1127 = vrot.lane.b32.xlu0 %v4670_v60, %s2188_s26 }
 0x2a7   : > { %v1012_v10 = vpop.permute.xlu2 %1011 }
 0x2a8   : > { %v1106_v62 = vpop.permute.xlu1 %1105  ;;  %v1094_v20 = vpop.permute.xlu0 %1093  ;;  %v1452_v12 = vsel %vm1438_vm8, %v3400_v2, %v1012_v10 }
 0x2a9   : > { %v1484_v58 = vsel %vm1471_vm9, %v1451_v6, %v1106_v62 }
 0x2aa   : > { %v1517_v13 = vsel %vm1504_vm10, %v1484_v58, %v1202_v47  ;;  %v1412_v47 = vsel %vm1405_vm6, %v1379_v54, %v4675_v50  ;;  %v1281_v54 = vsel %vm1273_vm2, %v2174_v37, %v4677_v41 }
 0x2ab   : > { %2087 = vmatmul.msk.f32.gmra.mxu1 %vm1542_vm11, %v1517_v13  ;;  %v1445_v5 = vsel %vm1438_vm8, %v1412_v47, %v998_v44  ;;  %v4678_v47 = vld [vmem:[#allocation89_spill] sm:$0xff] }
 0x2ac   : > { %v1478_v30 = vsel %vm1471_vm9, %v1445_v5, %v1094_v20  ;;  %v1314_v2 = vsel %vm1306_vm3, %v1281_v54, %v4678_v47 }
 0x2ad   : > { %1141 = vrot.lane.b32.xlu2 %v497_v49, %s2188_s26 }
 0x2ae   : > { %1045 = vrot.lane.b32.xlu1 %v266_v17, %s2189_s27  ;;  %1235 = vrot.lane.b32.xlu0 %v4676_v63, %s2190_s28  ;;  %v4679_v63 = vld [vmem:[#allocation2_spill] sm:$0xff] }
 0x2af   : > { %v3962_v61 = vpop.permute.xlu2 %1025  ;;  %v1347_v51 = vsel %vm1339_vm4, %v1314_v2, %v4679_v63 }
 0x2b0   : > { %v1190_v56 = vpop.permute.xlu1 %1189  ;;  %v1036_v39 = vpop.permute.xlu0 %1035 }
 0x2b1   : > { %v1511_v36 = vsel %vm1504_vm10, %v1478_v30, %v1190_v56  ;;  %v1464_v26 = vsel %vm1438_vm8, %v3583_v11, %v1036_v39 }
 0x2b2   : > { %2081 = vmatmul.msk.f32.gmra.mxu0 %vm1542_vm11, %v1511_v36 }
 0x2b5   : > { %1143 = vrot.lane.b32.xlu2 %v499_v4, %s2188_s26 }
 0x2b6   : > { %1047 = vrot.lane.b32.xlu1 %v267_v52, %s2189_s27  ;;  %1237 = vrot.lane.b32.xlu0 %v502_v43, %s2190_s28  ;;  %v504_v52 = vsel %vm398_vm1, %v501_v28, %v503_v38  ;;  %v1380_v28 = vsel %vm1372_vm5, %v1347_v51, %v4680_v27 }
 0x2b7   : > { %v1660_v44 = vpop.f32.mrf.mxu0  ;;  %v1204_v53 = vpop.permute.xlu2 %1203  ;;  %v1413_v30 = vsel %vm1405_vm6, %v1380_v28, %v3334_v57  ;;  %v1459_v57 = vsel %vm1438_vm8, %v3496_v9, %v3962_v61 }
 0x2b8   : > { %1756 = vst.msk [vmem:[%s3968_s18] sm:$0xff] %vm1306_vm3, %v1660_v44  ;;  %v1132_v0 = vpop.permute.xlu1 %1131  ;;  %v1120_v21 = vpop.permute.xlu0 %1119  ;;  %v1859_v35 = vmul.f32 %v1660_v44, %v1660_v44  ;;  %v1788_v19 = vsel %vm1306_vm3, %v1660_v44, 0.0 }
 0x2b9   : > { %v1491_v17 = vsel %vm1471_vm9, %v1458_v23, %v1120_v21  ;;  %v1497_v60 = vsel %vm1471_vm9, %v1464_v26, %v1132_v0 }
 0x2ba   : > { %v1524_v16 = vsel %vm1504_vm10, %v1491_v17, %v1216_v3  ;;  %v1891_v20 = vsel %vm1306_vm3, %v1859_v35, 0.0 }
 0x2bb   : > { %2094 = vmatmul.msk.f32.gmra.mxu2 %vm1542_vm11, %v1524_v16 }
 0x2be   : > { %1239 = vrot.lane.b32.xlu0 %v504_v52, %s2190_s28 }
 0x2bf   : > { %v1663_v46 = vpop.f32.mrf.mxu0  ;;  %v1218_v40 = vpop.permute.xlu2 %1217 }
 0x2c0   : > { %1757 = vst.msk [vmem:[%s3968_s18 + $0x8] sm:$0xff] %vm1306_vm3, %v1663_v46  ;;  %v1789_v3 = vsel %vm1306_vm3, %v1663_v46, 0.0  ;;  %v1860_v1 = vmul.f32 %v1663_v46, %v1663_v46  ;;  %v1000_v31 = vpop.permute.xlu1 %999  ;;  %v1228_v22 = vpop.permute.xlu0 %1227 }
 0x2c1   : > { %v1790_v6 = vadd.f32 %v1789_v3, %v1788_v19  ;;  %v1530_v62 = vsel %vm1504_vm10, %v1497_v60, %v1228_v22  ;;  %v1446_v56 = vsel %vm1438_vm8, %v1413_v30, %v1000_v31 }
 0x2c2   : > { %v1892_v11 = vsel %vm1306_vm3, %v1860_v1, 0.0  ;;  %2100 = vmatmul.msk.f32.gmra.mxu3 %vm1542_vm11, %v1530_v62 }
 0x2c3   : > { %v1893_v58 = vadd.f32 %v1892_v11, %v1891_v20 }
 0x2c7   : > { %v1110_v38 = vpop.permute.xlu2 %1109 }
 0x2c8   : > { %v1108_v48 = vpop.permute.xlu1 %1107  ;;  %v1666_v13 = vpop.f32.mrf.mxu0 }
 0x2c9   : > { %v1485_v49 = vsel %vm1471_vm9, %v1452_v12, %v1108_v48  ;;  %1758 = vst.msk [vmem:[%s3968_s18 + $0x10] sm:$0xff] %vm1306_vm3, %v1666_v13  ;;  %v1791_v15 = vsel %vm1306_vm3, %v1666_v13, 0.0  ;;  %v1861_v33 = vmul.f32 %v1666_v13, %v1666_v13  ;;  %v1096_v42 = vpop.permute.xlu0 %1095 }
 0x2ca   : > { %v1792_v8 = vadd.f32 %v1791_v15, %v1790_v6  ;;  %v1518_v50 = vsel %vm1504_vm10, %v1485_v49, %v1204_v53  ;;  %v1479_v36 = vsel %vm1471_vm9, %v1446_v56, %v1096_v42 }
 0x2cb   : > { %v1894_v10 = vsel %vm1306_vm3, %v1861_v33, 0.0  ;;  %2088 = vmatmul.msk.f32.gmra.mxu1 %vm1542_vm11, %v1518_v50 }
 0x2cc   : > { %v1895_v5 = vadd.f32 %v1894_v10, %v1893_v58 }
 0x2cf   : > { %v4015_v39 = vpop.f32.mrf.mxu1  ;;  %v1206_v16 = vpop.permute.xlu2 %1205 }
 0x2d0   : > { %1764 = vst.msk [vmem:[%s3968_s18 + $0x40] sm:$0xff] %vm1306_vm3, %v4015_v39  ;;  %v1192_v4 = vpop.permute.xlu1 %1191 }
 0x2d1   : > { %v1038_v43 = vpop.permute.xlu0 %1037  ;;  %v1512_v44 = vsel %vm1504_vm10, %v1479_v36, %v1192_v4 }
 0x2d2   : > { %2082 = vmatmul.msk.f32.gmra.mxu0 %vm1542_vm11, %v1512_v44  ;;  %v1465_v35 = vsel %vm1438_vm8, %v3580_v32, %v1038_v43 }
 0x2d7   : > { %v1220_v62 = vpop.permute.xlu2 %1219 }
 0x2d8   : > { %v1134_v23 = vpop.permute.xlu1 %1133 }
 0x2d9   : > { %v1122_v0 = vpop.permute.xlu0 %1121  ;;  %v1498_v61 = vsel %vm1471_vm9, %v1465_v35, %v1134_v23 }
 0x2da   : > { %v1492_v21 = vsel %vm1471_vm9, %v1459_v57, %v1122_v0 }
 0x2db   : > { %v1525_v17 = vsel %vm1504_vm10, %v1492_v21, %v1218_v40 }
 0x2dc   : > { %2095 = vmatmul.msk.f32.gmra.mxu2 %vm1542_vm11, %v1525_v17 }
 0x2df   : > { %v1669_v52 = vpop.f32.mrf.mxu0  ;;  %v4029_v53 = vpop.f32.mrf.mxu1 }
 0x2e0   : > { %1759 = vst.msk [vmem:[%s3968_s18 + $0x18] sm:$0xff] %vm1306_vm3, %v1669_v52  ;;  %v1793_v26 = vsel %vm1306_vm3, %v1669_v52, 0.0  ;;  %v1862_v46 = vmul.f32 %v1669_v52, %v1669_v52  ;;  %v1014_v9 = vpop.permute.xlu1 %1013 }
 0x2e1   : > { %v1794_v19 = vadd.f32 %v1793_v26, %v1792_v8  ;;  %1765 = vst.msk [vmem:[%s3968_s18 + $0x48] sm:$0xff] %vm1306_vm3, %v4029_v53  ;;  %v1453_v60 = vsel %vm1438_vm8, %v3397_v29, %v1014_v9  ;;  %v1230_v3 = vpop.permute.xlu0 %1229  ;;  %v1112_v29 = vpop.permute.xlu2 %1111 }
 0x2e2   : > { %v1896_v1 = vsel %vm1306_vm3, %v1862_v46, 0.0  ;;  %v1531_v32 = vsel %vm1504_vm10, %v1498_v61, %v1230_v3  ;;  %v1486_v31 = vsel %vm1471_vm9, %v1453_v60, %v1110_v38 }
 0x2e3   : > { %v1897_v22 = vadd.f32 %v1896_v1, %v1895_v5  ;;  %2101 = vmatmul.msk.f32.gmra.mxu3 %vm1542_vm11, %v1531_v32  ;;  %v1519_v6 = vsel %vm1504_vm10, %v1486_v31, %v1206_v16 }
 0x2e4   : > { %2089 = vmatmul.msk.f32.gmra.mxu1 %vm1542_vm11, %v1519_v6 }
 0x2e8   : > { %v1040_v20 = vpop.permute.xlu1 %1039 }
 0x2e9   : > { %v1028_v11 = vpop.permute.xlu0 %1027  ;;  %v1466_v42 = vsel %vm1438_vm8, %v3442_v45, %v1040_v20  ;;  %v1208_v2 = vpop.permute.xlu2 %1207 }
 0x2ea   : > { %v1460_v12 = vsel %vm1438_vm8, %v3356_v24, %v1028_v11 }
 0x2ed   : > { %v4048_v58 = vpop.f32.mrf.mxu2 }
 0x2ee   : > { %1772 = vst.msk [vmem:[%s3968_s18 + $0x80] sm:$0xff] %vm1306_vm3, %v4048_v58 }
 0x2f0   : > { %v1136_v40 = vpop.permute.xlu1 %1135 }
 0x2f1   : > { %v1124_v48 = vpop.permute.xlu0 %1123  ;;  %v1499_v24 = vsel %vm1471_vm9, %v1466_v42, %v1136_v40  ;;  %v1222_v30 = vpop.permute.xlu2 %1221 }
 0x2f2   : > { %v1493_v13 = vsel %vm1471_vm9, %v1460_v12, %v1124_v48 }
 0x2f3   : > { %v1526_v49 = vsel %vm1504_vm10, %v1493_v13, %v1220_v62 }
 0x2f4   : > { %2096 = vmatmul.msk.f32.gmra.mxu2 %vm1542_vm11, %v1526_v49 }
 0x2f7   : > { %v1672_v15 = vpop.f32.mrf.mxu0  ;;  %v4058_v33 = vpop.f32.mrf.mxu1 }
 0x2f8   : > { %1760 = vst.msk [vmem:[%s3968_s18 + $0x20] sm:$0xff] %vm1306_vm3, %v1672_v15  ;;  %v1795_v37 = vsel %vm1306_vm3, %v1672_v15, 0.0  ;;  %v1863_v41 = vmul.f32 %v1672_v15, %v1672_v15  ;;  %v1016_v54 = vpop.permute.xlu1 %1015 }
 0x2f9   : > { %v1796_v8 = vadd.f32 %v1795_v37, %v1794_v19  ;;  %1766 = vst.msk [vmem:[%s3968_s18 + $0x50] sm:$0xff] %vm1306_vm3, %v4058_v33  ;;  %v1454_v50 = vsel %vm1438_vm8, %v3311_v25, %v1016_v54  ;;  %v1232_v47 = vpop.permute.xlu0 %1231  ;;  %v1044_v57 = vpop.permute.xlu2 %1043 }
 0x2fa   : > { %v1898_v45 = vsel %vm1306_vm3, %v1863_v41, 0.0  ;;  %v1532_v10 = vsel %vm1504_vm10, %v1499_v24, %v1232_v47  ;;  %v1487_v63 = vsel %vm1471_vm9, %v1454_v50, %v1112_v29  ;;  %v1468_v31 = vsel %vm1438_vm8, %v3611_v7, %v1044_v57 }
 0x2fb   : > { %v1899_v51 = vadd.f32 %v1898_v45, %v1897_v22  ;;  %2102 = vmatmul.msk.f32.gmra.mxu3 %vm1542_vm11, %v1532_v10  ;;  %v1520_v5 = vsel %vm1504_vm10, %v1487_v63, %v1208_v2  ;;  %v1867_v63 = vmul.f32 %v4015_v39, %v4015_v39 }
 0x2fc   : > { %2090 = vmatmul.msk.f32.gmra.mxu1 %vm1542_vm11, %v1520_v5 }
 0x300   : > { %v1042_v27 = vpop.permute.xlu1 %1041 }
 0x301   : > { %v1030_v28 = vpop.permute.xlu0 %1029  ;;  %v1467_v0 = vsel %vm1438_vm8, %v3614_v55, %v1042_v27  ;;  %v1224_v55 = vpop.permute.xlu2 %1223 }
 0x302   : > { %v1461_v4 = vsel %vm1438_vm8, %v3545_v34, %v1030_v28  ;;  %v1803_v28 = vsel %vm1306_vm3, %v4015_v39, 0.0  ;;  %v1807_v39 = vsel %vm1306_vm3, %v4058_v33, 0.0 }
 0x305   : > { %v4077_v25 = vpop.f32.mrf.mxu2 }
 0x306   : > { %1773 = vst.msk [vmem:[%s3968_s18 + $0x88] sm:$0xff] %vm1306_vm3, %v4077_v25 }
 0x308   : > { %v1138_v56 = vpop.permute.xlu1 %1137  ;;  %v4082_v36 = vpop.f32.mrf.mxu1 }
 0x309   : > { %1767 = vst.msk [vmem:[%s3968_s18 + $0x58] sm:$0xff] %vm1306_vm3, %v4082_v36  ;;  %v1126_v43 = vpop.permute.xlu0 %1125  ;;  %v1500_v16 = vsel %vm1471_vm9, %v1467_v0, %v1138_v56  ;;  %v1142_v20 = vpop.permute.xlu2 %1141 }
 0x30a   : > { %v1494_v44 = vsel %vm1471_vm9, %v1461_v4, %v1126_v43 }
 0x30b   : > { %v1527_v38 = vsel %vm1504_vm10, %v1494_v44, %v1222_v30  ;;  %v1868_v30 = vmul.f32 %v4029_v53, %v4029_v53  ;;  %v1906_v44 = vsel %vm1306_vm3, %v1867_v63, 0.0 }
 0x30c   : > { %2097 = vmatmul.msk.f32.gmra.mxu2 %vm1542_vm11, %v1527_v38  ;;  %v1805_v38 = vsel %vm1306_vm3, %v4029_v53, 0.0  ;;  %v1809_v53 = vsel %vm1306_vm3, %v4082_v36, 0.0 }
 0x30f   : > { %v1675_v23 = vpop.f32.mrf.mxu0 }
 0x310   : > { %1761 = vst.msk [vmem:[%s3968_s18 + $0x28] sm:$0xff] %vm1306_vm3, %v1675_v23  ;;  %v1797_v21 = vsel %vm1306_vm3, %v1675_v23, 0.0  ;;  %v1864_v34 = vmul.f32 %v1675_v23, %v1675_v23  ;;  %v1032_v17 = vpop.permute.xlu1 %1031  ;;  %v1869_v23 = vmul.f32 %v4058_v33, %v4058_v33 }
 0x311   : > { %v1798_v52 = vadd.f32 %v1797_v21, %v1796_v8  ;;  %v1234_v35 = vpop.permute.xlu0 %1233  ;;  %v1462_v19 = vsel %vm1438_vm8, %v3542_v14, %v1032_v17  ;;  %v1908_v21 = vsel %vm1306_vm3, %v1868_v30, 0.0 }
 0x312   : > { %v1900_v26 = vsel %vm1306_vm3, %v1864_v34, 0.0  ;;  %v1533_v46 = vsel %vm1504_vm10, %v1500_v16, %v1234_v35  ;;  %v1870_v34 = vmul.f32 %v4082_v36, %v4082_v36 }
 0x313   : > { %v1901_v9 = vadd.f32 %v1900_v26, %v1899_v51  ;;  %2103 = vmatmul.msk.f32.gmra.mxu3 %vm1542_vm11, %v1533_v46 }
 0x318   : > { %v1140_v61 = vpop.permute.xlu1 %1139 }
 0x319   : > { %v1128_v60 = vpop.permute.xlu0 %1127  ;;  %v1501_v22 = vsel %vm1471_vm9, %v1468_v31, %v1140_v61 }
 0x31a   : > { %v1495_v3 = vsel %vm1471_vm9, %v1462_v19, %v1128_v60 }
 0x31b   : > { %v1528_v1 = vsel %vm1504_vm10, %v1495_v3, %v1224_v55 }
 0x31c   : > { %2098 = vmatmul.msk.f32.gmra.mxu2 %vm1542_vm11, %v1528_v1 }
 0x31e   : > { %v4106_v32 = vpop.f32.mrf.mxu2 }
 0x31f   : > { %1774 = vst.msk [vmem:[%s3968_s18 + $0x90] sm:$0xff] %vm1306_vm3, %v4106_v32 }
 0x320   : > { %v1046_v14 = vpop.permute.xlu1 %1045 }
 0x321   : > { %v1236_v6 = vpop.permute.xlu0 %1235  ;;  %v1469_v29 = vsel %vm1438_vm8, %v3490_v18, %v1046_v14  ;;  %v1144_v18 = vpop.permute.xlu2 %1143 }
 0x322   : > { %v1534_v62 = vsel %vm1504_vm10, %v1501_v22, %v1236_v6  ;;  %v1502_v7 = vsel %vm1471_vm9, %v1469_v29, %v1142_v20 }
 0x323   : > { %2104 = vmatmul.msk.f32.gmra.mxu3 %vm1542_vm11, %v1534_v62 }
 0x325   : > { %v4116_v11 = vpop.f32.mrf.mxu3 }
 0x326   : > { %1780 = vst.msk [vmem:[%s3968_s18 + $0xc0] sm:$0xff] %vm1306_vm3, %v4116_v11 }
 0x328   : > { %v1696_v40 = vpop.f32.mrf.mxu1  ;;  %v1048_v13 = vpop.permute.xlu1 %1047 }
 0x329   : > { %1768 = vst.msk [vmem:[%s3968_s18 + $0x60] sm:$0xff] %vm1306_vm3, %v1696_v40  ;;  %v1238_v12 = vpop.permute.xlu0 %1237  ;;  %v1470_v49 = vsel %vm1438_vm8, %v3643_v59, %v1048_v13  ;;  %v1871_v35 = vmul.f32 %v1696_v40, %v1696_v40  ;;  %v1811_v33 = vsel %vm1306_vm3, %v1696_v40, 0.0  ;;  %v1875_v13 = vmul.f32 %v4048_v58, %v4048_v58 }
 0x32a   : > { %v1535_v48 = vsel %vm1504_vm10, %v1502_v7, %v1238_v12  ;;  %v1503_v41 = vsel %vm1471_vm9, %v1470_v49, %v1144_v18 }
 0x32b   : > { %2105 = vmatmul.msk.f32.gmra.mxu3 %vm1542_vm11, %v1535_v48  ;;  %v1914_v60 = vsel %vm1306_vm3, %v1871_v35, 0.0 }
 0x32f   : > { %v1678_v15 = vpop.f32.mrf.mxu0 }
 0x330   : > { %1762 = vst.msk [vmem:[%s3968_s18 + $0x30] sm:$0xff] %vm1306_vm3, %v1678_v15  ;;  %v1799_v42 = vsel %vm1306_vm3, %v1678_v15, 0.0  ;;  %v1865_v37 = vmul.f32 %v1678_v15, %v1678_v15 }
 0x331   : > { %v1800_v54 = vadd.f32 %v1799_v42, %v1798_v52  ;;  %v1240_v24 = vpop.permute.xlu0 %1239  ;;  %v1910_v52 = vsel %vm1306_vm3, %v1869_v23, 0.0 }
 0x332   : > { %v1902_v8 = vsel %vm1306_vm3, %v1865_v37, 0.0  ;;  %v1536_v50 = vsel %vm1504_vm10, %v1503_v41, %v1240_v24  ;;  %v1819_v37 = vsel %vm1306_vm3, %v4048_v58, 0.0  ;;  %v1876_v41 = vmul.f32 %v4077_v25, %v4077_v25 }
 0x333   : > { %v1903_v47 = vadd.f32 %v1902_v8, %v1901_v9  ;;  %2106 = vmatmul.msk.f32.gmra.mxu3 %vm1542_vm11, %v1536_v50  ;;  %v1912_v9 = vsel %vm1306_vm3, %v1870_v34, 0.0  ;;  %v1922_v50 = vsel %vm1306_vm3, %v1875_v13, 0.0 }
 0x334   : > { %v1924_v58 = vsel %vm1306_vm3, %v1876_v41, 0.0 }
 0x33e   : > { %v4137_v59 = vpop.f32.mrf.mxu2 }
 0x33f   : > { %1775 = vst.msk [vmem:[%s3968_s18 + $0x98] sm:$0xff] %vm1306_vm3, %v4137_v59 }
 0x345   : > { %v4142_v2 = vpop.f32.mrf.mxu3 }
 0x346   : > { %1781 = vst.msk [vmem:[%s3968_s18 + $0xc8] sm:$0xff] %vm1306_vm3, %v4142_v2 }
 0x348   : > { %v1699_v45 = vpop.f32.mrf.mxu1 }
 0x349   : > { %1769 = vst.msk [vmem:[%s3968_s18 + $0x68] sm:$0xff] %vm1306_vm3, %v1699_v45  ;;  %v1872_v61 = vmul.f32 %v1699_v45, %v1699_v45  ;;  %v1813_v3 = vsel %vm1306_vm3, %v1699_v45, 0.0  ;;  %v1877_v45 = vmul.f32 %v4106_v32, %v4106_v32 }
 0x34b   : > { %v1916_v31 = vsel %vm1306_vm3, %v1872_v61, 0.0  ;;  %v1926_v30 = vsel %vm1306_vm3, %v1877_v45, 0.0  ;;  %v1883_v61 = vmul.f32 %v4116_v11, %v4116_v11 }
 0x34f   : > { %v1681_v10 = vpop.f32.mrf.mxu0 }
 0x350   : > { %1763 = vst.msk [vmem:[%s3968_s18 + $0x38] sm:$0xff] %vm1306_vm3, %v1681_v10  ;;  %v1801_v51 = vsel %vm1306_vm3, %v1681_v10, 0.0  ;;  %v1866_v5 = vmul.f32 %v1681_v10, %v1681_v10 }
 0x351   : > { %v1802_v27 = vadd.f32 %v1801_v51, %v1800_v54 }
 0x352   : > { %v1904_v56 = vsel %vm1306_vm3, %v1866_v5, 0.0  ;;  %v1823_v5 = vsel %vm1306_vm3, %v4106_v32, 0.0 }
 0x353   : > { %v1804_v4 = vadd.f32 %v1803_v28, %v1802_v27  ;;  %v1905_v43 = vadd.f32 %v1904_v56, %v1903_v47  ;;  %v1821_v47 = vsel %vm1306_vm3, %v4077_v25, 0.0  ;;  %v1878_v27 = vmul.f32 %v4137_v59, %v4137_v59 }
 0x354   : > { %v1825_v56 = vsel %vm1306_vm3, %v4137_v59, 0.0 }
 0x355   : > { %v1806_v57 = vadd.f32 %v1805_v38, %v1804_v4  ;;  %v1907_v0 = vadd.f32 %v1906_v44, %v1905_v43  ;;  %v1928_v38 = vsel %vm1306_vm3, %v1878_v27, 0.0 }
 0x357   : > { %v1808_v17 = vadd.f32 %v1807_v39, %v1806_v57  ;;  %v1909_v16 = vadd.f32 %v1908_v21, %v1907_v0 }
 0x359   : > { %v1911_v26 = vadd.f32 %v1910_v52, %v1909_v16  ;;  %v1810_v46 = vadd.f32 %v1809_v53, %v1808_v17 }
 0x35b   : > { %v1812_v55 = vadd.f32 %v1811_v33, %v1810_v46  ;;  %v1913_v19 = vadd.f32 %v1912_v9, %v1911_v26 }
 0x35d   : > { %v1814_v1 = vadd.f32 %v1813_v3, %v1812_v55  ;;  %v1915_v36 = vadd.f32 %v1914_v60, %v1913_v19 }
 0x35f   : > { %v1720_v22 = vpop.f32.mrf.mxu2  ;;  %v1917_v14 = vadd.f32 %v1916_v31, %v1915_v36  ;;  %v1884_v36 = vmul.f32 %v4142_v2, %v4142_v2 }
 0x360   : > { %1776 = vst.msk [vmem:[%s3968_s18 + $0xa0] sm:$0xff] %vm1306_vm3, %v1720_v22  ;;  %v1879_v4 = vmul.f32 %v1720_v22, %v1720_v22  ;;  %v1827_v23 = vsel %vm1306_vm3, %v1720_v22, 0.0 }
 0x361   : > { %v1702_v6 = vpop.f32.mrf.mxu1 }
 0x362   : > { %1770 = vst.msk [vmem:[%s3968_s18 + $0x70] sm:$0xff] %vm1306_vm3, %v1702_v6  ;;  %v1873_v20 = vmul.f32 %v1702_v6, %v1702_v6  ;;  %v1815_v29 = vsel %vm1306_vm3, %v1702_v6, 0.0  ;;  %v1930_v0 = vsel %vm1306_vm3, %v1879_v4, 0.0  ;;  %v1938_v6 = vsel %vm1306_vm3, %v1883_v61, 0.0 }
 0x363   : > { %v1816_v12 = vadd.f32 %v1815_v29, %v1814_v1  ;;  %v1835_v1 = vsel %vm1306_vm3, %v4116_v11, 0.0  ;;  %v1940_v11 = vsel %vm1306_vm3, %v1884_v36, 0.0 }
 0x364   : > { %v1918_v7 = vsel %vm1306_vm3, %v1873_v20, 0.0  ;;  %v1837_v20 = vsel %vm1306_vm3, %v4142_v2, 0.0 }
 0x365   : > { %v1919_v15 = vadd.f32 %v1918_v7, %v1917_v14 }
 0x366   : > { %v4181_v62 = vpop.f32.mrf.mxu3 }
 0x367   : > { %1782 = vst.msk [vmem:[%s3968_s18 + $0xd0] sm:$0xff] %vm1306_vm3, %v4181_v62  ;;  %v1885_v29 = vmul.f32 %v4181_v62, %v4181_v62 }
 0x377   : > { %v1723_v40 = vpop.f32.mrf.mxu2 }
 0x378   : > { %1777 = vst.msk [vmem:[%s3968_s18 + $0xa8] sm:$0xff] %vm1306_vm3, %v1723_v40  ;;  %v1880_v59 = vmul.f32 %v1723_v40, %v1723_v40  ;;  %v1829_v16 = vsel %vm1306_vm3, %v1723_v40, 0.0 }
 0x379   : > { %v1705_v48 = vpop.f32.mrf.mxu1 }
 0x37a   : > { %1771 = vst.msk [vmem:[%s3968_s18 + $0x78] sm:$0xff] %vm1306_vm3, %v1705_v48  ;;  %v1817_v49 = vsel %vm1306_vm3, %v1705_v48, 0.0  ;;  %v1874_v18 = vmul.f32 %v1705_v48, %v1705_v48  ;;  %v1932_v35 = vsel %vm1306_vm3, %v1880_v59, 0.0 }
 0x37b   : > { %v1818_v42 = vadd.f32 %v1817_v49, %v1816_v12  ;;  %v1839_v12 = vsel %vm1306_vm3, %v4181_v62, 0.0 }
 0x37c   : > { %v1920_v54 = vsel %vm1306_vm3, %v1874_v18, 0.0 }
 0x37d   : > { %v1820_v24 = vadd.f32 %v1819_v37, %v1818_v42  ;;  %v1921_v8 = vadd.f32 %v1920_v54, %v1919_v15  ;;  %v1942_v15 = vsel %vm1306_vm3, %v1885_v29, 0.0 }
 0x37e   : > { %v1741_v10 = vpop.f32.mrf.mxu3 }
 0x37f   : > { %v1822_v63 = vadd.f32 %v1821_v47, %v1820_v24  ;;  %v1923_v51 = vadd.f32 %v1922_v50, %v1921_v8  ;;  %1783 = vst.msk [vmem:[%s3968_s18 + $0xd8] sm:$0xff] %vm1306_vm3, %v1741_v10  ;;  %v1886_v13 = vmul.f32 %v1741_v10, %v1741_v10  ;;  %v1841_v2 = vsel %vm1306_vm3, %v1741_v10, 0.0 }
 0x381   : > { %v1824_v28 = vadd.f32 %v1823_v5, %v1822_v63  ;;  %v1925_v25 = vadd.f32 %v1924_v58, %v1923_v51  ;;  %v1944_v41 = vsel %vm1306_vm3, %v1886_v13, 0.0 }
 0x383   : > { %v1927_v43 = vadd.f32 %v1926_v30, %v1925_v25  ;;  %v1826_v44 = vadd.f32 %v1825_v56, %v1824_v28 }
 0x385   : > { %v1828_v32 = vadd.f32 %v1827_v23, %v1826_v44  ;;  %v1929_v57 = vadd.f32 %v1928_v38, %v1927_v43 }
 0x387   : > { %v1931_v21 = vadd.f32 %v1930_v0, %v1929_v57  ;;  %v1830_v53 = vadd.f32 %v1829_v16, %v1828_v32 }
 0x389   : > { %v1933_v9 = vadd.f32 %v1932_v35, %v1931_v21 }
 0x38f   : > { %v1726_v39 = vpop.f32.mrf.mxu2 }
 0x390   : > { %1778 = vst.msk [vmem:[%s3968_s18 + $0xb0] sm:$0xff] %vm1306_vm3, %v1726_v39  ;;  %v1881_v17 = vmul.f32 %v1726_v39, %v1726_v39  ;;  %v1831_v52 = vsel %vm1306_vm3, %v1726_v39, 0.0 }
 0x391   : > { %v1832_v46 = vadd.f32 %v1831_v52, %v1830_v53 }
 0x392   : > { %v1934_v26 = vsel %vm1306_vm3, %v1881_v17, 0.0 }
 0x393   : > { %v1935_v60 = vadd.f32 %v1934_v26, %v1933_v9 }
 0x396   : > { %v1744_v34 = vpop.f32.mrf.mxu3 }
 0x397   : > { %1784 = vst.msk [vmem:[%s3968_s18 + $0xe0] sm:$0xff] %vm1306_vm3, %v1744_v34  ;;  %v1887_v54 = vmul.f32 %v1744_v34, %v1744_v34  ;;  %v1843_v8 = vsel %vm1306_vm3, %v1744_v34, 0.0 }
 0x399   : > { %v1946_v47 = vsel %vm1306_vm3, %v1887_v54, 0.0 }
 0x39f   : > { %v1729_v33 = vpop.f32.mrf.mxu2 }
 0x3a0   : > { %1779 = vst.msk [vmem:[%s3968_s18 + $0xb8] sm:$0xff] %vm1306_vm3, %v1729_v33  ;;  %v1833_v55 = vsel %vm1306_vm3, %v1729_v33, 0.0  ;;  %v1882_v19 = vmul.f32 %v1729_v33, %v1729_v33 }
 0x3a1   : > { %v1834_v3 = vadd.f32 %v1833_v55, %v1832_v46 }
 0x3a2   : > { %v1936_v31 = vsel %vm1306_vm3, %v1882_v19, 0.0 }
 0x3a3   : > { %v1836_v22 = vadd.f32 %v1835_v1, %v1834_v3  ;;  %v1937_v14 = vadd.f32 %v1936_v31, %v1935_v60 }
 0x3a5   : > { %v1838_v40 = vadd.f32 %v1837_v20, %v1836_v22  ;;  %v1939_v7 = vadd.f32 %v1938_v6, %v1937_v14 }
 0x3a6   : > { %v1747_v48 = vpop.f32.mrf.mxu3 }
 0x3a7   : > { %v1840_v49 = vadd.f32 %v1839_v12, %v1838_v40  ;;  %v1941_v18 = vadd.f32 %v1940_v11, %v1939_v7  ;;  %1785 = vst.msk [vmem:[%s3968_s18 + $0xe8] sm:$0xff] %vm1306_vm3, %v1747_v48  ;;  %v1888_v45 = vmul.f32 %v1747_v48, %v1747_v48  ;;  %v1845_v51 = vsel %vm1306_vm3, %v1747_v48, 0.0 }
 0x3a9   : > { %v1943_v42 = vadd.f32 %v1942_v15, %v1941_v18  ;;  %v1842_v37 = vadd.f32 %v1841_v2, %v1840_v49  ;;  %v1948_v5 = vsel %vm1306_vm3, %v1888_v45, 0.0 }
 0x3ab   : > { %v1945_v24 = vadd.f32 %v1944_v41, %v1943_v42  ;;  %v1844_v62 = vadd.f32 %v1843_v8, %v1842_v37 }
 0x3ad   : > { %v1947_v63 = vadd.f32 %v1946_v47, %v1945_v24  ;;  %v1846_v58 = vadd.f32 %v1845_v51, %v1844_v62 }
 0x3ae   : > { %v1750_v50 = vpop.f32.mrf.mxu3 }
 0x3af   : > { %1786 = vst.msk [vmem:[%s3968_s18 + $0xf0] sm:$0xff] %vm1306_vm3, %v1750_v50  ;;  %v1889_v10 = vmul.f32 %v1750_v50, %v1750_v50  ;;  %v1847_v27 = vsel %vm1306_vm3, %v1750_v50, 0.0  ;;  %v1949_v28 = vadd.f32 %v1948_v5, %v1947_v63 }
 0x3b0   : > { %v1848_v30 = vadd.f32 %v1847_v27, %v1846_v58 }
 0x3b1   : > { %v1950_v25 = vsel %vm1306_vm3, %v1889_v10, 0.0 }
 0x3b2   : > { %v1951_v44 = vadd.f32 %v1950_v25, %v1949_v28 }
 0x3b6   : > { %v1753_v56 = vpop.f32.mrf.mxu3 }
 0x3b7   : > { %1787 = vst.msk [vmem:[%s3968_s18 + $0xf8] sm:$0xff] %vm1306_vm3, %v1753_v56  ;;  %v1849_v4 = vsel %vm1306_vm3, %v1753_v56, 0.0  ;;  %v1890_v43 = vmul.f32 %v1753_v56, %v1753_v56 }
 0x3b8   : > { %v1850_v38 = vadd.f32 %v1849_v4, %v1848_v30 }
 0x3b9   : > { %v1952_v23 = vsel %vm1306_vm3, %v1890_v43, 0.0 }
 0x3ba   : > { %v1851_v32 = vrot.slane %v1850_v38, 4  ;;  %v1953_v57 = vadd.f32 %v1952_v23, %v1951_v44 }
 0x3bc   : > { %v1852_v0 = vadd.f32 %v1851_v32, %v1850_v38  ;;  %v1954_v21 = vrot.slane %v1953_v57, 4 }
 0x3be   : > { %v1853_v39 = vrot.slane %v1852_v0, 2  ;;  %v1955_v34 = vadd.f32 %v1954_v21, %v1953_v57 }
 0x3c0   : > { %v1854_v59 = vadd.f32 %v1853_v39, %v1852_v0  ;;  %v1956_v17 = vrot.slane %v1955_v34, 2 }
 0x3c2   : > { %v1855_v16 = vrot.slane %v1854_v59, 1  ;;  %v1957_v52 = vadd.f32 %v1956_v17, %v1955_v34 }
 0x3c4   : > { %v1856_v53 = vadd.f32 %v1855_v16, %v1854_v59  ;;  %v1958_v35 = vrot.slane %v1957_v52, 1 }
 0x3c6   : > { %1858 = vst.msk [vmem:[%s211_s21] sm:$0x1] %vm1857_vm12, %v1856_v53  ;;  %v1959_v26 = vadd.f32 %v1958_v35, %v1957_v52 }
 0x3c8   : > { %1960 = vst.msk [vmem:[%s214_s24] sm:$0x1] %vm1857_vm12, %v1959_v26 }
 0x3c9 PF: > { %s15_s15 = sadd.s32 1, %s2181_s15  }
 0x3ca   : > { %p12_p4 = scmp.ge.s32.totalorder %s15_s15, 4  }
 0x3cc   :  { %14 = sbr.rel (!%p12_p4) target bundleno = 1 (0x1), region = 82 }

// kernel: vgg_block_forward.7
= control target key start
LH: loop header
LB: loop body
LE: loop exit
PB: predicated region body
PF: predicated region fallthrough
CT: control target
= control target key end

     0   :  { %s296_s12 = smov 0   ;;  %s313_s0 = inlined_call_operand.vmem [shape: f32[2,16,64], index: 0, kind: input, shape index: {}]   ;;  %s314_s1 = inlined_call_operand.vmem [shape: f32[1,1,64], index: 1, kind: input, shape index: {}]   ;;  %s315_s2 = inlined_call_operand.vmem [shape: f32[1,1,64], index: 2, kind: input, shape index: {}]   ;;  %s316_s3 = inlined_call_operand.vmem [shape: f32[2,16,64], index: 3, kind: output, shape index: {}]  }
   0x1 LB: > { %s245_s13 = sadd.s32 4294967295, %s274_s12   ;;  %p249_p0 = scmp.ge.s32.totalorder %s274_s12, 1  ;;  %s274_s12 = sphi %s296_s12, %s13_s12  }
   0x2   : > { %p137_p1 = scmp.lt.s32.totalorder %s274_s12, 3 }
   0x4   : > { %p138_p2 = pnand %p249_p0, %p137_p1 }
   0x5   : > { %p161_p3 = scmp.lt.s32.totalorder (!%p138_p2), %s245_s13, 1 }
   0x6   : > { %141 = sbr.rel (%p138_p2) target bundleno = 23 (0x17), region = 32 }
   0xb   : > { %s318_s13 = smov (!%p161_p3, %s245_s13), 1  ;;  %v266_v0 = vld [vmem:[%s314_s1] ss:$0 sm:$0xff]  ;;  %vm187_vm0 = vcmask 523264  }
   0xc   : > { %s256_s16 = sshll.u32 %s318_s13, 4  ;;  %v267_v1 = vld [vmem:[%s315_s2] ss:$0 sm:$0xff] }
   0xd   : > { %s165_s19 = scalar_lea.vmem %s313_s0, %s256_s16  ;;  %s170_s24 = scalar_lea.vmem %s316_s3, %s256_s16 }
   0xe   : > { %v171_v2 = vld [vmem:[%s165_s19] sm:$0xff]  ;;  %v172_v3 = vld [vmem:[%s165_s19 + $0x8] sm:$0xff] }
   0xf   : > { %v177_v4 = vmul.f32 %v266_v0, %v171_v2  ;;  %v178_v5 = vmul.f32 %v266_v0, %v172_v3 }
  0x11   : > { %v183_v6 = vadd.f32 %v267_v1, %v177_v4  ;;  %v184_v7 = vadd.f32 %v267_v1, %v178_v5 }
  0x13   : > { %v185_v8 = vmax.f32 %v183_v6, 0.0  ;;  %v186_v9 = vmax.f32 %v184_v7, 0.0 }
  0x15   : > { %188 = vst.msk [vmem:[%s170_s24] sm:$0xff] %vm187_vm0, %v185_v8 }
  0x16   : > { %189 = vst.msk [vmem:[%s170_s24 + $0x8] sm:$0xff] %vm187_vm0, %v186_v9 }
  0x17 PF: > { %s13_s12 = sadd.s32 1, %s274_s12  }
  0x18   : > { %p10_p4 = scmp.ge.s32.totalorder %s13_s12, 4  }
  0x1a   :  { %12 = sbr.rel (!%p10_p4) target bundleno = 1 (0x1), region = 62 }

// kernel: vgg_block_forward.6
= control target key start
LH: loop header
LB: loop body
LE: loop exit
PB: predicated region body
PF: predicated region fallthrough
CT: control target
= control target key end

     0   :  { %s2228_s15 = smov 0   ;;  %s4299_s0 = inlined_call_operand.vmem [shape: f32[2,18,18,8], index: 0, kind: input, shape index: {}]   ;;  %s4300_s1 = inlined_call_operand.vmem [shape: f32[72,4], index: 1, kind: input, shape index: {}]   ;;  %s4301_s2 = inlined_call_operand.vmem [shape: f32[2,256,4], index: 2, kind: output, shape index: {0}]   ;;  %s4302_s3 = inlined_call_operand.vmem [shape: f32[2,1,4], index: 3, kind: output, shape index: {1}]   ;;  %s4303_s4 = inlined_call_operand.vmem [shape: f32[2,1,4], index: 4, kind: output, shape index: {2}]  }
   0x1 LB: > { %s2067_s16 = sadd.s32 4294967295, %s2193_s15   ;;  %p2071_p0 = scmp.ge.s32.totalorder %s2193_s15, 1  ;;  %s2193_s15 = sphi %s2228_s15, %s15_s15  }
   0x2   : > { %p167_p1 = scmp.lt.s32.totalorder %s2193_s15, 3 }
   0x4   : > { %p168_p2 = pnand %p2071_p0, %p167_p1 }
   0x6   : > { %171 = sbr.rel (%p168_p2) target bundleno = 969 (0x3c9), region = 28 }
   0xb   : > { %p199_p3 = scmp.lt.s32.totalorder %s2067_s16, 1  ;;  %vm317_vm0 = vcmask 1046528   ;;  %s2195_s21 = smov 8   ;;  %vm398_vm1 = vcmask 1045504   ;;  %vm1273_vm2 = vcmask 64512   ;;  %vm1306_vm3 = vcmask 130048  }
   0xc   : > { %s2196_s22 = smov 16   ;;  %s2197_s23 = smov 24   ;;  %vm1339_vm4 = vcmask 195584   ;;  %vm1372_vm5 = vcmask 261120   ;;  %vm1405_vm6 = vcmask 326656   ;;  %vm1438_vm7 = vcmask 392192  }
   0xd   : > { %s4709_s16 = smov (!%p199_p3, %s2067_s16), 1  ;;  %s2198_s24 = smov 32   ;;  %vm1471_vm8 = vcmask 457728   ;;  %vm1504_vm9 = vcmask 523264   ;;  %vm1546_vm10 = vcmask 588800   ;;  %vm1756_vm11 = vcmask 31744  }
   0xe   : > { %s2137_s17 = smul.u32 432, %s4709_s16  ;;  %s2199_s25 = smov 40   ;;  %vm1858_vm12 = vcmask 24576  }
   0xf   : > { %s2200_s26 = smov 56   ;;  %s2201_s27 = smov 48  }
  0x10   : > { %s2242_s20 = scalar_lea.vmem %s4299_s0, %s2137_s17  ;;  %s2202_s28 = smov 64  }
  0x11   : > { %v2245_v0 = vld [vmem:[%s2242_s20 + $0x30] sm:$0xff]  ;;  %v2248_v1 = vld [vmem:[%s2242_s20 + $0x38] sm:$0xff]  ;;  %v2256_v5 = vld [vmem:[%s2242_s20 + $0x20] sm:$0xff]  ;;  %s214_s6 = scalar_lea.vmem %s4303_s4, %s4709_s16 }
  0x12   : > { %v2251_v2 = vld [vmem:[%s2242_s20 + $0x18] sm:$0xff]  ;;  %v328_v3 = vrot.slane %v2245_v0, 1  ;;  %v329_v4 = vrot.slane %v2248_v1, 1  ;;  %v2260_v7 = vld [vmem:[%s2242_s20] sm:$0xff]  ;;  %v2263_v8 = vld [vmem:[%s2242_s20 + $0x8] sm:$0xff]  ;;  %v324_v9 = vrot.slane %v2256_v5, 1 }
  0x13   : > { %v323_v6 = vrot.slane %v2251_v2, 1  ;;  %v318_v10 = vrot.slane %v2260_v7, 1  ;;  %v319_v11 = vrot.slane %v2263_v8, 1  ;;  %v2269_v12 = vld [vmem:[%s2242_s20 + $0x40] sm:$0x3]  ;;  %v2303_v25 = vld [vmem:[%s2242_s20 + $0x68] sm:$0xff] }
  0x14   : > { %v2272_v13 = vsel %vm317_vm0, %v328_v3, %v329_v4  ;;  %v2275_v14 = vld [vmem:[%s2242_s20 + $0x28] sm:$0x3]  ;;  %v2278_v15 = vld [vmem:[%s2242_s20 + $0x10] sm:$0x3]  ;;  %v331_v18 = vrot.slane %v2269_v12, 1  ;;  %v2300_v24 = vld [vmem:[%s2242_s20 + $0x60] sm:$0xff] }
  0x15   : > { %513 = vrot.lane.b32.xlu2 %v2272_v13, %s2195_s21  ;;  %v2283_v16 = vsel %vm317_vm0, %v323_v6, %v324_v9  ;;  %v320_v17 = vsel %vm317_vm0, %v318_v10, %v319_v11  ;;  %v326_v19 = vrot.slane %v2275_v14, 1  ;;  %v321_v20 = vrot.slane %v2278_v15, 1  ;;  %v2306_v26 = vld [vmem:[%s2242_s20 + $0x50] sm:$0xff]  ;;  %v2309_v27 = vld [vmem:[%s2242_s20 + $0x58] sm:$0x3]  ;;  %v2312_v28 = vld [vmem:[%s2242_s20 + $0x48] sm:$0xff] }
  0x16   : > { %509 = vrot.lane.b32.xlu1 %v2283_v16, %s2195_s21  ;;  %505 = vrot.lane.b32.xlu0 %v320_v17, %s2195_s21  ;;  %v2293_v21 = vsel %vm317_vm0, %v329_v4, %v331_v18  ;;  %v338_v29 = vrot.slane %v2300_v24, 1  ;;  %v339_v30 = vrot.slane %v2303_v25, 1  ;;  %v334_v31 = vrot.slane %v2306_v26, 1  ;;  %v2334_v37 = vld [vmem:[%s2242_s20 + $0x80] sm:$0xff]  ;;  %v2337_v38 = vld [vmem:[%s2242_s20 + $0x88] sm:$0x3] }
  0x17   : > { %v2296_v22 = vsel %vm317_vm0, %v324_v9, %v326_v19  ;;  %v322_v23 = vsel %vm317_vm0, %v319_v11, %v321_v20  ;;  %v336_v32 = vrot.slane %v2309_v27, 1  ;;  %v333_v33 = vrot.slane %v2312_v28, 1  ;;  %v2340_v39 = vld [vmem:[%s2242_s20 + $0x78] sm:$0xff]  ;;  %v2343_v40 = vld [vmem:[%s2242_s20 + $0x70] sm:$0x3]  ;;  %v2365_v48 = vld [vmem:[%s2242_s20 + $0xa8] sm:$0xff] }
  0x18   : > { %v2325_v34 = vsel %vm317_vm0, %v338_v29, %v339_v30  ;;  %v344_v41 = vrot.slane %v2334_v37, 1  ;;  %v346_v42 = vrot.slane %v2337_v38, 1  ;;  %v343_v43 = vrot.slane %v2340_v39, 1  ;;  %v2368_v49 = vld [vmem:[%s2242_s20 + $0xb0] sm:$0xff]  ;;  %v2371_v50 = vld [vmem:[%s2242_s20 + $0x98] sm:$0xff]  ;;  %v2400_v61 = vld [vmem:[%s2242_s20 + $0xc8] sm:$0xff] }
  0x19   : > { %4391 = vst [vmem:[#allocation2_spill] sm:$0xff] %v2325_v34  ;;  %v2328_v35 = vsel %vm317_vm0, %v334_v31, %v336_v32  ;;  %v2331_v36 = vsel %vm317_vm0, %v333_v33, %v334_v31  ;;  %v341_v44 = vrot.slane %v2343_v40, 1  ;;  %v2374_v51 = vld [vmem:[%s2242_s20 + $0xa0] sm:$0x3]  ;;  %v2377_v52 = vld [vmem:[%s2242_s20 + $0x90] sm:$0xff]  ;;  %v353_v53 = vrot.slane %v2365_v48, 1 }
  0x1a   : > { %v2356_v45 = vsel %vm317_vm0, %v344_v41, %v346_v42  ;;  %v2359_v46 = vsel %vm317_vm0, %v343_v43, %v344_v41  ;;  %v354_v54 = vrot.slane %v2368_v49, 1  ;;  %v349_v55 = vrot.slane %v2371_v50, 1  ;;  %v2403_v62 = vld [vmem:[%s2242_s20 + $0xd0] sm:$0x3]  ;;  %v2406_v63 = vld [vmem:[%s2242_s20 + $0xc0] sm:$0xff]  ;;  %v2434_v20 = vld [vmem:[%s2242_s20 + $0xf8] sm:$0xff] }
  0x1b   : > { %4392 = vst [vmem:[#allocation3_spill] sm:$0xff] %v2356_v45  ;;  %v2362_v47 = vsel %vm317_vm0, %v339_v30, %v341_v44  ;;  %v351_v56 = vrot.slane %v2374_v51, 1  ;;  %v348_v57 = vrot.slane %v2377_v52, 1  ;;  %v2409_v3 = vld [vmem:[%s2242_s20 + $0xb8] sm:$0x3]  ;;  %v359_v4 = vrot.slane %v2400_v61, 1 }
  0x1c   : > { %4393 = vst [vmem:[#allocation4_spill] sm:$0xff] %v2359_v46  ;;  %v2391_v58 = vsel %vm317_vm0, %v353_v53, %v354_v54  ;;  %v361_v6 = vrot.slane %v2403_v62, 1  ;;  %v358_v9 = vrot.slane %v2406_v63, 1  ;;  %v356_v10 = vrot.slane %v2409_v3, 1  ;;  %v2431_v19 = vld [vmem:[%s2242_s20 + $0xf0] sm:$0xff]  ;;  %v2443_v30 = vld [vmem:[%s2242_s20 + $0xd8] sm:$0xff] }
  0x1d   : > { %515 = vrot.lane.b32.xlu2 %v2293_v21, %s2195_s21  ;;  %4394 = vst [vmem:[#allocation5_spill] sm:$0xff] %v2362_v47  ;;  %v2394_v59 = vsel %vm317_vm0, %v349_v55, %v351_v56  ;;  %v2397_v60 = vsel %vm317_vm0, %v348_v57, %v349_v55  ;;  %v2440_v29 = vld [vmem:[%s2242_s20 + $0xe8] sm:$0x3]  ;;  %v368_v31 = vrot.slane %v2431_v19, 1  ;;  %v369_v32 = vrot.slane %v2434_v20, 1 }
  0x1e   : > { %511 = vrot.lane.b32.xlu1 %v2296_v22, %s2195_s21  ;;  %507 = vrot.lane.b32.xlu0 %v322_v23, %s2195_s21  ;;  %4395 = vst [vmem:[#allocation6_spill] sm:$0xff] %v2391_v58  ;;  %v2422_v11 = vsel %vm317_vm0, %v359_v4, %v361_v6  ;;  %v2425_v17 = vsel %vm317_vm0, %v358_v9, %v359_v4  ;;  %v2437_v23 = vld [vmem:[%s2242_s20 + $0xe0] sm:$0xff]  ;;  %v366_v41 = vrot.slane %v2440_v29, 1  ;;  %v363_v42 = vrot.slane %v2443_v30, 1  ;;  %v2469_v55 = vld [vmem:[%s2242_s20 + $0x118] sm:$0x3] }
  0x1f   : > { %4396 = vst [vmem:[#allocation7_spill] sm:$0xff] %v2394_v59  ;;  %v2428_v18 = vsel %vm317_vm0, %v354_v54, %v356_v10  ;;  %v364_v33 = vrot.slane %v2437_v23, 1  ;;  %v2457_v43 = vsel %vm317_vm0, %v368_v31, %v369_v32  ;;  %v2466_v54 = vld [vmem:[%s2242_s20 + $0x110] sm:$0xff]  ;;  %v2472_v56 = vld [vmem:[%s2242_s20 + $0x108] sm:$0xff]  ;;  %v2475_v57 = vld [vmem:[%s2242_s20 + $0x100] sm:$0x3] }
  0x20   : > { %4397 = vst [vmem:[#allocation8_spill] sm:$0xff] %v2397_v60  ;;  %v374_v4 = vrot.slane %v2466_v54, 1  ;;  %v376_v6 = vrot.slane %v2469_v55, 1  ;;  %v373_v9 = vrot.slane %v2472_v56, 1  ;;  %v371_v10 = vrot.slane %v2475_v57, 1 }
  0x21   : > { %4398 = vst [vmem:[#allocation9_spill] sm:$0xff] %v2422_v11  ;;  %v2460_v44 = vsel %vm317_vm0, %v364_v33, %v366_v41  ;;  %v2463_v53 = vsel %vm317_vm0, %v363_v42, %v364_v33  ;;  %v2497_v42 = vld [vmem:[%s2242_s20 + $0x138] sm:$0xff] }
  0x22   : > { %4399 = vst [vmem:[#allocation10_spill] sm:$0xff] %v2425_v17  ;;  %v2488_v31 = vsel %vm317_vm0, %v374_v4, %v376_v6  ;;  %v2491_v33 = vsel %vm317_vm0, %v373_v9, %v374_v4  ;;  %v2494_v41 = vsel %vm317_vm0, %v369_v32, %v371_v10  ;;  %v2509_v6 = vld [vmem:[%s2242_s20 + $0x120] sm:$0xff]  ;;  %v383_v32 = vrot.slane %v2497_v42, 1 }
  0x23   : > { %4400 = vst [vmem:[#allocation11_spill] sm:$0xff] %v2428_v18 }
  0x24   : > { %4401 = vst [vmem:[#allocation12_spill] sm:$0xff] %v2457_v43 }
  0x25   : > { %521 = vrot.lane.b32.xlu2 %v2325_v34, %s2195_s21  ;;  %4402 = vst [vmem:[#allocation13_spill] sm:$0xff] %v2460_v44  ;;  %v2569_v34 = vld [vmem:[%s2242_s20 + $0x168] sm:$0xff] }
  0x26   : > { %519 = vrot.lane.b32.xlu1 %v2328_v35, %s2195_s21  ;;  %517 = vrot.lane.b32.xlu0 %v2331_v36, %s2195_s21  ;;  %4403 = vst [vmem:[#allocation14_spill] sm:$0xff] %v2463_v53 }
  0x27   : > { %4404 = vst [vmem:[#allocation15_spill] sm:$0xff] %v2488_v31 }
  0x28   : > { %4405 = vst [vmem:[#allocation16_spill] sm:$0xff] %v2491_v33 }
  0x29   : > { %4406 = vst [vmem:[#allocation17_spill] sm:$0xff] %v2494_v41 }
  0x2a   : > { %4414 = vst [vmem:[#allocation25_spill] sm:$0xff] %v2569_v34 }
  0x2d   : > { %527 = vrot.lane.b32.xlu2 %v2356_v45, %s2195_s21  ;;  %v2541_v45 = vld [vmem:[%s2242_s20 + $0x148] sm:$0x3] }
  0x2e   : > { %525 = vrot.lane.b32.xlu1 %v2359_v46, %s2195_s21  ;;  %523 = vrot.lane.b32.xlu0 %v2362_v47, %s2195_s21 }
  0x35   : > { %533 = vrot.lane.b32.xlu2 %v2391_v58, %s2195_s21 }
  0x36   : > { %531 = vrot.lane.b32.xlu1 %v2394_v59, %s2195_s21  ;;  %529 = vrot.lane.b32.xlu0 %v2397_v60, %s2195_s21 }
  0x3d   : > { %539 = vrot.lane.b32.xlu2 %v2422_v11, %s2195_s21  ;;  %v2503_v11 = vld [vmem:[%s2242_s20 + $0x128] sm:$0xff] }
  0x3e   : > { %537 = vrot.lane.b32.xlu1 %v2425_v17, %s2195_s21  ;;  %535 = vrot.lane.b32.xlu0 %v2428_v18, %s2195_s21  ;;  %v379_v9 = vrot.slane %v2503_v11, 1  ;;  %v2535_v18 = vld [vmem:[%s2242_s20 + $0x160] sm:$0x3]  ;;  %v2538_v17 = vld [vmem:[%s2242_s20 + $0x150] sm:$0xff] }
  0x45   : > { %545 = vrot.lane.b32.xlu2 %v2457_v43, %s2195_s21  ;;  %v2500_v43 = vld [vmem:[%s2242_s20 + $0x140] sm:$0xff] }
  0x46   : > { %543 = vrot.lane.b32.xlu1 %v2460_v44, %s2195_s21  ;;  %541 = vrot.lane.b32.xlu0 %v2463_v53, %s2195_s21  ;;  %4407 = vst [vmem:[#allocation18_spill] sm:$0xff] %v2500_v43  ;;  %v2506_v53 = vld [vmem:[%s2242_s20 + $0x130] sm:$0x3]  ;;  %v384_v4 = vrot.slane %v2500_v43, 1  ;;  %v378_v44 = vrot.slane %v2509_v6, 1 }
  0x47   : > { %v381_v10 = vrot.slane %v2506_v53, 1 }
  0x48   : > { %v2523_v58 = vsel %vm317_vm0, %v383_v32, %v384_v4  ;;  %v391_v32 = vrot.slane %v2535_v18, 1 }
  0x49   : > { %4408 = vst [vmem:[#allocation19_spill] sm:$0xff] %v2523_v58 }
  0x4d   : > { %551 = vrot.lane.b32.xlu2 %v2488_v31, %s2195_s21  ;;  %v2526_v31 = vsel %vm317_vm0, %v379_v9, %v381_v10  ;;  %v386_v10 = vrot.slane %v2541_v45, 1 }
  0x4e   : > { %549 = vrot.lane.b32.xlu1 %v2491_v33, %s2195_s21  ;;  %547 = vrot.lane.b32.xlu0 %v2494_v41, %s2195_s21  ;;  %4409 = vst [vmem:[#allocation20_spill] sm:$0xff] %v2526_v31  ;;  %v2529_v33 = vsel %vm317_vm0, %v378_v44, %v379_v9  ;;  %v2532_v41 = vld [vmem:[%s2242_s20 + $0x158] sm:$0xff]  ;;  %v388_v9 = vrot.slane %v2538_v17, 1 }
  0x4f   : > { %4410 = vst [vmem:[#allocation21_spill] sm:$0xff] %v2529_v33  ;;  %v389_v44 = vrot.slane %v2532_v41, 1 }
  0x51   : > { %v2554_v60 = vsel %vm317_vm0, %v389_v44, %v391_v32  ;;  %v2557_v59 = vsel %vm317_vm0, %v388_v9, %v389_v44  ;;  %v399_v44 = vrot.slane %v2260_v7, 2  ;;  %v405_v7 = vrot.slane %v2256_v5, 2 }
  0x52   : > { %4411 = vst [vmem:[#allocation22_spill] sm:$0xff] %v2554_v60 }
  0x53   : > { %4412 = vst [vmem:[#allocation23_spill] sm:$0xff] %v2557_v59 }
  0x55   : > { %557 = vrot.lane.b32.xlu2 %v2523_v58, %s2195_s21  ;;  %v2560_v58 = vsel %vm317_vm0, %v384_v4, %v386_v10  ;;  %v400_v4 = vrot.slane %v2263_v8, 2  ;;  %v393_v10 = vrot.slane %v2569_v34, 1  ;;  %v407_v8 = vrot.slane %v2275_v14, 2 }
  0x56   : > { %555 = vrot.lane.b32.xlu1 %v2526_v31, %s2195_s21  ;;  %553 = vrot.lane.b32.xlu0 %v2529_v33, %s2195_s21  ;;  %4413 = vst [vmem:[#allocation24_spill] sm:$0xff] %v2560_v58  ;;  %v2563_v31 = vld [vmem:[%s2242_s20 + $0x170] sm:$0xff]  ;;  %v2566_v33 = vld [vmem:[%s2242_s20 + $0x178] sm:$0x3]  ;;  %v414_v14 = vrot.slane %v2312_v28, 2 }
  0x57   : > { %v394_v32 = vrot.slane %v2563_v31, 1  ;;  %v396_v9 = vrot.slane %v2566_v33, 1  ;;  %v401_v47 = vsel %vm398_vm1, %v399_v44, %v400_v4  ;;  %v404_v44 = vrot.slane %v2251_v2, 2 }
  0x5d   : > { %563 = vrot.lane.b32.xlu2 %v2554_v60, %s2195_s21  ;;  %v2584_v60 = vsel %vm317_vm0, %v394_v32, %v396_v9  ;;  %v402_v9 = vrot.slane %v2278_v15, 2  ;;  %v415_v15 = vrot.slane %v2306_v26, 2 }
  0x5e   : > { %561 = vrot.lane.b32.xlu1 %v2557_v59, %s2195_s21  ;;  %559 = vrot.lane.b32.xlu0 %v2560_v58, %s2195_s21  ;;  %4415 = vst [vmem:[#allocation26_spill] sm:$0xff] %v2584_v60  ;;  %v2587_v59 = vsel %vm317_vm0, %v393_v10, %v394_v32  ;;  %v2599_v32 = vsel %vm398_vm1, %v405_v7, %v407_v8  ;;  %v410_v8 = vrot.slane %v2248_v1, 2 }
  0x5f   : > { %4416 = vst [vmem:[#allocation27_spill] sm:$0xff] %v2587_v59  ;;  %v2602_v10 = vsel %vm398_vm1, %v404_v44, %v405_v7  ;;  %v412_v7 = vrot.slane %v2269_v12, 2  ;;  %v2618_v44 = vsel %vm398_vm1, %v414_v14, %v415_v15  ;;  %v420_v12 = vrot.slane %v2303_v25, 2 }
  0x60   : > { %4417 = vst [vmem:[#allocation28_spill] sm:$0xff] %v2599_v32  ;;  %v422_v14 = vrot.slane %v2343_v40, 2  ;;  %v430_v40 = vrot.slane %v2371_v50, 2 }
  0x61   : > { %4419 = vst [vmem:[#allocation30_spill] sm:$0xff] %v2618_v44 }
  0x65   : > { %601 = vrot.lane.b32.xlu2 %v401_v47, %s2196_s22  ;;  %v403_v47 = vsel %vm398_vm1, %v400_v4, %v402_v9  ;;  %v409_v4 = vrot.slane %v2245_v0, 2  ;;  %v2621_v9 = vsel %vm398_vm1, %v410_v8, %v412_v7  ;;  %v419_v7 = vrot.slane %v2300_v24, 2 }
  0x66   : > { %567 = vrot.lane.b32.xlu1 %v2584_v60, %s2195_s21  ;;  %565 = vrot.lane.b32.xlu0 %v2587_v59, %s2195_s21 }
  0x6d   : > { %607 = vrot.lane.b32.xlu2 %v2599_v32, %s2196_s22 }
  0x6e   : > { %605 = vrot.lane.b32.xlu1 %v2602_v10, %s2196_s22  ;;  %603 = vrot.lane.b32.xlu0 %v403_v47, %s2196_s22  ;;  %v2624_v47 = vsel %vm398_vm1, %v409_v4, %v410_v8  ;;  %v417_v8 = vrot.slane %v2309_v27, 2  ;;  %v2639_v4 = vsel %vm398_vm1, %v420_v12, %v422_v14  ;;  %v429_v27 = vrot.slane %v2377_v52, 2 }
  0x6f   : > { %v2612_v59 = vpop.permute.xlu2 %513  ;;  %4421 = vst [vmem:[#allocation32_spill] sm:$0xff] %v2639_v4 }
  0x70   : > { %4418 = vst [vmem:[#allocation29_spill] sm:$0xff] %v2612_v59  ;;  %v2645_v32 = vsel %vm398_vm1, %v415_v15, %v417_v8  ;;  %v427_v15 = vrot.slane %v2337_v38, 2  ;;  %v2661_v8 = vsel %vm398_vm1, %v429_v27, %v430_v40  ;;  %v435_v38 = vrot.slane %v2368_v49, 2 }
  0x71   : > { %4423 = vst [vmem:[#allocation34_spill] sm:$0xff] %v2645_v32  ;;  %v437_v27 = vrot.slane %v2409_v3, 2  ;;  %v445_v3 = vrot.slane %v2437_v23, 2 }
  0x72   : > { %4425 = vst [vmem:[#allocation36_spill] sm:$0xff] %v2661_v8 }
  0x75   : > { %613 = vrot.lane.b32.xlu2 %v2618_v44, %s2196_s22  ;;  %v2642_v44 = vsel %vm398_vm1, %v419_v7, %v420_v12  ;;  %v425_v12 = vrot.slane %v2334_v37, 2  ;;  %v424_v7 = vrot.slane %v2340_v39, 2 }
  0x76   : > { %611 = vrot.lane.b32.xlu1 %v2621_v9, %s2196_s22  ;;  %609 = vrot.lane.b32.xlu0 %v2624_v47, %s2196_s22  ;;  %4422 = vst [vmem:[#allocation33_spill] sm:$0xff] %v2642_v44 }
  0x77   : > { %v2634_v59 = vpop.permute.xlu2 %515 }
  0x78   : > { %4420 = vst [vmem:[#allocation31_spill] sm:$0xff] %v2634_v59  ;;  %v2664_v59 = vsel %vm398_vm1, %v425_v12, %v427_v15  ;;  %v434_v15 = vrot.slane %v2365_v48, 2 }
  0x79   : > { %4426 = vst [vmem:[#allocation37_spill] sm:$0xff] %v2664_v59 }
  0x7d   : > { %619 = vrot.lane.b32.xlu2 %v2639_v4, %s2196_s22  ;;  %v2667_v4 = vsel %vm398_vm1, %v424_v7, %v425_v12  ;;  %v432_v12 = vrot.slane %v2374_v51, 2  ;;  %v444_v51 = vrot.slane %v2443_v30, 2 }
  0x7e   : > { %617 = vrot.lane.b32.xlu1 %v2642_v44, %s2196_s22  ;;  %615 = vrot.lane.b32.xlu0 %v2645_v32, %s2196_s22  ;;  %4427 = vst [vmem:[#allocation38_spill] sm:$0xff] %v2667_v4 }
  0x7f   : > { %v2655_v14 = vpop.permute.xlu2 %521 }
  0x80   : > { %4424 = vst [vmem:[#allocation35_spill] sm:$0xff] %v2655_v14 }
  0x85   : > { %625 = vrot.lane.b32.xlu2 %v2661_v8, %s2196_s22  ;;  %v2686_v8 = vsel %vm398_vm1, %v435_v38, %v437_v27 }
  0x86   : > { %623 = vrot.lane.b32.xlu1 %v2664_v59, %s2196_s22  ;;  %621 = vrot.lane.b32.xlu0 %v2667_v4, %s2196_s22  ;;  %4431 = vst [vmem:[#allocation42_spill] sm:$0xff] %v2686_v8  ;;  %v2689_v59 = vsel %vm398_vm1, %v434_v15, %v435_v38  ;;  %v2692_v4 = vsel %vm398_vm1, %v430_v40, %v432_v12  ;;  %v440_v38 = vrot.slane %v2400_v61, 2  ;;  %v442_v40 = vrot.slane %v2403_v62, 2 }
  0x87   : > { %v2677_v14 = vpop.permute.xlu2 %527  ;;  %4432 = vst [vmem:[#allocation43_spill] sm:$0xff] %v2689_v59  ;;  %v439_v15 = vrot.slane %v2406_v63, 2  ;;  %v450_v62 = vrot.slane %v2434_v20, 2 }
  0x88   : > { %4428 = vst [vmem:[#allocation39_spill] sm:$0xff] %v2677_v14  ;;  %v2681_v7 = vpop.permute.xlu1 %509  ;;  %v2683_v32 = vpop.permute.xlu0 %505 }
  0x89   : > { %4429 = vst [vmem:[#allocation40_spill] sm:$0xff] %v2681_v7  ;;  %v2712_v7 = vsel %vm398_vm1, %v444_v51, %v445_v3  ;;  %v452_v51 = vrot.slane %v2475_v57, 2  ;;  %v460_v57 = vrot.slane %v2503_v11, 2 }
  0x8a   : > { %4430 = vst [vmem:[#allocation41_spill] sm:$0xff] %v2683_v32  ;;  %v2715_v32 = vsel %vm398_vm1, %v440_v38, %v442_v40  ;;  %v449_v40 = vrot.slane %v2431_v19, 2 }
  0x8b   : > { %4436 = vst [vmem:[#allocation47_spill] sm:$0xff] %v2712_v7 }
  0x8c   : > { %4437 = vst [vmem:[#allocation48_spill] sm:$0xff] %v2715_v32 }
  0x8d   : > { %631 = vrot.lane.b32.xlu2 %v2686_v8, %s2196_s22  ;;  %v2718_v8 = vsel %vm398_vm1, %v439_v15, %v440_v38  ;;  %v447_v38 = vrot.slane %v2440_v29, 2  ;;  %v459_v29 = vrot.slane %v2509_v6, 2 }
  0x8e   : > { %629 = vrot.lane.b32.xlu1 %v2689_v59, %s2196_s22  ;;  %627 = vrot.lane.b32.xlu0 %v2692_v4, %s2196_s22  ;;  %4438 = vst [vmem:[#allocation49_spill] sm:$0xff] %v2718_v8 }
  0x8f   : > { %v2702_v27 = vpop.permute.xlu2 %533 }
  0x90   : > { %4433 = vst [vmem:[#allocation44_spill] sm:$0xff] %v2702_v27  ;;  %v2707_v12 = vpop.permute.xlu1 %511  ;;  %v2709_v14 = vpop.permute.xlu0 %507  ;;  %v2737_v27 = vsel %vm398_vm1, %v450_v62, %v452_v51 }
  0x91   : > { %4434 = vst [vmem:[#allocation45_spill] sm:$0xff] %v2707_v12 }
  0x92   : > { %4435 = vst [vmem:[#allocation46_spill] sm:$0xff] %v2709_v14 }
  0x93   : > { %4442 = vst [vmem:[#allocation53_spill] sm:$0xff] %v2737_v27 }
  0x95   : > { %637 = vrot.lane.b32.xlu2 %v2712_v7, %s2196_s22  ;;  %v2740_v7 = vsel %vm398_vm1, %v449_v40, %v450_v62  ;;  %v455_v62 = vrot.slane %v2466_v54, 2  ;;  %v454_v40 = vrot.slane %v2472_v56, 2 }
  0x96   : > { %635 = vrot.lane.b32.xlu1 %v2715_v32, %s2196_s22  ;;  %633 = vrot.lane.b32.xlu0 %v2718_v8, %s2196_s22  ;;  %v2743_v8 = vsel %vm398_vm1, %v445_v3, %v447_v38  ;;  %v457_v3 = vrot.slane %v2469_v55, 2  ;;  %v465_v55 = vrot.slane %v2500_v43, 2 }
  0x97   : > { %v2728_v12 = vpop.permute.xlu2 %539  ;;  %4443 = vst [vmem:[#allocation54_spill] sm:$0xff] %v2743_v8 }
  0x98   : > { %4439 = vst [vmem:[#allocation50_spill] sm:$0xff] %v2728_v12  ;;  %v2732_v15 = vpop.permute.xlu1 %519  ;;  %v2734_v14 = vpop.permute.xlu0 %517  ;;  %v2766_v12 = vsel %vm398_vm1, %v455_v62, %v457_v3  ;;  %v464_v3 = vrot.slane %v2497_v42, 2 }
  0x99   : > { %4440 = vst [vmem:[#allocation51_spill] sm:$0xff] %v2732_v15 }
  0x9a   : > { %4441 = vst [vmem:[#allocation52_spill] sm:$0xff] %v2734_v14  ;;  %v2763_v14 = vsel %vm398_vm1, %v459_v29, %v460_v57  ;;  %v467_v29 = vrot.slane %v2541_v45, 2  ;;  %v474_v45 = vrot.slane %v2569_v34, 2 }
  0x9b   : > { %4447 = vst [vmem:[#allocation58_spill] sm:$0xff] %v2763_v14 }
  0x9c   : > { %4448 = vst [vmem:[#allocation59_spill] sm:$0xff] %v2766_v12 }
  0x9d   : > { %643 = vrot.lane.b32.xlu2 %v2737_v27, %s2196_s22  ;;  %v2769_v27 = vsel %vm398_vm1, %v454_v40, %v455_v62  ;;  %v462_v62 = vrot.slane %v2506_v53, 2  ;;  %v475_v53 = vrot.slane %v2563_v31, 2 }
  0x9e   : > { %641 = vrot.lane.b32.xlu1 %v2740_v7, %s2196_s22  ;;  %639 = vrot.lane.b32.xlu0 %v2743_v8, %s2196_s22  ;;  %4449 = vst [vmem:[#allocation60_spill] sm:$0xff] %v2769_v27 }
  0x9f   : > { %v2753_v51 = vpop.permute.xlu2 %545 }
  0xa0   : > { %4444 = vst [vmem:[#allocation55_spill] sm:$0xff] %v2753_v51  ;;  %v2758_v38 = vpop.permute.xlu1 %525  ;;  %v2760_v15 = vpop.permute.xlu0 %523  ;;  %v2788_v51 = vsel %vm398_vm1, %v465_v55, %v467_v29 }
  0xa1   : > { %4445 = vst [vmem:[#allocation56_spill] sm:$0xff] %v2758_v38 }
  0xa2   : > { %4446 = vst [vmem:[#allocation57_spill] sm:$0xff] %v2760_v15 }
  0xa3   : > { %4453 = vst [vmem:[#allocation64_spill] sm:$0xff] %v2788_v51 }
  0xa5   : > { %649 = vrot.lane.b32.xlu2 %v2763_v14, %s2196_s22  ;;  %v2791_v14 = vsel %vm398_vm1, %v464_v3, %v465_v55  ;;  %v470_v55 = vrot.slane %v2532_v41, 2  ;;  %v469_v3 = vrot.slane %v2538_v17, 2 }
  0xa6   : > { %647 = vrot.lane.b32.xlu1 %v2766_v12, %s2196_s22  ;;  %645 = vrot.lane.b32.xlu0 %v2769_v27, %s2196_s22  ;;  %4454 = vst [vmem:[#allocation65_spill] sm:$0xff] %v2791_v14  ;;  %v2794_v27 = vsel %vm398_vm1, %v460_v57, %v462_v62  ;;  %v472_v57 = vrot.slane %v2535_v18, 2 }
  0xa7   : > { %v2779_v38 = vpop.permute.xlu2 %551  ;;  %4455 = vst [vmem:[#allocation66_spill] sm:$0xff] %v2794_v27 }
  0xa8   : > { %4450 = vst [vmem:[#allocation61_spill] sm:$0xff] %v2779_v38  ;;  %v2783_v40 = vpop.permute.xlu1 %531  ;;  %v2785_v15 = vpop.permute.xlu0 %529  ;;  %v2814_v38 = vsel %vm398_vm1, %v474_v45, %v475_v53  ;;  %v477_v45 = vrot.slane %v2566_v33, 2 }
  0xa9   : > { %4451 = vst [vmem:[#allocation62_spill] sm:$0xff] %v2783_v40  ;;  %v2817_v40 = vsel %vm398_vm1, %v470_v55, %v472_v57 }
  0xaa   : > { %4452 = vst [vmem:[#allocation63_spill] sm:$0xff] %v2785_v15 }
  0xab   : > { %4458 = vst [vmem:[#allocation69_spill] sm:$0xff] %v2817_v40 }
  0xad   : > { %655 = vrot.lane.b32.xlu2 %v2788_v51, %s2196_s22  ;;  %v2820_v51 = vsel %vm398_vm1, %v469_v3, %v470_v55  ;;  %v2836_v55 = vsel %vm398_vm1, %v475_v53, %v477_v45 }
  0xae   : > { %653 = vrot.lane.b32.xlu1 %v2791_v14, %s2196_s22  ;;  %651 = vrot.lane.b32.xlu0 %v2794_v27, %s2196_s22  ;;  %4461 = vst [vmem:[#allocation72_spill] sm:$0xff] %v2836_v55 }
  0xaf   : > { %v2804_v29 = vpop.permute.xlu2 %557 }
  0xb0   : > { %4456 = vst [vmem:[#allocation67_spill] sm:$0xff] %v2804_v29  ;;  %v2809_v62 = vpop.permute.xlu1 %537  ;;  %v2811_v15 = vpop.permute.xlu0 %535 }
  0xb1   : > { %4457 = vst [vmem:[#allocation68_spill] sm:$0xff] %v2809_v62 }
  0xb5   : > { %661 = vrot.lane.b32.xlu2 %v2814_v38, %s2196_s22 }
  0xb6   : > { %659 = vrot.lane.b32.xlu1 %v2817_v40, %s2196_s22  ;;  %657 = vrot.lane.b32.xlu0 %v2820_v51, %s2196_s22 }
  0xb7   : > { %v2828_v18 = vpop.permute.xlu2 %563 }
  0xb8   : > { %4459 = vst [vmem:[#allocation70_spill] sm:$0xff] %v2828_v18  ;;  %v2831_v29 = vpop.permute.xlu1 %543  ;;  %v2833_v57 = vpop.permute.xlu0 %541 }
  0xb9   : > { %4460 = vst [vmem:[#allocation71_spill] sm:$0xff] %v2831_v29 }
  0xbd   : > { %699 = vrot.lane.b32.xlu2 %v2256_v5, %s2197_s23 }
  0xbe   : > { %697 = vrot.lane.b32.xlu1 %v2251_v2, %s2197_s23  ;;  %663 = vrot.lane.b32.xlu0 %v2836_v55, %s2196_s22 }
  0xbf   : > { %v2844_v3 = vpop.permute.xlu2 %601 }
  0xc0   : > { %4462 = vst [vmem:[#allocation73_spill] sm:$0xff] %v2844_v3  ;;  %v2846_v33 = vpop.permute.xlu1 %549  ;;  %v2848_v18 = vpop.permute.xlu0 %547 }
  0xc1   : > { %4463 = vst [vmem:[#allocation74_spill] sm:$0xff] %v2846_v33 }
  0xc5   : > { %705 = vrot.lane.b32.xlu2 %v2312_v28, %s2197_s23 }
  0xc6   : > { %703 = vrot.lane.b32.xlu1 %v2248_v1, %s2197_s23  ;;  %701 = vrot.lane.b32.xlu0 %v2245_v0, %s2197_s23 }
  0xc7   : > { %v2856_v5 = vpop.permute.xlu2 %607 }
  0xc8   : > { %4464 = vst [vmem:[#allocation75_spill] sm:$0xff] %v2856_v5  ;;  %v2858_v2 = vpop.permute.xlu1 %555  ;;  %v2860_v53 = vpop.permute.xlu0 %553 }
  0xc9   : > { %4465 = vst [vmem:[#allocation76_spill] sm:$0xff] %v2858_v2 }
  0xcd   : > { %711 = vrot.lane.b32.xlu2 %v2303_v25, %s2197_s23 }
  0xce   : > { %709 = vrot.lane.b32.xlu1 %v2300_v24, %s2197_s23  ;;  %707 = vrot.lane.b32.xlu0 %v2306_v26, %s2197_s23 }
  0xcf   : > { %v2868_v45 = vpop.permute.xlu2 %613 }
  0xd0   : > { %4466 = vst [vmem:[#allocation77_spill] sm:$0xff] %v2868_v45  ;;  %v2870_v1 = vpop.permute.xlu1 %561  ;;  %v2872_v3 = vpop.permute.xlu0 %559 }
  0xd1   : > { %4467 = vst [vmem:[#allocation78_spill] sm:$0xff] %v2870_v1 }
  0xd2   : > { %4468 = vst [vmem:[#allocation79_spill] sm:$0xff] %v2872_v3 }
  0xd5   : > { %717 = vrot.lane.b32.xlu2 %v2377_v52, %s2197_s23 }
  0xd6   : > { %715 = vrot.lane.b32.xlu1 %v2334_v37, %s2197_s23  ;;  %713 = vrot.lane.b32.xlu0 %v2340_v39, %s2197_s23 }
  0xd7   : > { %v2880_v25 = vpop.permute.xlu2 %619 }
  0xd8   : > { %4469 = vst [vmem:[#allocation80_spill] sm:$0xff] %v2880_v25  ;;  %v2882_v24 = vpop.permute.xlu1 %567  ;;  %v2884_v5 = vpop.permute.xlu0 %565 }
  0xd9   : > { %4470 = vst [vmem:[#allocation81_spill] sm:$0xff] %v2882_v24 }
  0xda   : > { %4471 = vst [vmem:[#allocation82_spill] sm:$0xff] %v2884_v5 }
  0xdd   : > { %723 = vrot.lane.b32.xlu2 %v2368_v49, %s2197_s23 }
  0xde   : > { %721 = vrot.lane.b32.xlu1 %v2365_v48, %s2197_s23  ;;  %719 = vrot.lane.b32.xlu0 %v2371_v50, %s2197_s23 }
  0xdf   : > { %v2892_v45 = vpop.permute.xlu2 %625 }
  0xe0   : > { %4472 = vst [vmem:[#allocation83_spill] sm:$0xff] %v2892_v45  ;;  %v2894_v37 = vpop.permute.xlu1 %605  ;;  %v2896_v39 = vpop.permute.xlu0 %603 }
  0xe1   : > { %4473 = vst [vmem:[#allocation84_spill] sm:$0xff] %v2894_v37 }
  0xe2   : > { %4474 = vst [vmem:[#allocation85_spill] sm:$0xff] %v2896_v39 }
  0xe5   : > { %729 = vrot.lane.b32.xlu2 %v2443_v30, %s2197_s23 }
  0xe6   : > { %727 = vrot.lane.b32.xlu1 %v2400_v61, %s2197_s23  ;;  %725 = vrot.lane.b32.xlu0 %v2406_v63, %s2197_s23 }
  0xe7   : > { %v2904_v25 = vpop.permute.xlu2 %631 }
  0xe8   : > { %v2906_v24 = vpop.permute.xlu1 %611  ;;  %v2908_v1 = vpop.permute.xlu0 %609 }
  0xe9   : > { %4475 = vst [vmem:[#allocation86_spill] sm:$0xff] %v2906_v24 }
  0xea   : > { %4476 = vst [vmem:[#allocation87_spill] sm:$0xff] %v2908_v1 }
  0xed   : > { %735 = vrot.lane.b32.xlu2 %v2434_v20, %s2197_s23 }
  0xee   : > { %733 = vrot.lane.b32.xlu1 %v2431_v19, %s2197_s23  ;;  %731 = vrot.lane.b32.xlu0 %v2437_v23, %s2197_s23 }
  0xef   : > { %v2916_v45 = vpop.permute.xlu2 %637 }
  0xf0   : > { %v2918_v61 = vpop.permute.xlu1 %617  ;;  %v2920_v63 = vpop.permute.xlu0 %615 }
  0xf1   : > { %4477 = vst [vmem:[#allocation88_spill] sm:$0xff] %v2918_v61  ;;  %v2962_v61 = vld [vmem:[%s2242_s20 + $0x180] sm:$0xff] }
  0xf2   : > { %4478 = vst [vmem:[#allocation89_spill] sm:$0xff] %v2920_v63 }
  0xf5   : > { %741 = vrot.lane.b32.xlu2 %v2509_v6, %s2197_s23 }
  0xf6   : > { %739 = vrot.lane.b32.xlu1 %v2466_v54, %s2197_s23  ;;  %737 = vrot.lane.b32.xlu0 %v2472_v56, %s2197_s23 }
  0xf7   : > { %v2928_v24 = vpop.permute.xlu2 %643 }
  0xf8   : > { %v2930_v23 = vpop.permute.xlu1 %623  ;;  %v2932_v1 = vpop.permute.xlu0 %621 }
  0xf9   : > { %4479 = vst [vmem:[#allocation90_spill] sm:$0xff] %v2930_v23 }
  0xfa   : > { %4480 = vst [vmem:[#allocation91_spill] sm:$0xff] %v2932_v1  ;;  %v2959_v1 = vld [vmem:[%s2242_s20 + $0x188] sm:$0xff] }
  0xfd   : > { %747 = vrot.lane.b32.xlu2 %v2500_v43, %s2197_s23 }
  0xfe   : > { %745 = vrot.lane.b32.xlu1 %v2497_v42, %s2197_s23  ;;  %743 = vrot.lane.b32.xlu0 %v2503_v11, %s2197_s23 }
  0xff   : > { %v2940_v54 = vpop.permute.xlu2 %649 }
 0x100   : > { %v2942_v56 = vpop.permute.xlu1 %629  ;;  %v2944_v63 = vpop.permute.xlu0 %627 }
 0x105   : > { %753 = vrot.lane.b32.xlu2 %v2569_v34, %s2197_s23 }
 0x106   : > { %751 = vrot.lane.b32.xlu1 %v2532_v41, %s2197_s23  ;;  %749 = vrot.lane.b32.xlu0 %v2538_v17, %s2197_s23 }
 0x107   : > { %v2952_v23 = vpop.permute.xlu2 %655 }
 0x108   : > { %4481 = vst [vmem:[#allocation92_spill] sm:$0xff] %v2952_v23  ;;  %v2954_v42 = vpop.permute.xlu1 %635  ;;  %v2956_v11 = vpop.permute.xlu0 %633 }
 0x109   : > { %4482 = vst [vmem:[#allocation93_spill] sm:$0xff] %v2954_v42 }
 0x10a   : > { %4483 = vst [vmem:[#allocation94_spill] sm:$0xff] %v2956_v11  ;;  %v4515_v11 = vld [vmem:[#allocation16_spill] sm:$0xff] }
 0x10d   : > { %759 = vrot.lane.b32.xlu2 %v2959_v1, %s2197_s23 }
 0x10e   : > { %757 = vrot.lane.b32.xlu1 %v2962_v61, %s2197_s23  ;;  %755 = vrot.lane.b32.xlu0 %v2563_v31, %s2197_s23 }
 0x10f   : > { %v2970_v17 = vpop.permute.xlu2 %661 }
 0x110   : > { %4484 = vst [vmem:[#allocation95_spill] sm:$0xff] %v2970_v17  ;;  %v2972_v41 = vpop.permute.xlu1 %641  ;;  %v2974_v37 = vpop.permute.xlu0 %639 }
 0x111   : > { %4485 = vst [vmem:[#allocation96_spill] sm:$0xff] %v2972_v41 }
 0x112   : > { %4486 = vst [vmem:[#allocation97_spill] sm:$0xff] %v2974_v37 }
 0x115   : > { %797 = vrot.lane.b32.xlu2 %v2272_v13, %s2198_s24 }
 0x116   : > { %795 = vrot.lane.b32.xlu1 %v2296_v22, %s2198_s24  ;;  %793 = vrot.lane.b32.xlu0 %v2283_v16, %s2198_s24 }
 0x117   : > { %v2982_v39 = vpop.permute.xlu2 %699 }
 0x118   : > { %4487 = vst [vmem:[#allocation98_spill] sm:$0xff] %v2982_v39  ;;  %v2984_v2 = vpop.permute.xlu1 %647  ;;  %v2986_v31 = vpop.permute.xlu0 %645  ;;  %v4493_v39 = vld [vmem:[#allocation5_spill] sm:$0xff] }
 0x119   : > { %4488 = vst [vmem:[#allocation99_spill] sm:$0xff] %v2984_v2 }
 0x11a   : > { %4489 = vst [vmem:[#allocation100_spill] sm:$0xff] %v2986_v31  ;;  %v4494_v31 = vld [vmem:[#allocation2_spill] sm:$0xff] }
 0x11d   : > { %803 = vrot.lane.b32.xlu2 %v2328_v35, %s2198_s24 }
 0x11e   : > { %801 = vrot.lane.b32.xlu1 %v2331_v36, %s2198_s24  ;;  %799 = vrot.lane.b32.xlu0 %v2293_v21, %s2198_s24 }
 0x11f   : > { %v2994_v33 = vpop.permute.xlu2 %705 }
 0x120   : > { %4490 = vst [vmem:[#allocation101_spill] sm:$0xff] %v2994_v33  ;;  %v2996_v22 = vpop.permute.xlu1 %653  ;;  %v2998_v16 = vpop.permute.xlu0 %651  ;;  %v4498_v33 = vld [vmem:[#allocation7_spill] sm:$0xff] }
 0x121   : > { %4491 = vst [vmem:[#allocation102_spill] sm:$0xff] %v2996_v22 }
 0x122   : > { %4492 = vst [vmem:[#allocation103_spill] sm:$0xff] %v2998_v16  ;;  %v4499_v16 = vld [vmem:[#allocation8_spill] sm:$0xff] }
 0x125   : > { %809 = vrot.lane.b32.xlu2 %v2359_v46, %s2198_s24  ;;  %v4500_v46 = vld [vmem:[#allocation3_spill] sm:$0xff] }
 0x126   : > { %807 = vrot.lane.b32.xlu1 %v4493_v39, %s2198_s24  ;;  %805 = vrot.lane.b32.xlu0 %v4494_v31, %s2198_s24 }
 0x127   : > { %v3006_v2 = vpop.permute.xlu2 %711 }
 0x128   : > { %4495 = vst [vmem:[#allocation2_spill] sm:$0xff] %v3006_v2  ;;  %v3008_v37 = vpop.permute.xlu1 %659  ;;  %v3010_v41 = vpop.permute.xlu0 %657  ;;  %v4504_v2 = vld [vmem:[#allocation10_spill] sm:$0xff] }
 0x129   : > { %4496 = vst [vmem:[#allocation104_spill] sm:$0xff] %v3008_v37  ;;  %v4506_v37 = vld [vmem:[#allocation6_spill] sm:$0xff] }
 0x12a   : > { %4497 = vst [vmem:[#allocation105_spill] sm:$0xff] %v3010_v41  ;;  %v4505_v41 = vld [vmem:[#allocation11_spill] sm:$0xff] }
 0x12d   : > { %815 = vrot.lane.b32.xlu2 %v4498_v33, %s2198_s24 }
 0x12e   : > { %813 = vrot.lane.b32.xlu1 %v4499_v16, %s2198_s24  ;;  %811 = vrot.lane.b32.xlu0 %v4500_v46, %s2198_s24 }
 0x12f   : > { %v3018_v22 = vpop.permute.xlu2 %717 }
 0x130   : > { %4501 = vst [vmem:[#allocation7_spill] sm:$0xff] %v3018_v22  ;;  %v3020_v39 = vpop.permute.xlu1 %697  ;;  %v3022_v17 = vpop.permute.xlu0 %663  ;;  %v4509_v22 = vld [vmem:[#allocation13_spill] sm:$0xff] }
 0x131   : > { %4502 = vst [vmem:[#allocation8_spill] sm:$0xff] %v3020_v39  ;;  %v4510_v39 = vld [vmem:[#allocation14_spill] sm:$0xff] }
 0x132   : > { %4503 = vst [vmem:[#allocation106_spill] sm:$0xff] %v3022_v17 }
 0x135   : > { %821 = vrot.lane.b32.xlu2 %v4504_v2, %s2198_s24  ;;  %v4511_v2 = vld [vmem:[#allocation9_spill] sm:$0xff] }
 0x136   : > { %819 = vrot.lane.b32.xlu1 %v4505_v41, %s2198_s24  ;;  %817 = vrot.lane.b32.xlu0 %v4506_v37, %s2198_s24 }
 0x137   : > { %v3030_v29 = vpop.permute.xlu2 %723 }
 0x138   : > { %v3032_v34 = vpop.permute.xlu1 %703  ;;  %v3034_v46 = vpop.permute.xlu0 %701 }
 0x139   : > { %4507 = vst [vmem:[#allocation6_spill] sm:$0xff] %v3032_v34  ;;  %v4516_v34 = vld [vmem:[#allocation17_spill] sm:$0xff] }
 0x13a   : > { %4508 = vst [vmem:[#allocation107_spill] sm:$0xff] %v3034_v46 }
 0x13d   : > { %827 = vrot.lane.b32.xlu2 %v4509_v22, %s2198_s24  ;;  %v4517_v22 = vld [vmem:[#allocation12_spill] sm:$0xff] }
 0x13e   : > { %825 = vrot.lane.b32.xlu1 %v4510_v39, %s2198_s24  ;;  %823 = vrot.lane.b32.xlu0 %v4511_v2, %s2198_s24 }
 0x13f   : > { %v3042_v17 = vpop.permute.xlu2 %729 }
 0x140   : > { %4512 = vst [vmem:[#allocation108_spill] sm:$0xff] %v3042_v17  ;;  %v3044_v41 = vpop.permute.xlu1 %709  ;;  %v3046_v5 = vpop.permute.xlu0 %707 }
 0x141   : > { %4513 = vst [vmem:[#allocation109_spill] sm:$0xff] %v3044_v41  ;;  %v4521_v41 = vld [vmem:[#allocation20_spill] sm:$0xff] }
 0x142   : > { %4514 = vst [vmem:[#allocation110_spill] sm:$0xff] %v3046_v5  ;;  %v4522_v5 = vld [vmem:[#allocation21_spill] sm:$0xff] }
 0x145   : > { %833 = vrot.lane.b32.xlu2 %v4515_v11, %s2198_s24  ;;  %v4523_v11 = vld [vmem:[#allocation15_spill] sm:$0xff] }
 0x146   : > { %831 = vrot.lane.b32.xlu1 %v4516_v34, %s2198_s24  ;;  %829 = vrot.lane.b32.xlu0 %v4517_v22, %s2198_s24 }
 0x147   : > { %v3054_v39 = vpop.permute.xlu2 %735 }
 0x148   : > { %4518 = vst [vmem:[#allocation12_spill] sm:$0xff] %v3054_v39  ;;  %v3056_v46 = vpop.permute.xlu1 %715  ;;  %v3058_v2 = vpop.permute.xlu0 %713  ;;  %v4527_v39 = vld [vmem:[#allocation23_spill] sm:$0xff] }
 0x149   : > { %4519 = vst [vmem:[#allocation111_spill] sm:$0xff] %v3056_v46 }
 0x14a   : > { %4520 = vst [vmem:[#allocation112_spill] sm:$0xff] %v3058_v2 }
 0x14d   : > { %839 = vrot.lane.b32.xlu2 %v4521_v41, %s2198_s24  ;;  %v4528_v41 = vld [vmem:[#allocation19_spill] sm:$0xff] }
 0x14e   : > { %837 = vrot.lane.b32.xlu1 %v4522_v5, %s2198_s24  ;;  %835 = vrot.lane.b32.xlu0 %v4523_v11, %s2198_s24  ;;  %v3085_v11 = vld [vmem:[%s2242_s20 + $0x190] sm:$0x3] }
 0x14f   : > { %v3066_v17 = vpop.permute.xlu2 %741 }
 0x150   : > { %4524 = vst [vmem:[#allocation113_spill] sm:$0xff] %v3066_v17  ;;  %v3068_v42 = vpop.permute.xlu1 %721  ;;  %v3070_v34 = vpop.permute.xlu0 %719 }
 0x151   : > { %4525 = vst [vmem:[#allocation114_spill] sm:$0xff] %v3068_v42  ;;  %v4530_v42 = vld [vmem:[#allocation27_spill] sm:$0xff] }
 0x152   : > { %4526 = vst [vmem:[#allocation115_spill] sm:$0xff] %v3070_v34  ;;  %v4531_v34 = vld [vmem:[#allocation22_spill] sm:$0xff] }
 0x155   : > { %845 = vrot.lane.b32.xlu2 %v4527_v39, %s2198_s24  ;;  %v485_v39 = vrot.slane %v3085_v11, 1 }
 0x156   : > { %843 = vrot.lane.b32.xlu1 %v2560_v58, %s2198_s24  ;;  %841 = vrot.lane.b32.xlu0 %v4528_v41, %s2198_s24  ;;  %v483_v41 = vrot.slane %v2959_v1, 1 }
 0x157   : > { %v3078_v46 = vpop.permute.xlu2 %747 }
 0x158   : > { %4529 = vst [vmem:[#allocation116_spill] sm:$0xff] %v3078_v46  ;;  %v3080_v5 = vpop.permute.xlu1 %727  ;;  %v3082_v2 = vpop.permute.xlu0 %725  ;;  %v482_v46 = vrot.slane %v2962_v61, 1 }
 0x15d   : > { %851 = vrot.lane.b32.xlu2 %v2584_v60, %s2198_s24  ;;  %v3103_v60 = vsel %vm317_vm0, %v483_v41, %v485_v39 }
 0x15e   : > { %849 = vrot.lane.b32.xlu1 %v4530_v42, %s2198_s24  ;;  %847 = vrot.lane.b32.xlu0 %v4531_v34, %s2198_s24  ;;  %4534 = vst [vmem:[#allocation119_spill] sm:$0xff] %v3103_v60  ;;  %v3106_v42 = vsel %vm317_vm0, %v482_v46, %v483_v41  ;;  %v4538_v46 = vld [vmem:[#allocation28_spill] sm:$0xff] }
 0x15f   : > { %v3093_v58 = vpop.permute.xlu2 %753  ;;  %4535 = vst [vmem:[#allocation120_spill] sm:$0xff] %v3106_v42 }
 0x160   : > { %4532 = vst [vmem:[#allocation117_spill] sm:$0xff] %v3093_v58  ;;  %v3098_v17 = vpop.permute.xlu1 %733  ;;  %v3100_v23 = vpop.permute.xlu0 %731 }
 0x161   : > { %4533 = vst [vmem:[#allocation118_spill] sm:$0xff] %v3100_v23 }
 0x165   : > { %889 = vrot.lane.b32.xlu2 %v2602_v10, %s2199_s25 }
 0x166   : > { %855 = vrot.lane.b32.xlu1 %v3103_v60, %s2198_s24  ;;  %853 = vrot.lane.b32.xlu0 %v3106_v42, %s2198_s24  ;;  %v4541_v60 = vld [vmem:[#allocation34_spill] sm:$0xff]  ;;  %s2109_s24 = sshll.u32 %s4709_s16, 8 }
 0x167   : > { %v3114_v34 = vpop.permute.xlu2 %759  ;;  %v4542_v42 = vld [vmem:[#allocation30_spill] sm:$0xff]  ;;  %s3994_s30 = scalar_lea.vmem %s4301_s2, %s2109_s24 }
 0x168   : > { %4536 = vst [vmem:[#allocation121_spill] sm:$0xff] %v3114_v34  ;;  %v3116_v58 = vpop.permute.xlu1 %739  ;;  %v3118_v23 = vpop.permute.xlu0 %737 }
 0x169   : > { %4537 = vst [vmem:[#allocation122_spill] sm:$0xff] %v3118_v23 }
 0x16d   : > { %895 = vrot.lane.b32.xlu2 %v2621_v9, %s2199_s25 }
 0x16e   : > { %893 = vrot.lane.b32.xlu1 %v2624_v47, %s2199_s25  ;;  %891 = vrot.lane.b32.xlu0 %v4538_v46, %s2199_s25 }
 0x16f   : > { %v3126_v10 = vpop.permute.xlu2 %797 }
 0x170   : > { %4539 = vst [vmem:[#allocation28_spill] sm:$0xff] %v3126_v10  ;;  %v3128_v39 = vpop.permute.xlu1 %745  ;;  %v3130_v41 = vpop.permute.xlu0 %743  ;;  %v4545_v10 = vld [vmem:[#allocation37_spill] sm:$0xff] }
 0x171   : > { %4540 = vst [vmem:[#allocation123_spill] sm:$0xff] %v3130_v41  ;;  %v4546_v41 = vld [vmem:[#allocation38_spill] sm:$0xff] }
 0x175   : > { %901 = vrot.lane.b32.xlu2 %v2642_v44, %s2199_s25  ;;  %v4547_v44 = vld [vmem:[#allocation32_spill] sm:$0xff] }
 0x176   : > { %899 = vrot.lane.b32.xlu1 %v4541_v60, %s2199_s25  ;;  %897 = vrot.lane.b32.xlu0 %v4542_v42, %s2199_s25 }
 0x177   : > { %v3138_v34 = vpop.permute.xlu2 %803 }
 0x178   : > { %4543 = vst [vmem:[#allocation34_spill] sm:$0xff] %v3138_v34  ;;  %v3140_v23 = vpop.permute.xlu1 %751  ;;  %v3142_v46 = vpop.permute.xlu0 %749  ;;  %v4551_v34 = vld [vmem:[#allocation36_spill] sm:$0xff] }
 0x179   : > { %4544 = vst [vmem:[#allocation30_spill] sm:$0xff] %v3142_v46 }
 0x17d   : > { %907 = vrot.lane.b32.xlu2 %v4545_v10, %s2199_s25 }
 0x17e   : > { %905 = vrot.lane.b32.xlu1 %v4546_v41, %s2199_s25  ;;  %903 = vrot.lane.b32.xlu0 %v4547_v44, %s2199_s25 }
 0x17f   : > { %v3150_v62 = vpop.permute.xlu2 %809 }
 0x180   : > { %4548 = vst [vmem:[#allocation124_spill] sm:$0xff] %v3150_v62  ;;  %v3152_v43 = vpop.permute.xlu1 %757  ;;  %v3154_v3 = vpop.permute.xlu0 %755  ;;  %v4555_v62 = vld [vmem:[#allocation49_spill] sm:$0xff] }
 0x181   : > { %4549 = vst [vmem:[#allocation125_spill] sm:$0xff] %v3152_v43 }
 0x182   : > { %4550 = vst [vmem:[#allocation126_spill] sm:$0xff] %v3154_v3  ;;  %v4556_v3 = vld [vmem:[#allocation42_spill] sm:$0xff] }
 0x185   : > { %913 = vrot.lane.b32.xlu2 %v2689_v59, %s2199_s25 }
 0x186   : > { %911 = vrot.lane.b32.xlu1 %v2692_v4, %s2199_s25  ;;  %909 = vrot.lane.b32.xlu0 %v4551_v34, %s2199_s25 }
 0x187   : > { %v3162_v10 = vpop.permute.xlu2 %815 }
 0x188   : > { %4552 = vst [vmem:[#allocation36_spill] sm:$0xff] %v3162_v10  ;;  %v3164_v41 = vpop.permute.xlu1 %795  ;;  %v3166_v46 = vpop.permute.xlu0 %793  ;;  %v4559_v10 = vld [vmem:[#allocation47_spill] sm:$0xff] }
 0x189   : > { %4553 = vst [vmem:[#allocation127_spill] sm:$0xff] %v3164_v41 }
 0x18a   : > { %4554 = vst [vmem:[#allocation128_spill] sm:$0xff] %v3166_v46 }
 0x18d   : > { %919 = vrot.lane.b32.xlu2 %v2715_v32, %s2199_s25 }
 0x18e   : > { %917 = vrot.lane.b32.xlu1 %v4555_v62, %s2199_s25  ;;  %915 = vrot.lane.b32.xlu0 %v4556_v3, %s2199_s25 }
 0x18f   : > { %v3174_v44 = vpop.permute.xlu2 %821 }
 0x190   : > { %v3176_v43 = vpop.permute.xlu1 %801  ;;  %v3178_v59 = vpop.permute.xlu0 %799 }
 0x191   : > { %4557 = vst [vmem:[#allocation129_spill] sm:$0xff] %v3176_v43  ;;  %v4562_v43 = vld [vmem:[#allocation60_spill] sm:$0xff] }
 0x192   : > { %4558 = vst [vmem:[#allocation130_spill] sm:$0xff] %v3178_v59  ;;  %v4563_v59 = vld [vmem:[#allocation53_spill] sm:$0xff] }
 0x195   : > { %925 = vrot.lane.b32.xlu2 %v2740_v7, %s2199_s25 }
 0x196   : > { %923 = vrot.lane.b32.xlu1 %v2743_v8, %s2199_s25  ;;  %921 = vrot.lane.b32.xlu0 %v4559_v10, %s2199_s25 }
 0x197   : > { %v3186_v32 = vpop.permute.xlu2 %827 }
 0x198   : > { %v3188_v62 = vpop.permute.xlu1 %807  ;;  %v3190_v41 = vpop.permute.xlu0 %805 }
 0x199   : > { %4560 = vst [vmem:[#allocation131_spill] sm:$0xff] %v3188_v62  ;;  %v4566_v62 = vld [vmem:[#allocation58_spill] sm:$0xff] }
 0x19a   : > { %4561 = vst [vmem:[#allocation132_spill] sm:$0xff] %v3190_v41 }
 0x19d   : > { %931 = vrot.lane.b32.xlu2 %v2766_v12, %s2199_s25 }
 0x19e   : > { %929 = vrot.lane.b32.xlu1 %v4562_v43, %s2199_s25  ;;  %927 = vrot.lane.b32.xlu0 %v4563_v59, %s2199_s25 }
 0x19f   : > { %v3198_v46 = vpop.permute.xlu2 %833 }
 0x1a0   : > { %v3200_v8 = vpop.permute.xlu1 %813  ;;  %v3202_v10 = vpop.permute.xlu0 %811 }
 0x1a1   : > { %4564 = vst [vmem:[#allocation53_spill] sm:$0xff] %v3200_v8  ;;  %v487_v8 = vrot.slane %v2962_v61, 2  ;;  %v490_v61 = vrot.slane %v3085_v11, 2 }
 0x1a2   : > { %4565 = vst [vmem:[#allocation133_spill] sm:$0xff] %v3202_v10  ;;  %v488_v10 = vrot.slane %v2959_v1, 2 }
 0x1a5   : > { %937 = vrot.lane.b32.xlu2 %v2791_v14, %s2199_s25  ;;  %v4568_v14 = vld [vmem:[#allocation64_spill] sm:$0xff] }
 0x1a6   : > { %935 = vrot.lane.b32.xlu1 %v2794_v27, %s2199_s25  ;;  %933 = vrot.lane.b32.xlu0 %v4566_v62, %s2199_s25 }
 0x1a7   : > { %v3210_v41 = vpop.permute.xlu2 %839 }
 0x1a8   : > { %v3212_v12 = vpop.permute.xlu1 %819  ;;  %v3214_v43 = vpop.permute.xlu0 %817 }
 0x1a9   : > { %4567 = vst [vmem:[#allocation134_spill] sm:$0xff] %v3214_v43  ;;  %v3229_v43 = vsel %vm398_vm1, %v487_v8, %v488_v10  ;;  %v3243_v8 = vsel %vm398_vm1, %v488_v10, %v490_v61  ;;  %v3258_v10 = vld [vmem:[%s2242_s20 + $0x38] sm:$0xff] }
 0x1aa   : > { %4569 = vst [vmem:[#allocation135_spill] sm:$0xff] %v3229_v43 }
 0x1ab   : > { %4570 = vst [vmem:[#allocation136_spill] sm:$0xff] %v3243_v8 }
 0x1ad   : > { %943 = vrot.lane.b32.xlu2 %v2817_v40, %s2199_s25 }
 0x1ae   : > { %941 = vrot.lane.b32.xlu1 %v2820_v51, %s2199_s25  ;;  %939 = vrot.lane.b32.xlu0 %v4568_v14, %s2199_s25 }
 0x1af   : > { %v3224_v27 = vpop.permute.xlu2 %845 }
 0x1b0   : > { %v3226_v62 = vpop.permute.xlu1 %825  ;;  %v824_v3 = vpop.permute.xlu0 %823 }
 0x1b5   : > { %949 = vrot.lane.b32.xlu2 %v3229_v43, %s2199_s25 }
 0x1b6   : > { %947 = vrot.lane.b32.xlu1 %v2836_v55, %s2199_s25  ;;  %945 = vrot.lane.b32.xlu0 %v2814_v38, %s2199_s25 }
 0x1b7   : > { %v3237_v1 = vpop.permute.xlu2 %851 }
 0x1b8   : > { %v3240_v14 = vpop.permute.xlu1 %831  ;;  %v830_v40 = vpop.permute.xlu0 %829 }
 0x1bd   : > { %1081 = vrot.lane.b32.xlu2 %v2272_v13, %s2200_s26 }
 0x1be   : > { %985 = vrot.lane.b32.xlu1 %v2245_v0, %s2201_s27  ;;  %951 = vrot.lane.b32.xlu0 %v3243_v8, %s2199_s25 }
 0x1bf   : > { %v3251_v43 = vpop.permute.xlu2 %889 }
 0x1c0   : > { %v3253_v11 = vpop.permute.xlu1 %837  ;;  %v836_v55 = vpop.permute.xlu0 %835 }
 0x1c5   : > { %1083 = vrot.lane.b32.xlu2 %v2293_v21, %s2200_s26 }
 0x1c6   : > { %987 = vrot.lane.b32.xlu1 %v3258_v10, %s2201_s27  ;;  %1177 = vrot.lane.b32.xlu0 %v2624_v47, %s2202_s28 }
 0x1c7   : > { %v3264_v0 = vpop.permute.xlu2 %895 }
 0x1c8   : > { %v3266_v13 = vpop.permute.xlu1 %843  ;;  %v3268_v61 = vpop.permute.xlu0 %841 }
 0x1cd   : > { %1001 = vrot.lane.b32.xlu2 %v2377_v52, %s2201_s27 }
 0x1ce   : > { %989 = vrot.lane.b32.xlu1 %v2312_v28, %s2201_s27  ;;  %1179 = vrot.lane.b32.xlu0 %v2621_v9, %s2202_s28 }
 0x1cf   : > { %v3276_v21 = vpop.permute.xlu2 %901 }
 0x1d0   : > { %4571 = vst [vmem:[#allocation137_spill] sm:$0xff] %v3276_v21  ;;  %v3278_v8 = vpop.permute.xlu1 %849  ;;  %v3280_v47 = vpop.permute.xlu0 %847  ;;  %v1289_v21 = vsel %vm1273_vm2, %v2368_v49, %v2811_v15 }
 0x1d5   : > { %1181 = vrot.lane.b32.xlu2 %v4542_v42, %s2202_s28 }
 0x1d6   : > { %1097 = vrot.lane.b32.xlu1 %v4499_v16, %s2200_s26  ;;  %1085 = vrot.lane.b32.xlu0 %v2331_v36, %s2200_s26 }
 0x1d7   : > { %v3288_v52 = vpop.permute.xlu2 %907 }
 0x1d8   : > { %v3290_v28 = vpop.permute.xlu1 %855  ;;  %v3292_v9 = vpop.permute.xlu0 %853 }
 0x1dd   : > { %1003 = vrot.lane.b32.xlu2 %v2371_v50, %s2201_s27  ;;  %v1322_v50 = vsel %vm1306_vm3, %v1289_v21, %v2904_v25 }
 0x1de   : > { %991 = vrot.lane.b32.xlu1 %v2306_v26, %s2201_s27  ;;  %1193 = vrot.lane.b32.xlu0 %v4551_v34, %s2202_s28  ;;  %v1355_v26 = vsel %vm1339_vm4, %v1322_v50, %v3080_v5  ;;  %v1292_v5 = vsel %vm1273_vm2, %v2443_v30, %v2833_v57 }
 0x1df   : > { %v3300_v42 = vpop.permute.xlu2 %913  ;;  %v1388_v34 = vsel %vm1372_vm5, %v1355_v26, %v824_v3  ;;  %v2156_v26 = vld [vmem:[%s2242_s20 + $0xa8] sm:$0xff] }
 0x1e0   : > { %v3302_v16 = vpop.permute.xlu1 %893  ;;  %v3304_v36 = vpop.permute.xlu0 %891 }
 0x1e5   : > { %1017 = vrot.lane.b32.xlu2 %v2431_v19, %s2201_s27 }
 0x1e6   : > { %1099 = vrot.lane.b32.xlu1 %v4498_v33, %s2200_s26  ;;  %1087 = vrot.lane.b32.xlu0 %v2328_v35, %s2200_s26  ;;  %v1325_v33 = vsel %vm1306_vm3, %v1292_v5, %v2916_v45  ;;  %v1295_v45 = vsel %vm1273_vm2, %v2434_v20, %v2848_v18  ;;  %v2157_v5 = vld [vmem:[%s2242_s20 + $0x98] sm:$0xff] }
 0x1e7   : > { %v920_v49 = vpop.permute.xlu2 %919  ;;  %v1358_v35 = vsel %vm1339_vm4, %v1325_v33, %v3098_v17 }
 0x1e8   : > { %v3320_v15 = vpop.permute.xlu1 %899  ;;  %v3323_v25 = vsel %vm1405_vm6, %v1388_v34, %v920_v49  ;;  %v3325_v19 = vpop.permute.xlu0 %897  ;;  %v1391_v3 = vsel %vm1372_vm5, %v1358_v35, %v830_v40  ;;  %v3358_v40 = vld [vmem:[%s2242_s20 + $0x60] sm:$0xff]  ;;  %v4572_v34 = vld [vmem:[#allocation44_spill] sm:$0xff] }
 0x1e9   : > { %v1288_v49 = vsel %vm1273_vm2, %v2156_v26, %v4572_v34  ;;  %v4578_v26 = vld [vmem:[#allocation92_spill] sm:$0xff] }
 0x1ea   : > { %v1321_v35 = vsel %vm1306_vm3, %v1288_v49, %v2942_v56  ;;  %v4579_v49 = vld [vmem:[#allocation17_spill] sm:$0xff] }
 0x1ed   : > { %1113 = vrot.lane.b32.xlu2 %v4517_v22, %s2200_s26 }
 0x1ee   : > { %1195 = vrot.lane.b32.xlu1 %v2692_v4, %s2202_s28  ;;  %1183 = vrot.lane.b32.xlu0 %v4541_v60, %s2202_s28  ;;  %v1328_v4 = vsel %vm1306_vm3, %v1295_v45, %v2928_v24  ;;  %v4574_v45 = vld [vmem:[#allocation79_spill] sm:$0xff] }
 0x1ef   : > { %v926_v21 = vpop.permute.xlu2 %925  ;;  %v1361_v60 = vsel %vm1339_vm4, %v1328_v4, %v3116_v58  ;;  %v1298_v58 = vsel %vm1273_vm2, %v2509_v6, %v2860_v53 }
 0x1f0   : > { %v3341_v50 = vpop.permute.xlu1 %905  ;;  %v3344_v30 = vsel %vm1405_vm6, %v1391_v3, %v926_v21  ;;  %v3346_v57 = vpop.permute.xlu0 %903  ;;  %v1394_v17 = vsel %vm1372_vm5, %v1361_v60, %v836_v55  ;;  %v1331_v33 = vsel %vm1306_vm3, %v1298_v58, %v2940_v54  ;;  %v1354_v54 = vsel %vm1339_vm4, %v1321_v35, %v3082_v2  ;;  %v3418_v60 = vld [vmem:[%s2242_s20 + $0xc8] sm:$0xff] }
 0x1f1   : > { %v1364_v53 = vsel %vm1339_vm4, %v1331_v33, %v3128_v39  ;;  %v1387_v39 = vsel %vm1372_vm5, %v1354_v54, %v3174_v44  ;;  %v4576_v44 = vld [vmem:[#allocation50_spill] sm:$0xff] }
 0x1f5   : > { %1005 = vrot.lane.b32.xlu2 %v2365_v48, %s2201_s27 }
 0x1f6   : > { %993 = vrot.lane.b32.xlu1 %v3358_v40, %s2201_s27  ;;  %1209 = vrot.lane.b32.xlu0 %v2740_v7, %s2202_s28  ;;  %v4573_v7 = vld [vmem:[#allocation62_spill] sm:$0xff] }
 0x1f7   : > { %v932_v18 = vpop.permute.xlu2 %931  ;;  %v1287_v55 = vsel %vm1273_vm2, %v2157_v5, %v4573_v7  ;;  %v4580_v5 = vld [vmem:[#allocation93_spill] sm:$0xff] }
 0x1f8   : > { %v3365_v22 = vpop.permute.xlu1 %911  ;;  %v3368_v24 = vsel %vm1405_vm6, %v1394_v17, %v932_v18  ;;  %v3370_v48 = vpop.permute.xlu0 %909  ;;  %v1320_v6 = vsel %vm1306_vm3, %v1287_v55, %v2944_v63  ;;  %v1397_v63 = vsel %vm1372_vm5, %v1364_v53, %v3268_v61  ;;  %v4575_v61 = vld [vmem:[#allocation18_spill] sm:$0xff]  ;;  %v4577_v18 = vld [vmem:[#allocation68_spill] sm:$0xff]  ;;  %v4583_v53 = vld [vmem:[#allocation33_spill] sm:$0xff] }
 0x1f9   : > { %v1301_v4 = vsel %vm1273_vm2, %v4575_v61, %v4574_v45  ;;  %v3424_v17 = vld [vmem:[%s2242_s20 + $0xc0] sm:$0xff] }
 0x1fa   : > { %v1290_v58 = vsel %vm1273_vm2, %v3424_v17, %v4577_v18  ;;  %v1334_v34 = vsel %vm1306_vm3, %v1301_v4, %v4578_v26  ;;  %v4581_v55 = vld [vmem:[#allocation94_spill] sm:$0xff]  ;;  %v4587_v18 = vld [vmem:[#allocation25_spill] sm:$0xff]  ;;  %v2160_v26 = vld [vmem:[%s2242_s20 + $0xf0] sm:$0xff] }
 0x1fb   : > { %v1323_v33 = vsel %vm1306_vm3, %v1290_v58, %v4581_v55  ;;  %v1367_v35 = vsel %vm1339_vm4, %v1334_v34, %v3140_v23  ;;  %v1545_v4 = vld [vmem:[%s4300_s1 + $0x40] sm:$0xff]  ;;  %v4588_v34 = vld [vmem:[#allocation55_spill] sm:$0xff] }
 0x1fc   : > { %1650 = vmatpush.msra.mxu0 %v1545_v4  ;;  %2110 = vmatpush.msra.mxu1 %v1545_v4 }
 0x1fd   : > { %1019 = vrot.lane.b32.xlu2 %v2434_v20, %s2201_s27  ;;  %v1353_v20 = vsel %vm1339_vm4, %v1320_v6, %v3030_v29  ;;  %v4582_v6 = vld [vmem:[#allocation43_spill] sm:$0xff]  ;;  %2111 = vmatpush.msra.mxu2 %v1545_v4 }
 0x1fe   : > { %1101 = vrot.lane.b32.xlu1 %v4506_v37, %s2200_s26  ;;  %1089 = vrot.lane.b32.xlu0 %v4494_v31, %s2200_s26  ;;  %v1386_v37 = vsel %vm1372_vm5, %v1353_v20, %v3212_v12  ;;  %v1291_v12 = vsel %vm1273_vm2, %v3418_v60, %v4576_v44  ;;  %v4584_v20 = vld [vmem:[#allocation108_spill] sm:$0xff] }
 0x1ff   : > { %v938_v56 = vpop.permute.xlu2 %937  ;;  %v1324_v7 = vsel %vm1306_vm3, %v1291_v12, %v4580_v5  ;;  %v1356_v54 = vsel %vm1339_vm4, %v1323_v33, %v4584_v20  ;;  %2112 = vmatpush.msra.mxu3 %v1545_v4  ;;  %v4586_v12 = vld [vmem:[#allocation82_spill] sm:$0xff]  ;;  %v4590_v33 = vld [vmem:[#allocation95_spill] sm:$0xff] }
 0x200   : > { %v918_v3 = vpop.permute.xlu1 %917  ;;  %v3406_v21 = vsel %vm1405_vm6, %v1397_v63, %v938_v56  ;;  %v916_v31 = vpop.permute.xlu0 %915  ;;  %v4585_v63 = vld [vmem:[#allocation118_spill] sm:$0xff]  ;;  %v1389_v23 = vsel %vm1372_vm5, %v1356_v54, %v3226_v62  ;;  %v1543_v62 = vld [vmem:[%s4300_s1 + $0x30] sm:$0xff]  ;;  %v1304_v58 = vsel %vm1273_vm2, %v4587_v18, %v4586_v12  ;;  %v4592_v54 = vld [vmem:[#allocation97_spill] sm:$0xff] }
 0x201   : > { %v3409_v29 = vsel %vm1405_vm6, %v1387_v39, %v918_v3  ;;  %v3412_v2 = vsel %vm1405_vm6, %v1386_v37, %v916_v31  ;;  %v1357_v56 = vsel %vm1339_vm4, %v1324_v7, %v4585_v63  ;;  %v1400_v39 = vsel %vm1372_vm5, %v1367_v35, %v3280_v47  ;;  %v3478_v5 = vld [vmem:[%s2242_s20 + $0xe0] sm:$0xff]  ;;  %v4589_v7 = vld [vmem:[#allocation71_spill] sm:$0xff] }
 0x202   : > { %v1390_v3 = vsel %vm1372_vm5, %v1357_v56, %v3186_v32  ;;  %v1544_v32 = vld [vmem:[%s4300_s1 + $0x38] sm:$0xff]  ;;  %v1293_v55 = vsel %vm1273_vm2, %v3478_v5, %v4589_v7  ;;  %v1337_v35 = vsel %vm1306_vm3, %v1304_v58, %v4590_v33  ;;  %v1539_v7 = vld [vmem:[%s4300_s1 + $0x10] sm:$0xff] }
 0x203   : > { %1651 = vmatpush.msra.mxu0 %v1544_v32  ;;  %2113 = vmatpush.msra.mxu1 %v1544_v32  ;;  %v1326_v63 = vsel %vm1306_vm3, %v1293_v55, %v4592_v54  ;;  %v4593_v56 = vld [vmem:[#allocation125_spill] sm:$0xff] }
 0x204   : > { %2114 = vmatpush.msra.mxu2 %v1544_v32  ;;  %2115 = vmatpush.msra.mxu3 %v1544_v32  ;;  %v4596_v55 = vld [vmem:[#allocation61_spill] sm:$0xff] }
 0x205   : > { %1115 = vrot.lane.b32.xlu2 %v4579_v49, %s2200_s26  ;;  %v1294_v49 = vsel %vm1273_vm2, %v2160_v26, %v4588_v34  ;;  %1652 = vmatpush.msra.mxu0 %v1543_v62 }
 0x206   : > { %1197 = vrot.lane.b32.xlu1 %v4582_v6, %s2202_s28  ;;  %1185 = vrot.lane.b32.xlu0 %v4583_v53, %s2202_s28  ;;  %v2162_v6 = vld [vmem:[%s2242_s20 + $0xb0] sm:$0xff] }
 0x207   : > { %v944_v37 = vpop.permute.xlu2 %943  ;;  %v4591_v53 = vld [vmem:[#allocation96_spill] sm:$0xff]  ;;  %2116 = vmatpush.msra.mxu1 %v1543_v62  ;;  %2117 = vmatpush.msra.mxu2 %v1543_v62 }
 0x208   : > { %v924_v31 = vpop.permute.xlu1 %923  ;;  %v3454_v45 = vsel %vm1405_vm6, %v1400_v39, %v944_v37  ;;  %v922_v61 = vpop.permute.xlu0 %921  ;;  %v1327_v20 = vsel %vm1306_vm3, %v1294_v49, %v4591_v53  ;;  %v1370_v39 = vsel %vm1339_vm4, %v1337_v35, %v4593_v56  ;;  %v3494_v37 = vld [vmem:[%s2242_s20 + $0x68] sm:$0xff]  ;;  %v1541_v49 = vld [vmem:[%s4300_s1 + $0x20] sm:$0xff]  ;;  %2118 = vmatpush.msra.mxu3 %v1543_v62  ;;  %v3532_v62 = vld [vmem:[%s2242_s20 + $0x110] sm:$0xff] }
 0x209   : > { %v3460_v47 = vsel %vm1405_vm6, %v1390_v3, %v924_v31  ;;  %v3463_v44 = vsel %vm1405_vm6, %v1389_v23, %v922_v61  ;;  %v1542_v3 = vld [vmem:[%s4300_s1 + $0x28] sm:$0xff]  ;;  %v4594_v23 = vld [vmem:[#allocation12_spill] sm:$0xff]  ;;  %v4595_v61 = vld [vmem:[#allocation122_spill] sm:$0xff]  ;;  %v1403_v32 = vsel %vm1372_vm5, %v1370_v39, %v3292_v9  ;;  %v1297_v33 = vsel %vm1273_vm2, %v3532_v62, %v4596_v55 }
 0x20a   : > { %v1359_v31 = vsel %vm1339_vm4, %v1326_v63, %v4594_v23  ;;  %v1360_v4 = vsel %vm1339_vm4, %v1327_v20, %v4595_v61  ;;  %1653 = vmatpush.msra.mxu0 %v1542_v3  ;;  %2119 = vmatpush.msra.mxu1 %v1542_v3  ;;  %v2165_v35 = vld [vmem:[%s2242_s20 + $0x108] sm:$0xff]  ;;  %v4599_v63 = vld [vmem:[#allocation100_spill] sm:$0xff] }
 0x20b   : > { %v1393_v18 = vsel %vm1372_vm5, %v1360_v4, %v3198_v46  ;;  %2120 = vmatpush.msra.mxu2 %v1542_v3  ;;  %2121 = vmatpush.msra.mxu3 %v1542_v3  ;;  %v4598_v20 = vld [vmem:[#allocation99_spill] sm:$0xff]  ;;  %v4601_v3 = vld [vmem:[#allocation5_spill] sm:$0xff] }
 0x20c   : > { %1654 = vmatpush.msra.mxu0 %v1541_v49  ;;  %2122 = vmatpush.msra.mxu1 %v1541_v49  ;;  %v1330_v54 = vsel %vm1306_vm3, %v1297_v33, %v4598_v20  ;;  %v4600_v39 = vld [vmem:[#allocation11_spill] sm:$0xff]  ;;  %v4606_v20 = vld [vmem:[#allocation42_spill] sm:$0xff] }
 0x20d   : > { %1007 = vrot.lane.b32.xlu2 %v2162_v6, %s2201_s27  ;;  %2123 = vmatpush.msra.mxu2 %v1541_v49  ;;  %v4597_v6 = vld [vmem:[#allocation74_spill] sm:$0xff]  ;;  %v1538_v23 = vld [vmem:[%s4300_s1 + $0x8] sm:$0xff] }
 0x20e   : > { %995 = vrot.lane.b32.xlu1 %v3494_v37, %s2201_s27  ;;  %1211 = vrot.lane.b32.xlu0 %v4563_v59, %s2202_s28  ;;  %v1392_v59 = vsel %vm1372_vm5, %v1359_v31, %v3240_v14  ;;  %v1540_v14 = vld [vmem:[%s4300_s1 + $0x18] sm:$0xff]  ;;  %v1296_v53 = vsel %vm1273_vm2, %v2165_v35, %v4597_v6  ;;  %v4603_v4 = vld [vmem:[#allocation123_spill] sm:$0xff]  ;;  %v4605_v6 = vld [vmem:[#allocation76_spill] sm:$0xff] }
 0x20f   : > { %v950_v12 = vpop.permute.xlu2 %949  ;;  %1655 = vmatpush.msra.mxu0 %v1540_v14  ;;  %2124 = vmatpush.msra.mxu3 %v1541_v49  ;;  %v1329_v56 = vsel %vm1306_vm3, %v1296_v53, %v4599_v63  ;;  %v4602_v31 = vld [vmem:[#allocation113_spill] sm:$0xff]  ;;  %v1537_v49 = vld [vmem:[%s4300_s1] sm:$0xff]  ;;  %v4608_v63 = vld [vmem:[#allocation103_spill] sm:$0xff] }
 0x210   : > { %v930_v58 = vpop.permute.xlu1 %929  ;;  %v3514_v26 = vsel %vm1405_vm6, %v1403_v32, %v950_v12  ;;  %v928_v34 = vpop.permute.xlu0 %927  ;;  %v1362_v61 = vsel %vm1339_vm4, %v1329_v56, %v4602_v31  ;;  %v1363_v32 = vsel %vm1339_vm4, %v1330_v54, %v4603_v4  ;;  %2125 = vmatpush.msra.mxu1 %v1540_v14  ;;  %2126 = vmatpush.msra.mxu2 %v1540_v14 }
 0x211   : > { %v3520_v9 = vsel %vm1405_vm6, %v1393_v18, %v930_v58  ;;  %v3523_v46 = vsel %vm1405_vm6, %v1392_v59, %v928_v34  ;;  %1656 = vmatpush.msra.mxu0 %v1539_v7  ;;  %v1396_v18 = vsel %vm1372_vm5, %v1363_v32, %v3210_v41  ;;  %v1395_v59 = vsel %vm1372_vm5, %v1362_v61, %v3253_v11  ;;  %v3572_v41 = vld [vmem:[%s2242_s20 + $0x138] sm:$0xff]  ;;  %v4604_v11 = vld [vmem:[#allocation67_spill] sm:$0xff]  ;;  %v4611_v61 = vld [vmem:[#allocation30_spill] sm:$0xff] }
 0x212   : > { %2127 = vmatpush.msra.mxu3 %v1540_v14  ;;  %2128 = vmatpush.msra.mxu1 %v1539_v7  ;;  %v1300_v14 = vsel %vm1273_vm2, %v3572_v41, %v4604_v11 }
 0x213   : > { %1657 = vmatpush.msra.mxu0 %v1538_v23  ;;  %2129 = vmatpush.msra.mxu2 %v1539_v7 }
 0x214   : > { %2130 = vmatpush.msra.mxu3 %v1539_v7  ;;  %2131 = vmatpush.msra.mxu1 %v1538_v23  ;;  %v4607_v7 = vld [vmem:[#allocation102_spill] sm:$0xff] }
 0x215   : > { %1021 = vrot.lane.b32.xlu2 %v2165_v35, %s2201_s27  ;;  %1658 = vmatpush.msra.mxu0 %v1537_v49  ;;  %v3578_v35 = vld [vmem:[%s2242_s20 + $0x128] sm:$0xff]  ;;  %v1333_v54 = vsel %vm1306_vm3, %v1300_v14, %v4607_v7  ;;  %v4613_v7 = vld [vmem:[#allocation78_spill] sm:$0xff] }
 0x216   : > { %1103 = vrot.lane.b32.xlu1 %v4600_v39, %s2200_s26  ;;  %1091 = vrot.lane.b32.xlu0 %v4601_v3, %s2200_s26  ;;  %v1299_v53 = vsel %vm1273_vm2, %v3578_v35, %v4605_v6  ;;  %v4609_v39 = vld [vmem:[#allocation32_spill] sm:$0xff]  ;;  %v1366_v4 = vsel %vm1339_vm4, %v1333_v54, %v4611_v61  ;;  %v2169_v6 = vld [vmem:[%s2242_s20 + $0x158] sm:$0xff] }
 0x217   : > { %v3556_v12 = vpop.permute.xlu2 %1081  ;;  %2132 = vmatpush.msra.mxu2 %v1538_v23  ;;  %2133 = vmatpush.msra.mxu3 %v1538_v23  ;;  %v1332_v56 = vsel %vm1306_vm3, %v1299_v53, %v4608_v63  ;;  %v2168_v3 = vld [vmem:[%s2242_s20 + $0x150] sm:$0xff]  ;;  %v4612_v53 = vld [vmem:[#allocation70_spill] sm:$0xff]  ;;  %v4616_v63 = vld [vmem:[#allocation105_spill] sm:$0xff] }
 0x218   : > { %v936_v58 = vpop.permute.xlu1 %935  ;;  %v934_v34 = vpop.permute.xlu0 %933  ;;  %2134 = vmatpush.msra.mxu1 %v1537_v49  ;;  %v4610_v23 = vld [vmem:[#allocation116_spill] sm:$0xff] }
 0x219   : > { %v3566_v55 = vsel %vm1405_vm6, %v1396_v18, %v936_v58  ;;  %v3569_v33 = vsel %vm1405_vm6, %v1395_v59, %v934_v34  ;;  %v1365_v31 = vsel %vm1339_vm4, %v1332_v56, %v4610_v23  ;;  %2135 = vmatpush.msra.mxu2 %v1537_v49  ;;  %2136 = vmatpush.msra.mxu3 %v1537_v49  ;;  %v4618_v23 = vld [vmem:[#allocation16_spill] sm:$0xff] }
 0x21a   : > { %v1399_v18 = vsel %vm1372_vm5, %v1366_v4, %v3224_v27  ;;  %v1398_v59 = vsel %vm1372_vm5, %v1365_v31, %v3266_v13  ;;  %v1302_v49 = vsel %vm1273_vm2, %v2168_v3, %v4613_v7  ;;  %v4614_v27 = vld [vmem:[#allocation60_spill] sm:$0xff]  ;;  %v4619_v31 = vld [vmem:[#allocation117_spill] sm:$0xff] }
 0x21b   : > { %v4615_v13 = vld [vmem:[#allocation104_spill] sm:$0xff]  ;;  %v1335_v56 = vsel %vm1306_vm3, %v1302_v49, %v4616_v63  ;;  %v4623_v63 = vld [vmem:[#allocation121_spill] sm:$0xff] }
 0x21c   : > { %v1368_v61 = vsel %vm1339_vm4, %v1335_v56, %v4619_v31  ;;  %v3641_v49 = vld [vmem:[%s2242_s20 + $0x170] sm:$0xff]  ;;  %v4624_v31 = vld [vmem:[#allocation41_spill] sm:$0xff] }
 0x21d   : > { %1199 = vrot.lane.b32.xlu2 %v4606_v20, %s2202_s28  ;;  %v1303_v20 = vsel %vm1273_vm2, %v2169_v6, %v4612_v53 }
 0x21e   : > { %1187 = vrot.lane.b32.xlu1 %v4609_v39, %s2202_s28  ;;  %1033 = vrot.lane.b32.xlu0 %v2168_v3, %s2201_s27  ;;  %v1336_v54 = vsel %vm1306_vm3, %v1303_v20, %v4615_v13  ;;  %v4617_v39 = vld [vmem:[#allocation23_spill] sm:$0xff]  ;;  %v4620_v3 = vld [vmem:[#allocation126_spill] sm:$0xff] }
 0x21f   : > { %v3597_v32 = vpop.permute.xlu2 %1083  ;;  %v1369_v4 = vsel %vm1339_vm4, %v1336_v54, %v4620_v3  ;;  %v3651_v54 = vld [vmem:[%s2242_s20 + $0x78] sm:$0xff] }
 0x220   : > { %v942_v58 = vpop.permute.xlu1 %941  ;;  %v940_v34 = vpop.permute.xlu0 %939 }
 0x221   : > { %v3604_v11 = vsel %vm1405_vm6, %v1399_v18, %v942_v58  ;;  %v3607_v14 = vsel %vm1405_vm6, %v1398_v59, %v940_v34  ;;  %v1402_v59 = vsel %vm1372_vm5, %v1369_v4, %v3237_v1  ;;  %v1401_v58 = vsel %vm1372_vm5, %v1368_v61, %v3278_v8  ;;  %v4622_v1 = vld [vmem:[#allocation106_spill] sm:$0xff] }
 0x225   : > { %1213 = vrot.lane.b32.xlu2 %v4614_v27, %s2202_s28  ;;  %v4621_v27 = vld [vmem:[#allocation81_spill] sm:$0xff] }
 0x226   : > { %1129 = vrot.lane.b32.xlu1 %v4617_v39, %s2200_s26  ;;  %1117 = vrot.lane.b32.xlu0 %v4618_v23, %s2200_s26  ;;  %v1305_v13 = vsel %vm1273_vm2, %v3641_v49, %v4621_v27  ;;  %v2172_v23 = vld [vmem:[%s2242_s20] sm:$0xff]  ;;  %v4627_v27 = vld [vmem:[#allocation128_spill] sm:$0xff] }
 0x227   : > { %v3628_v18 = vpop.permute.xlu2 %1001  ;;  %v1338_v8 = vsel %vm1306_vm3, %v1305_v13, %v4622_v1  ;;  %v1274_v61 = vsel %vm1273_vm2, %v2172_v23, %v4624_v31  ;;  %v2173_v23 = vld [vmem:[%s2242_s20 + $0x8] sm:$0xff]  ;;  %v4630_v31 = vld [vmem:[#allocation46_spill] sm:$0xff] }
 0x228   : > { %v948_v34 = vpop.permute.xlu1 %947  ;;  %v946_v53 = vpop.permute.xlu0 %945  ;;  %v1371_v56 = vsel %vm1339_vm4, %v1338_v8, %v4623_v63  ;;  %v4628_v8 = vld [vmem:[#allocation10_spill] sm:$0xff]  ;;  %v4629_v63 = vld [vmem:[#allocation4_spill] sm:$0xff] }
 0x229   : > { %v3635_v20 = vsel %vm1405_vm6, %v1402_v59, %v948_v34  ;;  %v3638_v7 = vsel %vm1405_vm6, %v1401_v58, %v946_v53  ;;  %v4625_v59 = vld [vmem:[#allocation73_spill] sm:$0xff] }
 0x22a   : > { %v1307_v58 = vsel %vm1306_vm3, %v1274_v61, %v4625_v59 }
 0x22d   : > { %1009 = vrot.lane.b32.xlu2 %v3424_v17, %s2201_s27  ;;  %v1404_v17 = vsel %vm1372_vm5, %v1371_v56, %v3290_v28 }
 0x22e   : > { %997 = vrot.lane.b32.xlu1 %v3651_v54, %s2201_s27  ;;  %1225 = vrot.lane.b32.xlu0 %v2820_v51, %s2202_s28  ;;  %v4626_v51 = vld [vmem:[#allocation8_spill] sm:$0xff] }
 0x22f   : > { %v1182_v39 = vpop.permute.xlu2 %1181  ;;  %v1340_v53 = vsel %vm1339_vm4, %v1307_v58, %v4626_v51  ;;  %v4632_v58 = vld [vmem:[#allocation98_spill] sm:$0xff] }
 0x230   : > { %v986_v3 = vpop.permute.xlu1 %985  ;;  %v952_v4 = vpop.permute.xlu0 %951  ;;  %v1373_v13 = vsel %vm1372_vm5, %v1340_v53, %v4627_v27  ;;  %v4633_v53 = vld [vmem:[#allocation127_spill] sm:$0xff] }
 0x231   : > { %v3667_v34 = vsel %vm1405_vm6, %v1404_v17, %v952_v4  ;;  %v1406_v1 = vsel %vm1405_vm6, %v1373_v13, %v3251_v43  ;;  %v1275_v43 = vsel %vm1273_vm2, %v2173_v23, %v4630_v31 }
 0x232   : > { %v1439_v28 = vsel %vm1438_vm7, %v1406_v1, %v986_v3  ;;  %v4631_v3 = vld [vmem:[#allocation85_spill] sm:$0xff] }
 0x233   : > { %v1308_v4 = vsel %vm1306_vm3, %v1275_v43, %v4631_v3 }
 0x234   : > { %v1341_v51 = vsel %vm1339_vm4, %v1308_v4, %v4632_v58  ;;  %v4638_v4 = vld [vmem:[#allocation107_spill] sm:$0xff]  ;;  %v4640_v58 = vld [vmem:[#allocation28_spill] sm:$0xff] }
 0x235   : > { %1023 = vrot.lane.b32.xlu2 %v3532_v62, %s2201_s27  ;;  %v1472_v62 = vsel %vm1471_vm8, %v1439_v28, %v3556_v12  ;;  %v1374_v27 = vsel %vm1372_vm5, %v1341_v51, %v4633_v53  ;;  %v4634_v12 = vld [vmem:[#allocation49_spill] sm:$0xff]  ;;  %v4635_v28 = vld [vmem:[#allocation38_spill] sm:$0xff]  ;;  %v4642_v53 = vld [vmem:[#allocation15_spill] sm:$0xff] }
 0x236   : > { %1105 = vrot.lane.b32.xlu1 %v4628_v8, %s2200_s26  ;;  %1093 = vrot.lane.b32.xlu0 %v4629_v63, %s2200_s26  ;;  %v1407_v13 = vsel %vm1405_vm6, %v1374_v27, %v3304_v36  ;;  %v2174_v36 = vld [vmem:[%s2242_s20 + $0x18] sm:$0xff]  ;;  %v4641_v51 = vld [vmem:[#allocation22_spill] sm:$0xff] }
 0x237   : > { %v3682_v56 = vpop.permute.xlu2 %1003 }
 0x238   : > { %v988_v61 = vpop.permute.xlu1 %987  ;;  %v1178_v17 = vpop.permute.xlu0 %1177 }
 0x239   : > { %v1505_v59 = vsel %vm1504_vm9, %v1472_v62, %v1178_v17  ;;  %v1440_v1 = vsel %vm1438_vm7, %v1407_v13, %v988_v61  ;;  %v4636_v61 = vld [vmem:[#allocation40_spill] sm:$0xff] }
 0x23a   : > { %2075 = vmatmul.msk.f32.vlgmr.msra.gmra.mxu0 %vm1546_vm10, %v1505_v59  ;;  %v1473_v31 = vsel %vm1471_vm8, %v1440_v1, %v3597_v32  ;;  %v1276_v17 = vsel %vm1273_vm2, %v2174_v36, %v4636_v61  ;;  %v4637_v62 = vld [vmem:[#allocation84_spill] sm:$0xff]  ;;  %v4639_v59 = vld [vmem:[#allocation59_spill] sm:$0xff] }
 0x23b   : > { %v1309_v3 = vsel %vm1306_vm3, %v1276_v17, %v4637_v62  ;;  %v4644_v61 = vld [vmem:[#allocation88_spill] sm:$0xff] }
 0x23d   : > { %1201 = vrot.lane.b32.xlu2 %v4634_v12, %s2202_s28 }
 0x23e   : > { %1189 = vrot.lane.b32.xlu1 %v4635_v28, %s2202_s28  ;;  %1035 = vrot.lane.b32.xlu0 %v2169_v6, %s2201_s27  ;;  %v1342_v6 = vsel %vm1339_vm4, %v1309_v3, %v4638_v4  ;;  %v3746_v4 = vld [vmem:[%s2242_s20 + $0x80] sm:$0xff] }
 0x23f   : > { %v3705_v8 = vpop.permute.xlu2 %1017  ;;  %v1375_v32 = vsel %vm1372_vm5, %v1342_v6, %v4640_v58 }
 0x240   : > { %v990_v63 = vpop.permute.xlu1 %989  ;;  %v1180_v23 = vpop.permute.xlu0 %1179  ;;  %v1408_v27 = vsel %vm1405_vm6, %v1375_v32, %v3302_v16  ;;  %v4645_v16 = vld [vmem:[#allocation112_spill] sm:$0xff] }
 0x241   : > { %v1506_v43 = vsel %vm1504_vm9, %v1473_v31, %v1180_v23  ;;  %v1441_v1 = vsel %vm1438_vm7, %v1408_v27, %v990_v63  ;;  %v4643_v31 = vld [vmem:[#allocation35_spill] sm:$0xff]  ;;  %v4646_v63 = vld [vmem:[#allocation124_spill] sm:$0xff] }
 0x242   : > { %2076 = vmatmul.msk.f32.gmra.mxu0 %vm1546_vm10, %v1506_v43  ;;  %v1282_v43 = vsel %vm1273_vm2, %v3358_v40, %v4643_v31  ;;  %v4649_v27 = vld [vmem:[#allocation3_spill] sm:$0xff] }
 0x243   : > { %v1315_v17 = vsel %vm1306_vm3, %v1282_v43, %v4644_v61  ;;  %v4651_v43 = vld [vmem:[#allocation57_spill] sm:$0xff]  ;;  %v4652_v61 = vld [vmem:[#allocation75_spill] sm:$0xff] }
 0x244   : > { %v1348_v62 = vsel %vm1339_vm4, %v1315_v17, %v4645_v16  ;;  %v4653_v16 = vld [vmem:[#allocation80_spill] sm:$0xff] }
 0x245   : > { %1215 = vrot.lane.b32.xlu2 %v4639_v59, %s2202_s28  ;;  %v1381_v3 = vsel %vm1372_vm5, %v1348_v62, %v4646_v63  ;;  %v4654_v63 = vld [vmem:[#allocation6_spill] sm:$0xff] }
 0x246   : > { %1131 = vrot.lane.b32.xlu1 %v4641_v51, %s2200_s26  ;;  %1119 = vrot.lane.b32.xlu0 %v4642_v53, %s2200_s26  ;;  %v1414_v40 = vsel %vm1405_vm6, %v1381_v3, %v3341_v50  ;;  %v2176_v51 = vld [vmem:[%s2242_s20 + $0x120] sm:$0xff]  ;;  %v4648_v53 = vld [vmem:[#allocation9_spill] sm:$0xff] }
 0x247   : > { %v1114_v13 = vpop.permute.xlu2 %1113  ;;  %v1447_v6 = vsel %vm1438_vm7, %v1414_v40, %v3628_v18  ;;  %v4655_v40 = vld [vmem:[#allocation111_spill] sm:$0xff] }
 0x248   : > { %v1098_v12 = vpop.permute.xlu1 %1097  ;;  %v1086_v28 = vpop.permute.xlu0 %1085 }
 0x249   : > { %v1474_v23 = vsel %vm1471_vm8, %v1441_v1, %v1086_v28  ;;  %v1480_v58 = vsel %vm1471_vm8, %v1447_v6, %v1098_v12  ;;  %v2177_v28 = vld [vmem:[%s2242_s20 + $0x20] sm:$0xff] }
 0x24a   : > { %v1507_v36 = vsel %vm1504_vm9, %v1474_v23, %v1182_v39  ;;  %v4647_v39 = vld [vmem:[#allocation69_spill] sm:$0xff]  ;;  %v4656_v6 = vld [vmem:[#allocation130_spill] sm:$0xff] }
 0x24b   : > { %2077 = vmatmul.msk.f32.gmra.mxu0 %vm1546_vm10, %v1507_v36  ;;  %v4650_v23 = vld [vmem:[#allocation45_spill] sm:$0xff]  ;;  %v1283_v36 = vsel %vm1273_vm2, %v3494_v37, %v4651_v43  ;;  %v4658_v37 = vld [vmem:[#allocation48_spill] sm:$0xff] }
 0x24c   : > { %v1277_v31 = vsel %vm1273_vm2, %v2177_v28, %v4650_v23  ;;  %v1316_v62 = vsel %vm1306_vm3, %v1283_v36, %v4653_v16  ;;  %v2178_v28 = vld [vmem:[%s2242_s20 + $0x168] sm:$0xff] }
 0x24d   : > { %1011 = vrot.lane.b32.xlu2 %v3418_v60, %s2201_s27  ;;  %v1310_v17 = vsel %vm1306_vm3, %v1277_v31, %v4652_v61 }
 0x24e   : > { %999 = vrot.lane.b32.xlu1 %v3746_v4, %s2201_s27  ;;  %1227 = vrot.lane.b32.xlu0 %v4647_v39, %s2202_s28  ;;  %v1343_v3 = vsel %vm1339_vm4, %v1310_v17, %v4654_v63  ;;  %v1349_v39 = vsel %vm1339_vm4, %v1316_v62, %v4655_v40 }
 0x24f   : > { %v3754_v59 = vpop.permute.xlu2 %1005 }
 0x250   : > { %v992_v60 = vpop.permute.xlu1 %991  ;;  %v1194_v32 = vpop.permute.xlu0 %1193 }
 0x251   : > { %v1513_v50 = vsel %vm1504_vm9, %v1480_v58, %v1194_v32  ;;  %v1376_v58 = vsel %vm1372_vm5, %v1343_v3, %v4656_v6  ;;  %v4657_v32 = vld [vmem:[#allocation133_spill] sm:$0xff]  ;;  %v4663_v6 = vld [vmem:[#allocation14_spill] sm:$0xff] }
 0x252   : > { %2083 = vmatmul.msk.f32.vlgmr.msra.gmra.mxu1 %vm1546_vm10, %v1513_v50  ;;  %v1382_v50 = vsel %vm1372_vm5, %v1349_v39, %v4657_v32 }
 0x255   : > { %1025 = vrot.lane.b32.xlu2 %v2176_v51, %s2201_s27  ;;  %v1409_v51 = vsel %vm1405_vm6, %v1376_v58, %v3264_v0  ;;  %v2179_v58 = vld [vmem:[%s2242_s20 + $0xd8] sm:$0xff] }
 0x256   : > { %1107 = vrot.lane.b32.xlu1 %v4648_v53, %s2200_s26  ;;  %1095 = vrot.lane.b32.xlu0 %v4649_v27, %s2200_s26  ;;  %v1415_v53 = vsel %vm1405_vm6, %v1382_v50, %v3288_v52  ;;  %v4659_v27 = vld [vmem:[#allocation37_spill] sm:$0xff]  ;;  %v1442_v31 = vsel %vm1438_vm7, %v1409_v51, %v992_v60  ;;  %v4661_v60 = vld [vmem:[#allocation27_spill] sm:$0xff]  ;;  %v4665_v51 = vld [vmem:[#allocation56_spill] sm:$0xff] }
 0x257   : > { %v3765_v18 = vpop.permute.xlu2 %1019  ;;  %v1448_v23 = vsel %vm1438_vm7, %v1415_v53, %v3682_v56  ;;  %v4660_v56 = vld [vmem:[#allocation58_spill] sm:$0xff]  ;;  %v4664_v50 = vld [vmem:[#allocation29_spill] sm:$0xff]  ;;  %v1284_v53 = vsel %vm1273_vm2, %v3651_v54, %v4665_v51  ;;  %v4672_v54 = vld [vmem:[#allocation47_spill] sm:$0xff] }
 0x258   : > { %v1100_v1 = vpop.permute.xlu1 %1099  ;;  %v1088_v12 = vpop.permute.xlu0 %1087 }
 0x259   : > { %v1481_v36 = vsel %vm1471_vm8, %v1448_v23, %v1100_v1  ;;  %v1475_v61 = vsel %vm1471_vm8, %v1442_v31, %v1088_v12  ;;  %v4662_v1 = vld [vmem:[#allocation21_spill] sm:$0xff]  ;;  %v1455_v12 = vsel %vm1438_vm7, %v3463_v44, %v3705_v8  ;;  %v4667_v23 = vld [vmem:[#allocation91_spill] sm:$0xff] }
 0x25a   : > { %v1488_v63 = vsel %vm1471_vm8, %v1455_v12, %v1114_v13  ;;  %v2180_v13 = vld [vmem:[%s2242_s20 + $0x30] sm:$0xff]  ;;  %v1317_v31 = vsel %vm1306_vm3, %v1284_v53, %v4667_v23  ;;  %v4676_v53 = vld [vmem:[#allocation39_spill] sm:$0xff] }
 0x25d   : > { %1203 = vrot.lane.b32.xlu2 %v4658_v37, %s2202_s28  ;;  %v1278_v37 = vsel %vm1273_vm2, %v2180_v13, %v4664_v50 }
 0x25e   : > { %1191 = vrot.lane.b32.xlu1 %v4659_v27, %s2202_s28  ;;  %1037 = vrot.lane.b32.xlu0 %v2178_v28, %s2201_s27  ;;  %v4666_v27 = vld [vmem:[#allocation87_spill] sm:$0xff] }
 0x25f   : > { %v1116_v43 = vpop.permute.xlu2 %1115  ;;  %v1311_v28 = vsel %vm1306_vm3, %v1278_v37, %v4666_v27  ;;  %v1285_v27 = vsel %vm1273_vm2, %v3746_v4, %v4676_v53  ;;  %v2182_v53 = vld [vmem:[%s2242_s20 + $0x188] sm:$0xff] }
 0x260   : > { %v1196_v0 = vpop.permute.xlu1 %1195  ;;  %v1184_v17 = vpop.permute.xlu0 %1183 }
 0x261   : > { %v1508_v52 = vsel %vm1504_vm9, %v1475_v61, %v1184_v17  ;;  %v1514_v16 = vsel %vm1504_vm9, %v1481_v36, %v1196_v0  ;;  %v4668_v36 = vld [vmem:[#allocation101_spill] sm:$0xff]  ;;  %v4669_v61 = vld [vmem:[#allocation7_spill] sm:$0xff] }
 0x262   : > { %2078 = vmatmul.msk.f32.gmra.mxu0 %vm1546_vm10, %v1508_v52  ;;  %2084 = vmatmul.msk.f32.gmra.mxu1 %vm1546_vm10, %v1514_v16  ;;  %v1350_v0 = vsel %vm1339_vm4, %v1317_v31, %v4669_v61  ;;  %v4670_v17 = vld [vmem:[#allocation129_spill] sm:$0xff]  ;;  %v4678_v31 = vld [vmem:[#allocation115_spill] sm:$0xff] }
 0x263   : > { %v4671_v16 = vld [vmem:[#allocation53_spill] sm:$0xff] }
 0x265   : > { %1217 = vrot.lane.b32.xlu2 %v4660_v56, %s2202_s28  ;;  %v1383_v56 = vsel %vm1372_vm5, %v1350_v0, %v4671_v16 }
 0x266   : > { %1133 = vrot.lane.b32.xlu1 %v4661_v60, %s2200_s26  ;;  %1121 = vrot.lane.b32.xlu0 %v4662_v1, %s2200_s26  ;;  %v1416_v1 = vsel %vm1405_vm6, %v1383_v56, %v3370_v48  ;;  %v4682_v56 = vld [vmem:[#allocation31_spill] sm:$0xff] }
 0x267   : > { %v1008_v62 = vpop.permute.xlu2 %1007  ;;  %v1449_v12 = vsel %vm1438_vm7, %v1416_v1, %v3754_v59  ;;  %v4675_v59 = vld [vmem:[#allocation20_spill] sm:$0xff] }
 0x268   : > { %v994_v3 = vpop.permute.xlu1 %993  ;;  %v1210_v40 = vpop.permute.xlu0 %1209 }
 0x269   : > { %v1521_v39 = vsel %vm1504_vm9, %v1488_v63, %v1210_v40 }
 0x26a   : > { %2091 = vmatmul.msk.f32.vlgmr.msra.gmra.mxu2 %vm1546_vm10, %v1521_v39 }
 0x26d   : > { %1109 = vrot.lane.b32.xlu2 %v4663_v6, %s2200_s26 }
 0x26e   : > { %1013 = vrot.lane.b32.xlu1 %v2179_v58, %s2201_s27  ;;  %1229 = vrot.lane.b32.xlu0 %v2814_v38, %s2202_s28  ;;  %v1344_v38 = vsel %vm1339_vm4, %v1311_v28, %v4668_v36  ;;  %v4677_v28 = vld [vmem:[#allocation90_spill] sm:$0xff] }
 0x26f   : > { %v3822_v32 = vpop.permute.xlu2 %1021  ;;  %v1377_v52 = vsel %vm1372_vm5, %v1344_v38, %v4670_v17  ;;  %v1318_v23 = vsel %vm1306_vm3, %v1285_v27, %v4677_v28  ;;  %v4681_v38 = vld [vmem:[#allocation72_spill] sm:$0xff]  ;;  %v2183_v27 = vld [vmem:[%s2242_s20 + $0x140] sm:$0xff]  ;;  %v4690_v28 = vld [vmem:[#allocation135_spill] sm:$0xff] }
 0x270   : > { %v1102_v44 = vpop.permute.xlu1 %1101  ;;  %v1090_v8 = vpop.permute.xlu0 %1089  ;;  %v1410_v60 = vsel %vm1405_vm6, %v1377_v52, %v3325_v19  ;;  %v1351_v36 = vsel %vm1339_vm4, %v1318_v23, %v4678_v31 }
 0x271   : > { %v1443_v63 = vsel %vm1438_vm7, %v1410_v60, %v994_v3  ;;  %v1482_v39 = vsel %vm1471_vm8, %v1449_v12, %v1102_v44  ;;  %v1456_v3 = vsel %vm1438_vm7, %v3460_v47, %v3765_v18  ;;  %v4679_v47 = vld [vmem:[#allocation13_spill] sm:$0xff]  ;;  %v4680_v18 = vld [vmem:[#allocation36_spill] sm:$0xff]  ;;  %v4683_v60 = vld [vmem:[#allocation86_spill] sm:$0xff] }
 0x272   : > { %v1476_v6 = vsel %vm1471_vm8, %v1443_v63, %v1090_v8  ;;  %v1489_v8 = vsel %vm1471_vm8, %v1456_v3, %v1116_v43  ;;  %v1384_v43 = vsel %vm1372_vm5, %v1351_v36, %v4680_v18  ;;  %v4684_v12 = vld [vmem:[#allocation110_spill] sm:$0xff]  ;;  %v1457_v3 = vsel %vm1438_vm7, %v3344_v30, %v3822_v32  ;;  %v4691_v18 = vld [vmem:[#allocation63_spill] sm:$0xff] }
 0x273   : > { %v1417_v4 = vsel %vm1405_vm6, %v1384_v43, %v3365_v22  ;;  %v4685_v63 = vld [vmem:[#allocation34_spill] sm:$0xff] }
 0x274   : > { %v1450_v0 = vsel %vm1438_vm7, %v1417_v4, %v1008_v62 }
 0x275   : > { %1205 = vrot.lane.b32.xlu2 %v4672_v54, %s2202_s28  ;;  %v1279_v54 = vsel %vm1273_vm2, %v3258_v10, %v4682_v56  ;;  %v2181_v10 = vld [vmem:[%s2242_s20 + $0x180] sm:$0xff] }
 0x276   : > { %1039 = vrot.lane.b32.xlu1 %v3641_v49, %s2201_s27  ;;  %1027 = vrot.lane.b32.xlu0 %v3578_v35, %s2201_s27  ;;  %v4673_v35 = vld [vmem:[#allocation66_spill] sm:$0xff]  ;;  %v1312_v1 = vsel %vm1306_vm3, %v1279_v54, %v4683_v60  ;;  %v4697_v60 = vld [vmem:[#allocation24_spill] sm:$0xff] }
 0x277   : > { %v1200_v40 = vpop.permute.xlu2 %1199  ;;  %v4674_v49 = vld [vmem:[#allocation26_spill] sm:$0xff]  ;;  %v1345_v22 = vsel %vm1339_vm4, %v1312_v1, %v4684_v12 }
 0x278   : > { %v1198_v19 = vpop.permute.xlu1 %1197  ;;  %v1186_v58 = vpop.permute.xlu0 %1185  ;;  %v1378_v62 = vsel %vm1372_vm5, %v1345_v22, %v4685_v63  ;;  %v4695_v56 = vld [vmem:[#allocation134_spill] sm:$0xff] }
 0x279   : > { %v1509_v48 = vsel %vm1504_vm9, %v1476_v6, %v1186_v58  ;;  %v1515_v13 = vsel %vm1504_vm9, %v1482_v39, %v1198_v19  ;;  %v4686_v39 = vld [vmem:[#allocation54_spill] sm:$0xff]  ;;  %v1411_v6 = vsel %vm1405_vm6, %v1378_v62, %v3320_v15  ;;  %v4687_v15 = vld [vmem:[#allocation65_spill] sm:$0xff] }
 0x27a   : > { %2079 = vmatmul.msk.f32.gmra.mxu0 %vm1546_vm10, %v1509_v48  ;;  %2085 = vmatmul.msk.f32.gmra.mxu1 %vm1546_vm10, %v1515_v13 }
 0x27d   : > { %1219 = vrot.lane.b32.xlu2 %v4673_v35, %s2202_s28 }
 0x27e   : > { %1135 = vrot.lane.b32.xlu1 %v4674_v49, %s2200_s26  ;;  %1123 = vrot.lane.b32.xlu0 %v4675_v59, %s2200_s26  ;;  %v4688_v49 = vld [vmem:[#allocation120_spill] sm:$0xff] }
 0x27f   : > { %v1214_v44 = vpop.permute.xlu2 %1213 }
 0x280   : > { %v996_v50 = vpop.permute.xlu1 %995  ;;  %v1212_v37 = vpop.permute.xlu0 %1211 }
 0x281   : > { %v1522_v51 = vsel %vm1504_vm9, %v1489_v8, %v1212_v37 }
 0x282   : > { %2092 = vmatmul.msk.f32.gmra.mxu2 %vm1546_vm10, %v1522_v51 }
 0x285   : > { %1111 = vrot.lane.b32.xlu2 %v4679_v47, %s2200_s26  ;;  %v2184_v47 = vld [vmem:[%s2242_s20 + $0x90] sm:$0xff] }
 0x286   : > { %1015 = vrot.lane.b32.xlu1 %v3478_v5, %s2201_s27  ;;  %1231 = vrot.lane.b32.xlu0 %v4681_v38, %s2202_s28  ;;  %v1286_v43 = vsel %vm1273_vm2, %v2184_v47, %v4691_v18  ;;  %v4692_v38 = vld [vmem:[#allocation83_spill] sm:$0xff] }
 0x287   : > { %v1010_v61 = vpop.permute.xlu2 %1009  ;;  %v1319_v4 = vsel %vm1306_vm3, %v1286_v43, %v4692_v38 }
 0x288   : > { %v1104_v17 = vpop.permute.xlu1 %1103  ;;  %v1092_v52 = vpop.permute.xlu0 %1091 }
 0x289   : > { %v1483_v16 = vsel %vm1471_vm8, %v1450_v0, %v1104_v17  ;;  %v4693_v0 = vld [vmem:[#allocation114_spill] sm:$0xff]  ;;  %v266_v17 = vld [vmem:[%s2242_s20 + $0x198] sm:$0xff] }
 0x28a   : > { %v1516_v5 = vsel %vm1504_vm9, %v1483_v16, %v1200_v40  ;;  %v1444_v40 = vsel %vm1438_vm7, %v1411_v6, %v996_v50  ;;  %v4694_v16 = vld [vmem:[#allocation64_spill] sm:$0xff]  ;;  %v495_v1 = vrot.slane %v266_v17, 1 }
 0x28b   : > { %2086 = vmatmul.msk.f32.gmra.mxu1 %vm1546_vm10, %v1516_v5  ;;  %v1477_v58 = vsel %vm1471_vm8, %v1444_v40, %v1092_v52  ;;  %v267_v52 = vld [vmem:[%s2242_s20 + $0x1a0] sm:$0xff]  ;;  %v4696_v5 = vld [vmem:[#allocation119_spill] sm:$0xff] }
 0x28c   : > { %v496_v12 = vrot.slane %v267_v52, 1  ;;  %v2185_v40 = vld [vmem:[%s2242_s20 + $0x48] sm:$0xff] }
 0x28d   : > { %1207 = vrot.lane.b32.xlu2 %v4686_v39, %s2202_s28 }
 0x28e   : > { %1041 = vrot.lane.b32.xlu1 %v2181_v10, %s2201_s27  ;;  %1029 = vrot.lane.b32.xlu0 %v3572_v41, %s2201_s27  ;;  %v4689_v41 = vld [vmem:[#allocation19_spill] sm:$0xff] }
 0x28f   : > { %v3912_v19 = vpop.permute.xlu2 %1023 }
 0x290   : > { %v1188_v48 = vpop.permute.xlu1 %1187  ;;  %v1034_v13 = vpop.permute.xlu0 %1033 }
 0x291   : > { %v1510_v35 = vsel %vm1504_vm9, %v1477_v58, %v1188_v48  ;;  %v1463_v30 = vsel %vm1438_vm7, %v3406_v21, %v1034_v13  ;;  %v1352_v21 = vsel %vm1339_vm4, %v1319_v4, %v4693_v0  ;;  %v4698_v58 = vld [vmem:[#allocation52_spill] sm:$0xff]  ;;  %v1458_v4 = vsel %vm1438_vm7, %v3523_v46, %v3912_v19 }
 0x292   : > { %2080 = vmatmul.msk.f32.gmra.mxu0 %vm1546_vm10, %v1510_v35  ;;  %v1385_v54 = vsel %vm1372_vm5, %v1352_v21, %v4695_v56  ;;  %v1280_v48 = vsel %vm1273_vm2, %v2185_v40, %v4698_v58  ;;  %v497_v35 = vsel %vm317_vm0, %v495_v1, %v496_v12 }
 0x293   : > { %v1418_v22 = vsel %vm1405_vm6, %v1385_v54, %v3300_v42  ;;  %v4700_v42 = vld [vmem:[#allocation109_spill] sm:$0xff] }
 0x294   : > { %v1451_v63 = vsel %vm1438_vm7, %v1418_v22, %v1010_v61 }
 0x295   : > { %1221 = vrot.lane.b32.xlu2 %v4687_v15, %s2202_s28  ;;  %v4699_v15 = vld [vmem:[#allocation77_spill] sm:$0xff] }
 0x296   : > { %1137 = vrot.lane.b32.xlu1 %v4688_v49, %s2200_s26  ;;  %1125 = vrot.lane.b32.xlu0 %v4689_v41, %s2200_s26  ;;  %v1313_v49 = vsel %vm1306_vm3, %v1280_v48, %v4699_v15  ;;  %v4701_v41 = vld [vmem:[#allocation132_spill] sm:$0xff] }
 0x297   : > { %v1202_v59 = vpop.permute.xlu2 %1201  ;;  %v1346_v61 = vsel %vm1339_vm4, %v1313_v49, %v4700_v42 }
 0x298   : > { %v1130_v8 = vpop.permute.xlu1 %1129  ;;  %v1118_v50 = vpop.permute.xlu0 %1117 }
 0x299   : > { %v1490_v37 = vsel %vm1471_vm8, %v1457_v3, %v1118_v50  ;;  %v1379_v3 = vsel %vm1372_vm5, %v1346_v61, %v4701_v41  ;;  %v4702_v50 = vld [vmem:[#allocation137_spill] sm:$0xff]  ;;  %v2186_v61 = vld [vmem:[%s2242_s20 + $0x50] sm:$0xff]  ;;  %v4704_v41 = vld [vmem:[#allocation51_spill] sm:$0xff] }
 0x29a   : > { %v1523_v51 = vsel %vm1504_vm9, %v1490_v37, %v1214_v44  ;;  %v1496_v44 = vsel %vm1471_vm8, %v1463_v30, %v1130_v8  ;;  %v268_v8 = vld [vmem:[%s2242_s20 + $0x1a8] sm:$0x3]  ;;  %v4703_v37 = vld [vmem:[#allocation136_spill] sm:$0xff] }
 0x29b   : > { %2093 = vmatmul.msk.f32.gmra.mxu2 %vm1546_vm10, %v1523_v51  ;;  %v498_v51 = vrot.slane %v268_v8, 1  ;;  %v503_v38 = vrot.slane %v268_v8, 2 }
 0x29d   : > { %1043 = vrot.lane.b32.xlu2 %v2182_v53, %s2201_s27  ;;  %v499_v47 = vsel %vm317_vm0, %v496_v12, %v498_v51 }
 0x29e   : > { %1031 = vrot.lane.b32.xlu1 %v2183_v27, %s2201_s27  ;;  %1233 = vrot.lane.b32.xlu0 %v4690_v28, %s2202_s28  ;;  %v500_v27 = vrot.slane %v266_v17, 2  ;;  %v501_v28 = vrot.slane %v267_v52, 2 }
 0x29f   : > { %v3937_v32 = vpop.permute.xlu2 %1215 }
 0x2a0   : > { %v998_v23 = vpop.permute.xlu1 %997  ;;  %v1226_v31 = vpop.permute.xlu0 %1225  ;;  %v502_v43 = vsel %vm398_vm1, %v500_v27, %v501_v28  ;;  %v4707_v27 = vld [vmem:[#allocation131_spill] sm:$0xff] }
 0x2a1   : > { %v1529_v36 = vsel %vm1504_vm9, %v1496_v44, %v1226_v31 }
 0x2a2   : > { %2099 = vmatmul.msk.f32.vlgmr.msra.gmra.mxu3 %vm1546_vm10, %v1529_v36 }
 0x2a5   : > { %1223 = vrot.lane.b32.xlu2 %v4694_v16, %s2202_s28 }
 0x2a6   : > { %1139 = vrot.lane.b32.xlu1 %v4696_v5, %s2200_s26  ;;  %1127 = vrot.lane.b32.xlu0 %v4697_v60, %s2200_s26 }
 0x2a7   : > { %v1012_v10 = vpop.permute.xlu2 %1011 }
 0x2a8   : > { %v1106_v62 = vpop.permute.xlu1 %1105  ;;  %v1094_v39 = vpop.permute.xlu0 %1093  ;;  %v1452_v58 = vsel %vm1438_vm7, %v3412_v2, %v1012_v10 }
 0x2a9   : > { %v1484_v6 = vsel %vm1471_vm8, %v1451_v63, %v1106_v62 }
 0x2aa   : > { %v1517_v13 = vsel %vm1504_vm9, %v1484_v6, %v1202_v59  ;;  %v1412_v59 = vsel %vm1405_vm6, %v1379_v3, %v4702_v50  ;;  %v1281_v3 = vsel %vm1273_vm2, %v2186_v61, %v4704_v41 }
 0x2ab   : > { %2087 = vmatmul.msk.f32.gmra.mxu1 %vm1546_vm10, %v1517_v13  ;;  %v1445_v53 = vsel %vm1438_vm7, %v1412_v59, %v998_v23  ;;  %v4705_v59 = vld [vmem:[#allocation89_spill] sm:$0xff] }
 0x2ac   : > { %v1478_v30 = vsel %vm1471_vm8, %v1445_v53, %v1094_v39  ;;  %v1314_v2 = vsel %vm1306_vm3, %v1281_v3, %v4705_v59 }
 0x2ad   : > { %1141 = vrot.lane.b32.xlu2 %v497_v35, %s2200_s26 }
 0x2ae   : > { %1045 = vrot.lane.b32.xlu1 %v266_v17, %s2201_s27  ;;  %1235 = vrot.lane.b32.xlu0 %v4703_v37, %s2202_s28  ;;  %v4706_v37 = vld [vmem:[#allocation2_spill] sm:$0xff] }
 0x2af   : > { %v3988_v18 = vpop.permute.xlu2 %1025  ;;  %v1347_v51 = vsel %vm1339_vm4, %v1314_v2, %v4706_v37 }
 0x2b0   : > { %v1190_v44 = vpop.permute.xlu1 %1189  ;;  %v1036_v31 = vpop.permute.xlu0 %1035 }
 0x2b1   : > { %v1511_v36 = vsel %vm1504_vm9, %v1478_v30, %v1190_v44  ;;  %v1464_v46 = vsel %vm1438_vm7, %v3607_v14, %v1036_v31 }
 0x2b2   : > { %2081 = vmatmul.msk.f32.gmra.mxu0 %vm1546_vm10, %v1511_v36 }
 0x2b5   : > { %1143 = vrot.lane.b32.xlu2 %v499_v47, %s2200_s26 }
 0x2b6   : > { %1047 = vrot.lane.b32.xlu1 %v267_v52, %s2201_s27  ;;  %1237 = vrot.lane.b32.xlu0 %v502_v43, %s2202_s28  ;;  %v504_v52 = vsel %vm398_vm1, %v501_v28, %v503_v38  ;;  %v1380_v28 = vsel %vm1372_vm5, %v1347_v51, %v4707_v27  ;;  %s211_s27 = scalar_lea.vmem %s4302_s3, %s4709_s16 }
 0x2b7   : > { %v1660_v23 = vpop.f32.mrf.mxu0  ;;  %v1204_v56 = vpop.permute.xlu2 %1203  ;;  %v1413_v30 = vsel %vm1405_vm6, %v1380_v28, %v3346_v57  ;;  %v1459_v57 = vsel %vm1438_vm7, %v3520_v9, %v3988_v18 }
 0x2b8   : > { %1757 = vst.msk [vmem:[%s3994_s30] sm:$0xff] %vm1756_vm11, %v1660_v23  ;;  %v1132_v0 = vpop.permute.xlu1 %1131  ;;  %v1120_v21 = vpop.permute.xlu0 %1119  ;;  %v1860_v54 = vmul.f32 %v1660_v23, %v1660_v23  ;;  %v1789_v5 = vsel %vm1756_vm11, %v1660_v23, 0.0 }
 0x2b9   : > { %v1491_v17 = vsel %vm1471_vm8, %v1458_v4, %v1120_v21  ;;  %v1497_v60 = vsel %vm1471_vm8, %v1464_v46, %v1132_v0 }
 0x2ba   : > { %v1524_v16 = vsel %vm1504_vm9, %v1491_v17, %v3937_v32  ;;  %v1892_v39 = vsel %vm1756_vm11, %v1860_v54, 0.0 }
 0x2bb   : > { %2094 = vmatmul.msk.f32.gmra.mxu2 %vm1546_vm10, %v1524_v16 }
 0x2be   : > { %1239 = vrot.lane.b32.xlu0 %v504_v52, %s2202_s28 }
 0x2bf   : > { %v1663_v19 = vpop.f32.mrf.mxu0  ;;  %v1218_v40 = vpop.permute.xlu2 %1217 }
 0x2c0   : > { %1758 = vst.msk [vmem:[%s3994_s30 + $0x8] sm:$0xff] %vm1756_vm11, %v1663_v19  ;;  %v1790_v32 = vsel %vm1756_vm11, %v1663_v19, 0.0  ;;  %v1861_v1 = vmul.f32 %v1663_v19, %v1663_v19  ;;  %v1000_v12 = vpop.permute.xlu1 %999  ;;  %v1228_v22 = vpop.permute.xlu0 %1227 }
 0x2c1   : > { %v1791_v63 = vadd.f32 %v1790_v32, %v1789_v5  ;;  %v1530_v62 = vsel %vm1504_vm9, %v1497_v60, %v1228_v22  ;;  %v1446_v44 = vsel %vm1438_vm7, %v1413_v30, %v1000_v12 }
 0x2c2   : > { %v1893_v14 = vsel %vm1756_vm11, %v1861_v1, 0.0  ;;  %2100 = vmatmul.msk.f32.gmra.mxu3 %vm1546_vm10, %v1530_v62 }
 0x2c3   : > { %v1894_v6 = vadd.f32 %v1893_v14, %v1892_v39 }
 0x2c7   : > { %v1110_v38 = vpop.permute.xlu2 %1109 }
 0x2c8   : > { %v1108_v48 = vpop.permute.xlu1 %1107  ;;  %v1666_v13 = vpop.f32.mrf.mxu0 }
 0x2c9   : > { %v1485_v35 = vsel %vm1471_vm8, %v1452_v58, %v1108_v48  ;;  %1759 = vst.msk [vmem:[%s3994_s30 + $0x10] sm:$0xff] %vm1756_vm11, %v1666_v13  ;;  %v1792_v15 = vsel %vm1756_vm11, %v1666_v13, 0.0  ;;  %v1862_v49 = vmul.f32 %v1666_v13, %v1666_v13  ;;  %v1096_v42 = vpop.permute.xlu0 %1095 }
 0x2ca   : > { %v1793_v8 = vadd.f32 %v1792_v15, %v1791_v63  ;;  %v1518_v50 = vsel %vm1504_vm9, %v1485_v35, %v1204_v56  ;;  %v1479_v36 = vsel %vm1471_vm8, %v1446_v44, %v1096_v42 }
 0x2cb   : > { %v1895_v10 = vsel %vm1756_vm11, %v1862_v49, 0.0  ;;  %2088 = vmatmul.msk.f32.gmra.mxu1 %vm1546_vm10, %v1518_v50 }
 0x2cc   : > { %v1896_v53 = vadd.f32 %v1895_v10, %v1894_v6 }
 0x2cf   : > { %v4042_v31 = vpop.f32.mrf.mxu1  ;;  %v1206_v16 = vpop.permute.xlu2 %1205 }
 0x2d0   : > { %1765 = vst.msk [vmem:[%s3994_s30 + $0x40] sm:$0xff] %vm1756_vm11, %v4042_v31  ;;  %v1192_v47 = vpop.permute.xlu1 %1191 }
 0x2d1   : > { %v1038_v43 = vpop.permute.xlu0 %1037  ;;  %v1512_v23 = vsel %vm1504_vm9, %v1479_v36, %v1192_v47 }
 0x2d2   : > { %2082 = vmatmul.msk.f32.gmra.mxu0 %vm1546_vm10, %v1512_v23  ;;  %v1465_v54 = vsel %vm1438_vm7, %v3604_v11, %v1038_v43 }
 0x2d7   : > { %v1220_v62 = vpop.permute.xlu2 %1219 }
 0x2d8   : > { %v1134_v4 = vpop.permute.xlu1 %1133 }
 0x2d9   : > { %v1122_v0 = vpop.permute.xlu0 %1121  ;;  %v1498_v18 = vsel %vm1471_vm8, %v1465_v54, %v1134_v4 }
 0x2da   : > { %v1492_v21 = vsel %vm1471_vm8, %v1459_v57, %v1122_v0 }
 0x2db   : > { %v1525_v17 = vsel %vm1504_vm9, %v1492_v21, %v1218_v40 }
 0x2dc   : > { %2095 = vmatmul.msk.f32.gmra.mxu2 %vm1546_vm10, %v1525_v17 }
 0x2df   : > { %v1669_v52 = vpop.f32.mrf.mxu0  ;;  %v4056_v56 = vpop.f32.mrf.mxu1 }
 0x2e0   : > { %1760 = vst.msk [vmem:[%s3994_s30 + $0x18] sm:$0xff] %vm1756_vm11, %v1669_v52  ;;  %v1794_v46 = vsel %vm1756_vm11, %v1669_v52, 0.0  ;;  %v1863_v19 = vmul.f32 %v1669_v52, %v1669_v52  ;;  %v1014_v9 = vpop.permute.xlu1 %1013 }
 0x2e1   : > { %v1795_v5 = vadd.f32 %v1794_v46, %v1793_v8  ;;  %1766 = vst.msk [vmem:[%s3994_s30 + $0x48] sm:$0xff] %vm1756_vm11, %v4056_v56  ;;  %v1453_v60 = vsel %vm1438_vm7, %v3409_v29, %v1014_v9  ;;  %v1230_v32 = vpop.permute.xlu0 %1229  ;;  %v1112_v29 = vpop.permute.xlu2 %1111 }
 0x2e2   : > { %v1897_v1 = vsel %vm1756_vm11, %v1863_v19, 0.0  ;;  %v1531_v11 = vsel %vm1504_vm9, %v1498_v18, %v1230_v32  ;;  %v1486_v12 = vsel %vm1471_vm8, %v1453_v60, %v1110_v38 }
 0x2e3   : > { %v1898_v22 = vadd.f32 %v1897_v1, %v1896_v53  ;;  %2101 = vmatmul.msk.f32.gmra.mxu3 %vm1546_vm10, %v1531_v11  ;;  %v1519_v63 = vsel %vm1504_vm9, %v1486_v12, %v1206_v16 }
 0x2e4   : > { %2089 = vmatmul.msk.f32.gmra.mxu1 %vm1546_vm10, %v1519_v63 }
 0x2e8   : > { %v1040_v39 = vpop.permute.xlu1 %1039 }
 0x2e9   : > { %v1028_v14 = vpop.permute.xlu0 %1027  ;;  %v1466_v42 = vsel %vm1438_vm7, %v3454_v45, %v1040_v39  ;;  %v1208_v2 = vpop.permute.xlu2 %1207 }
 0x2ea   : > { %v1460_v58 = vsel %vm1438_vm7, %v3368_v24, %v1028_v14 }
 0x2ed   : > { %v4075_v6 = vpop.f32.mrf.mxu2 }
 0x2ee   : > { %1773 = vst.msk [vmem:[%s3994_s30 + $0x80] sm:$0xff] %vm1756_vm11, %v4075_v6 }
 0x2f0   : > { %v1136_v40 = vpop.permute.xlu1 %1135 }
 0x2f1   : > { %v1124_v48 = vpop.permute.xlu0 %1123  ;;  %v1499_v24 = vsel %vm1471_vm8, %v1466_v42, %v1136_v40  ;;  %v1222_v30 = vpop.permute.xlu2 %1221 }
 0x2f2   : > { %v1493_v13 = vsel %vm1471_vm8, %v1460_v58, %v1124_v48 }
 0x2f3   : > { %v1526_v35 = vsel %vm1504_vm9, %v1493_v13, %v1220_v62 }
 0x2f4   : > { %2096 = vmatmul.msk.f32.gmra.mxu2 %vm1546_vm10, %v1526_v35 }
 0x2f7   : > { %v1672_v15 = vpop.f32.mrf.mxu0  ;;  %v4085_v49 = vpop.f32.mrf.mxu1 }
 0x2f8   : > { %1761 = vst.msk [vmem:[%s3994_s30 + $0x20] sm:$0xff] %vm1756_vm11, %v1672_v15  ;;  %v1796_v61 = vsel %vm1756_vm11, %v1672_v15, 0.0  ;;  %v1864_v41 = vmul.f32 %v1672_v15, %v1672_v15  ;;  %v1016_v3 = vpop.permute.xlu1 %1015 }
 0x2f9   : > { %v1797_v8 = vadd.f32 %v1796_v61, %v1795_v5  ;;  %1767 = vst.msk [vmem:[%s3994_s30 + $0x50] sm:$0xff] %vm1756_vm11, %v4085_v49  ;;  %v1454_v50 = vsel %vm1438_vm7, %v3323_v25, %v1016_v3  ;;  %v1232_v59 = vpop.permute.xlu0 %1231  ;;  %v1044_v57 = vpop.permute.xlu2 %1043 }
 0x2fa   : > { %v1899_v45 = vsel %vm1756_vm11, %v1864_v41, 0.0  ;;  %v1532_v10 = vsel %vm1504_vm9, %v1499_v24, %v1232_v59  ;;  %v1487_v37 = vsel %vm1471_vm8, %v1454_v50, %v1112_v29  ;;  %v1468_v12 = vsel %vm1438_vm7, %v3635_v20, %v1044_v57 }
 0x2fb   : > { %v1900_v51 = vadd.f32 %v1899_v45, %v1898_v22  ;;  %2102 = vmatmul.msk.f32.gmra.mxu3 %vm1546_vm10, %v1532_v10  ;;  %v1520_v53 = vsel %vm1504_vm9, %v1487_v37, %v1208_v2  ;;  %v1868_v37 = vmul.f32 %v4042_v31, %v4042_v31 }
 0x2fc   : > { %2090 = vmatmul.msk.f32.gmra.mxu1 %vm1546_vm10, %v1520_v53 }
 0x300   : > { %v1042_v27 = vpop.permute.xlu1 %1041 }
 0x301   : > { %v1030_v28 = vpop.permute.xlu0 %1029  ;;  %v1467_v0 = vsel %vm1438_vm7, %v3638_v7, %v1042_v27  ;;  %v1224_v7 = vpop.permute.xlu2 %1223 }
 0x302   : > { %v1461_v47 = vsel %vm1438_vm7, %v3569_v33, %v1030_v28  ;;  %v1804_v28 = vsel %vm1756_vm11, %v4042_v31, 0.0  ;;  %v1808_v31 = vsel %vm1756_vm11, %v4085_v49, 0.0 }
 0x305   : > { %v4104_v25 = vpop.f32.mrf.mxu2 }
 0x306   : > { %1774 = vst.msk [vmem:[%s3994_s30 + $0x88] sm:$0xff] %vm1756_vm11, %v4104_v25 }
 0x308   : > { %v1138_v44 = vpop.permute.xlu1 %1137  ;;  %v4109_v36 = vpop.f32.mrf.mxu1 }
 0x309   : > { %1768 = vst.msk [vmem:[%s3994_s30 + $0x58] sm:$0xff] %vm1756_vm11, %v4109_v36  ;;  %v1126_v43 = vpop.permute.xlu0 %1125  ;;  %v1500_v16 = vsel %vm1471_vm8, %v1467_v0, %v1138_v44  ;;  %v1142_v39 = vpop.permute.xlu2 %1141 }
 0x30a   : > { %v1494_v23 = vsel %vm1471_vm8, %v1461_v47, %v1126_v43 }
 0x30b   : > { %v1527_v38 = vsel %vm1504_vm9, %v1494_v23, %v1222_v30  ;;  %v1869_v30 = vmul.f32 %v4056_v56, %v4056_v56  ;;  %v1907_v23 = vsel %vm1756_vm11, %v1868_v37, 0.0 }
 0x30c   : > { %2097 = vmatmul.msk.f32.gmra.mxu2 %vm1546_vm10, %v1527_v38  ;;  %v1806_v38 = vsel %vm1756_vm11, %v4056_v56, 0.0  ;;  %v1810_v56 = vsel %vm1756_vm11, %v4109_v36, 0.0 }
 0x30f   : > { %v1675_v4 = vpop.f32.mrf.mxu0 }
 0x310   : > { %1762 = vst.msk [vmem:[%s3994_s30 + $0x28] sm:$0xff] %vm1756_vm11, %v1675_v4  ;;  %v1798_v21 = vsel %vm1756_vm11, %v1675_v4, 0.0  ;;  %v1865_v33 = vmul.f32 %v1675_v4, %v1675_v4  ;;  %v1032_v17 = vpop.permute.xlu1 %1031  ;;  %v1870_v4 = vmul.f32 %v4085_v49, %v4085_v49 }
 0x311   : > { %v1799_v52 = vadd.f32 %v1798_v21, %v1797_v8  ;;  %v1234_v54 = vpop.permute.xlu0 %1233  ;;  %v1462_v5 = vsel %vm1438_vm7, %v3566_v55, %v1032_v17  ;;  %v1909_v21 = vsel %vm1756_vm11, %v1869_v30, 0.0 }
 0x312   : > { %v1901_v46 = vsel %vm1756_vm11, %v1865_v33, 0.0  ;;  %v1533_v19 = vsel %vm1504_vm9, %v1500_v16, %v1234_v54  ;;  %v1871_v33 = vmul.f32 %v4109_v36, %v4109_v36 }
 0x313   : > { %v1902_v9 = vadd.f32 %v1901_v46, %v1900_v51  ;;  %2103 = vmatmul.msk.f32.gmra.mxu3 %vm1546_vm10, %v1533_v19 }
 0x318   : > { %v1140_v18 = vpop.permute.xlu1 %1139 }
 0x319   : > { %v1128_v60 = vpop.permute.xlu0 %1127  ;;  %v1501_v22 = vsel %vm1471_vm8, %v1468_v12, %v1140_v18 }
 0x31a   : > { %v1495_v32 = vsel %vm1471_vm8, %v1462_v5, %v1128_v60 }
 0x31b   : > { %v1528_v1 = vsel %vm1504_vm9, %v1495_v32, %v1224_v7 }
 0x31c   : > { %2098 = vmatmul.msk.f32.gmra.mxu2 %vm1546_vm10, %v1528_v1 }
 0x31e   : > { %v4133_v11 = vpop.f32.mrf.mxu2 }
 0x31f   : > { %1775 = vst.msk [vmem:[%s3994_s30 + $0x90] sm:$0xff] %vm1756_vm11, %v4133_v11 }
 0x320   : > { %v1046_v55 = vpop.permute.xlu1 %1045 }
 0x321   : > { %v1236_v63 = vpop.permute.xlu0 %1235  ;;  %v1469_v29 = vsel %vm1438_vm7, %v3514_v26, %v1046_v55  ;;  %v1144_v26 = vpop.permute.xlu2 %1143 }
 0x322   : > { %v1534_v62 = vsel %vm1504_vm9, %v1501_v22, %v1236_v63  ;;  %v1502_v20 = vsel %vm1471_vm8, %v1469_v29, %v1142_v39 }
 0x323   : > { %2104 = vmatmul.msk.f32.gmra.mxu3 %vm1546_vm10, %v1534_v62 }
 0x325   : > { %v4143_v14 = vpop.f32.mrf.mxu3 }
 0x326   : > { %1781 = vst.msk [vmem:[%s3994_s30 + $0xc0] sm:$0xff] %vm1756_vm11, %v4143_v14 }
 0x328   : > { %v1696_v40 = vpop.f32.mrf.mxu1  ;;  %v1048_v13 = vpop.permute.xlu1 %1047 }
 0x329   : > { %1769 = vst.msk [vmem:[%s3994_s30 + $0x60] sm:$0xff] %vm1756_vm11, %v1696_v40  ;;  %v1238_v58 = vpop.permute.xlu0 %1237  ;;  %v1470_v35 = vsel %vm1438_vm7, %v3667_v34, %v1048_v13  ;;  %v1872_v54 = vmul.f32 %v1696_v40, %v1696_v40  ;;  %v1812_v49 = vsel %vm1756_vm11, %v1696_v40, 0.0  ;;  %v1876_v13 = vmul.f32 %v4075_v6, %v4075_v6 }
 0x32a   : > { %v1535_v48 = vsel %vm1504_vm9, %v1502_v20, %v1238_v58  ;;  %v1503_v41 = vsel %vm1471_vm8, %v1470_v35, %v1144_v26 }
 0x32b   : > { %2105 = vmatmul.msk.f32.gmra.mxu3 %vm1546_vm10, %v1535_v48  ;;  %v1915_v60 = vsel %vm1756_vm11, %v1872_v54, 0.0 }
 0x32f   : > { %v1678_v15 = vpop.f32.mrf.mxu0 }
 0x330   : > { %1763 = vst.msk [vmem:[%s3994_s30 + $0x30] sm:$0xff] %vm1756_vm11, %v1678_v15  ;;  %v1800_v42 = vsel %vm1756_vm11, %v1678_v15, 0.0  ;;  %v1866_v61 = vmul.f32 %v1678_v15, %v1678_v15 }
 0x331   : > { %v1801_v3 = vadd.f32 %v1800_v42, %v1799_v52  ;;  %v1240_v24 = vpop.permute.xlu0 %1239  ;;  %v1911_v52 = vsel %vm1756_vm11, %v1870_v4, 0.0 }
 0x332   : > { %v1903_v8 = vsel %vm1756_vm11, %v1866_v61, 0.0  ;;  %v1536_v50 = vsel %vm1504_vm9, %v1503_v41, %v1240_v24  ;;  %v1820_v61 = vsel %vm1756_vm11, %v4075_v6, 0.0  ;;  %v1877_v41 = vmul.f32 %v4104_v25, %v4104_v25 }
 0x333   : > { %v1904_v59 = vadd.f32 %v1903_v8, %v1902_v9  ;;  %2106 = vmatmul.msk.f32.gmra.mxu3 %vm1546_vm10, %v1536_v50  ;;  %v1913_v9 = vsel %vm1756_vm11, %v1871_v33, 0.0  ;;  %v1923_v50 = vsel %vm1756_vm11, %v1876_v13, 0.0 }
 0x334   : > { %v1925_v6 = vsel %vm1756_vm11, %v1877_v41, 0.0 }
 0x33e   : > { %v4164_v34 = vpop.f32.mrf.mxu2 }
 0x33f   : > { %1776 = vst.msk [vmem:[%s3994_s30 + $0x98] sm:$0xff] %vm1756_vm11, %v4164_v34 }
 0x345   : > { %v4169_v2 = vpop.f32.mrf.mxu3 }
 0x346   : > { %1782 = vst.msk [vmem:[%s3994_s30 + $0xc8] sm:$0xff] %vm1756_vm11, %v4169_v2 }
 0x348   : > { %v1699_v45 = vpop.f32.mrf.mxu1 }
 0x349   : > { %1770 = vst.msk [vmem:[%s3994_s30 + $0x68] sm:$0xff] %vm1756_vm11, %v1699_v45  ;;  %v1873_v18 = vmul.f32 %v1699_v45, %v1699_v45  ;;  %v1814_v32 = vsel %vm1756_vm11, %v1699_v45, 0.0  ;;  %v1878_v45 = vmul.f32 %v4133_v11, %v4133_v11 }
 0x34b   : > { %v1917_v12 = vsel %vm1756_vm11, %v1873_v18, 0.0  ;;  %v1927_v30 = vsel %vm1756_vm11, %v1878_v45, 0.0  ;;  %v1884_v18 = vmul.f32 %v4143_v14, %v4143_v14 }
 0x34f   : > { %v1681_v10 = vpop.f32.mrf.mxu0 }
 0x350   : > { %1764 = vst.msk [vmem:[%s3994_s30 + $0x38] sm:$0xff] %vm1756_vm11, %v1681_v10  ;;  %v1802_v51 = vsel %vm1756_vm11, %v1681_v10, 0.0  ;;  %v1867_v53 = vmul.f32 %v1681_v10, %v1681_v10 }
 0x351   : > { %v1803_v27 = vadd.f32 %v1802_v51, %v1801_v3 }
 0x352   : > { %v1905_v44 = vsel %vm1756_vm11, %v1867_v53, 0.0  ;;  %v1824_v53 = vsel %vm1756_vm11, %v4133_v11, 0.0 }
 0x353   : > { %v1805_v47 = vadd.f32 %v1804_v28, %v1803_v27  ;;  %v1906_v43 = vadd.f32 %v1905_v44, %v1904_v59  ;;  %v1822_v59 = vsel %vm1756_vm11, %v4104_v25, 0.0  ;;  %v1879_v27 = vmul.f32 %v4164_v34, %v4164_v34 }
 0x354   : > { %v1826_v44 = vsel %vm1756_vm11, %v4164_v34, 0.0 }
 0x355   : > { %v1807_v57 = vadd.f32 %v1806_v38, %v1805_v47  ;;  %v1908_v0 = vadd.f32 %v1907_v23, %v1906_v43  ;;  %v1929_v38 = vsel %vm1756_vm11, %v1879_v27, 0.0 }
 0x357   : > { %v1809_v17 = vadd.f32 %v1808_v31, %v1807_v57  ;;  %v1910_v16 = vadd.f32 %v1909_v21, %v1908_v0 }
 0x359   : > { %v1912_v46 = vadd.f32 %v1911_v52, %v1910_v16  ;;  %v1811_v19 = vadd.f32 %v1810_v56, %v1809_v17 }
 0x35b   : > { %v1813_v7 = vadd.f32 %v1812_v49, %v1811_v19  ;;  %v1914_v5 = vadd.f32 %v1913_v9, %v1912_v46 }
 0x35d   : > { %v1815_v1 = vadd.f32 %v1814_v32, %v1813_v7  ;;  %v1916_v36 = vadd.f32 %v1915_v60, %v1914_v5 }
 0x35f   : > { %v1720_v22 = vpop.f32.mrf.mxu2  ;;  %v1918_v55 = vadd.f32 %v1917_v12, %v1916_v36  ;;  %v1885_v36 = vmul.f32 %v4169_v2, %v4169_v2 }
 0x360   : > { %1777 = vst.msk [vmem:[%s3994_s30 + $0xa0] sm:$0xff] %vm1756_vm11, %v1720_v22  ;;  %v1880_v47 = vmul.f32 %v1720_v22, %v1720_v22  ;;  %v1828_v4 = vsel %vm1756_vm11, %v1720_v22, 0.0 }
 0x361   : > { %v1702_v63 = vpop.f32.mrf.mxu1 }
 0x362   : > { %1771 = vst.msk [vmem:[%s3994_s30 + $0x70] sm:$0xff] %vm1756_vm11, %v1702_v63  ;;  %v1874_v39 = vmul.f32 %v1702_v63, %v1702_v63  ;;  %v1816_v29 = vsel %vm1756_vm11, %v1702_v63, 0.0  ;;  %v1931_v0 = vsel %vm1756_vm11, %v1880_v47, 0.0  ;;  %v1939_v63 = vsel %vm1756_vm11, %v1884_v18, 0.0 }
 0x363   : > { %v1817_v58 = vadd.f32 %v1816_v29, %v1815_v1  ;;  %v1836_v1 = vsel %vm1756_vm11, %v4143_v14, 0.0  ;;  %v1941_v14 = vsel %vm1756_vm11, %v1885_v36, 0.0 }
 0x364   : > { %v1919_v20 = vsel %vm1756_vm11, %v1874_v39, 0.0  ;;  %v1838_v39 = vsel %vm1756_vm11, %v4169_v2, 0.0 }
 0x365   : > { %v1920_v15 = vadd.f32 %v1919_v20, %v1918_v55 }
 0x366   : > { %v4208_v62 = vpop.f32.mrf.mxu3 }
 0x367   : > { %1783 = vst.msk [vmem:[%s3994_s30 + $0xd0] sm:$0xff] %vm1756_vm11, %v4208_v62  ;;  %v1886_v29 = vmul.f32 %v4208_v62, %v4208_v62 }
 0x377   : > { %v1723_v40 = vpop.f32.mrf.mxu2 }
 0x378   : > { %1778 = vst.msk [vmem:[%s3994_s30 + $0xa8] sm:$0xff] %vm1756_vm11, %v1723_v40  ;;  %v1881_v34 = vmul.f32 %v1723_v40, %v1723_v40  ;;  %v1830_v16 = vsel %vm1756_vm11, %v1723_v40, 0.0 }
 0x379   : > { %v1705_v48 = vpop.f32.mrf.mxu1 }
 0x37a   : > { %1772 = vst.msk [vmem:[%s3994_s30 + $0x78] sm:$0xff] %vm1756_vm11, %v1705_v48  ;;  %v1818_v35 = vsel %vm1756_vm11, %v1705_v48, 0.0  ;;  %v1875_v26 = vmul.f32 %v1705_v48, %v1705_v48  ;;  %v1933_v54 = vsel %vm1756_vm11, %v1881_v34, 0.0 }
 0x37b   : > { %v1819_v42 = vadd.f32 %v1818_v35, %v1817_v58  ;;  %v1840_v58 = vsel %vm1756_vm11, %v4208_v62, 0.0 }
 0x37c   : > { %v1921_v3 = vsel %vm1756_vm11, %v1875_v26, 0.0 }
 0x37d   : > { %v1821_v24 = vadd.f32 %v1820_v61, %v1819_v42  ;;  %v1922_v8 = vadd.f32 %v1921_v3, %v1920_v15  ;;  %v1943_v15 = vsel %vm1756_vm11, %v1886_v29, 0.0 }
 0x37e   : > { %v1741_v10 = vpop.f32.mrf.mxu3 }
 0x37f   : > { %v1823_v37 = vadd.f32 %v1822_v59, %v1821_v24  ;;  %v1924_v51 = vadd.f32 %v1923_v50, %v1922_v8  ;;  %1784 = vst.msk [vmem:[%s3994_s30 + $0xd8] sm:$0xff] %vm1756_vm11, %v1741_v10  ;;  %v1887_v13 = vmul.f32 %v1741_v10, %v1741_v10  ;;  %v1842_v2 = vsel %vm1756_vm11, %v1741_v10, 0.0 }
 0x381   : > { %v1825_v28 = vadd.f32 %v1824_v53, %v1823_v37  ;;  %v1926_v25 = vadd.f32 %v1925_v6, %v1924_v51  ;;  %v1945_v41 = vsel %vm1756_vm11, %v1887_v13, 0.0 }
 0x383   : > { %v1928_v43 = vadd.f32 %v1927_v30, %v1926_v25  ;;  %v1827_v23 = vadd.f32 %v1826_v44, %v1825_v28 }
 0x385   : > { %v1829_v11 = vadd.f32 %v1828_v4, %v1827_v23  ;;  %v1930_v57 = vadd.f32 %v1929_v38, %v1928_v43 }
 0x387   : > { %v1932_v21 = vadd.f32 %v1931_v0, %v1930_v57  ;;  %v1831_v56 = vadd.f32 %v1830_v16, %v1829_v11 }
 0x389   : > { %v1934_v9 = vadd.f32 %v1933_v54, %v1932_v21 }
 0x38f   : > { %v1726_v31 = vpop.f32.mrf.mxu2 }
 0x390   : > { %1779 = vst.msk [vmem:[%s3994_s30 + $0xb0] sm:$0xff] %vm1756_vm11, %v1726_v31  ;;  %v1882_v17 = vmul.f32 %v1726_v31, %v1726_v31  ;;  %v1832_v52 = vsel %vm1756_vm11, %v1726_v31, 0.0 }
 0x391   : > { %v1833_v19 = vadd.f32 %v1832_v52, %v1831_v56 }
 0x392   : > { %v1935_v46 = vsel %vm1756_vm11, %v1882_v17, 0.0 }
 0x393   : > { %v1936_v60 = vadd.f32 %v1935_v46, %v1934_v9 }
 0x396   : > { %v1744_v33 = vpop.f32.mrf.mxu3 }
 0x397   : > { %1785 = vst.msk [vmem:[%s3994_s30 + $0xe0] sm:$0xff] %vm1756_vm11, %v1744_v33  ;;  %v1888_v3 = vmul.f32 %v1744_v33, %v1744_v33  ;;  %v1844_v8 = vsel %vm1756_vm11, %v1744_v33, 0.0 }
 0x399   : > { %v1947_v59 = vsel %vm1756_vm11, %v1888_v3, 0.0 }
 0x39f   : > { %v1729_v49 = vpop.f32.mrf.mxu2 }
 0x3a0   : > { %1780 = vst.msk [vmem:[%s3994_s30 + $0xb8] sm:$0xff] %vm1756_vm11, %v1729_v49  ;;  %v1834_v7 = vsel %vm1756_vm11, %v1729_v49, 0.0  ;;  %v1883_v5 = vmul.f32 %v1729_v49, %v1729_v49 }
 0x3a1   : > { %v1835_v32 = vadd.f32 %v1834_v7, %v1833_v19 }
 0x3a2   : > { %v1937_v12 = vsel %vm1756_vm11, %v1883_v5, 0.0 }
 0x3a3   : > { %v1837_v22 = vadd.f32 %v1836_v1, %v1835_v32  ;;  %v1938_v55 = vadd.f32 %v1937_v12, %v1936_v60 }
 0x3a5   : > { %v1839_v40 = vadd.f32 %v1838_v39, %v1837_v22  ;;  %v1940_v20 = vadd.f32 %v1939_v63, %v1938_v55 }
 0x3a6   : > { %v1747_v48 = vpop.f32.mrf.mxu3 }
 0x3a7   : > { %v1841_v35 = vadd.f32 %v1840_v58, %v1839_v40  ;;  %v1942_v26 = vadd.f32 %v1941_v14, %v1940_v20  ;;  %1786 = vst.msk [vmem:[%s3994_s30 + $0xe8] sm:$0xff] %vm1756_vm11, %v1747_v48  ;;  %v1889_v45 = vmul.f32 %v1747_v48, %v1747_v48  ;;  %v1846_v51 = vsel %vm1756_vm11, %v1747_v48, 0.0 }
 0x3a9   : > { %v1944_v42 = vadd.f32 %v1943_v15, %v1942_v26  ;;  %v1843_v61 = vadd.f32 %v1842_v2, %v1841_v35  ;;  %v1949_v53 = vsel %vm1756_vm11, %v1889_v45, 0.0 }
 0x3ab   : > { %v1946_v24 = vadd.f32 %v1945_v41, %v1944_v42  ;;  %v1845_v62 = vadd.f32 %v1844_v8, %v1843_v61 }
 0x3ad   : > { %v1948_v37 = vadd.f32 %v1947_v59, %v1946_v24  ;;  %v1847_v6 = vadd.f32 %v1846_v51, %v1845_v62 }
 0x3ae   : > { %v1750_v50 = vpop.f32.mrf.mxu3 }
 0x3af   : > { %1787 = vst.msk [vmem:[%s3994_s30 + $0xf0] sm:$0xff] %vm1756_vm11, %v1750_v50  ;;  %v1890_v10 = vmul.f32 %v1750_v50, %v1750_v50  ;;  %v1848_v27 = vsel %vm1756_vm11, %v1750_v50, 0.0  ;;  %v1950_v28 = vadd.f32 %v1949_v53, %v1948_v37 }
 0x3b0   : > { %v1849_v30 = vadd.f32 %v1848_v27, %v1847_v6 }
 0x3b1   : > { %v1951_v25 = vsel %vm1756_vm11, %v1890_v10, 0.0 }
 0x3b2   : > { %v1952_v23 = vadd.f32 %v1951_v25, %v1950_v28 }
 0x3b6   : > { %v1753_v44 = vpop.f32.mrf.mxu3 }
 0x3b7   : > { %1788 = vst.msk [vmem:[%s3994_s30 + $0xf8] sm:$0xff] %vm1756_vm11, %v1753_v44  ;;  %v1850_v47 = vsel %vm1756_vm11, %v1753_v44, 0.0  ;;  %v1891_v43 = vmul.f32 %v1753_v44, %v1753_v44 }
 0x3b8   : > { %v1851_v38 = vadd.f32 %v1850_v47, %v1849_v30 }
 0x3b9   : > { %v1953_v4 = vsel %vm1756_vm11, %v1891_v43, 0.0 }
 0x3ba   : > { %v1852_v11 = vrot.slane %v1851_v38, 4  ;;  %v1954_v57 = vadd.f32 %v1953_v4, %v1952_v23 }
 0x3bc   : > { %v1853_v0 = vadd.f32 %v1852_v11, %v1851_v38  ;;  %v1955_v21 = vrot.slane %v1954_v57, 4 }
 0x3be   : > { %v1854_v31 = vrot.slane %v1853_v0, 2  ;;  %v1956_v33 = vadd.f32 %v1955_v21, %v1954_v57 }
 0x3c0   : > { %v1855_v34 = vadd.f32 %v1854_v31, %v1853_v0  ;;  %v1957_v17 = vrot.slane %v1956_v33, 2 }
 0x3c2   : > { %v1856_v16 = vrot.slane %v1855_v34, 1  ;;  %v1958_v52 = vadd.f32 %v1957_v17, %v1956_v33 }
 0x3c4   : > { %v1857_v56 = vadd.f32 %v1856_v16, %v1855_v34  ;;  %v1959_v54 = vrot.slane %v1958_v52, 1 }
 0x3c6   : > { %1859 = vst.msk [vmem:[%s211_s27] sm:$0x1] %vm1858_vm12, %v1857_v56  ;;  %v1960_v46 = vadd.f32 %v1959_v54, %v1958_v52 }
 0x3c8   : > { %1961 = vst.msk [vmem:[%s214_s6] sm:$0x1] %vm1858_vm12, %v1960_v46 }
 0x3c9 PF: > { %s15_s15 = sadd.s32 1, %s2193_s15  }
 0x3ca   : > { %p12_p4 = scmp.ge.s32.totalorder %s15_s15, 4  }
 0x3cc   :  { %14 = sbr.rel (!%p12_p4) target bundleno = 1 (0x1), region = 82 }

</bundles_post_ra>
